<compile_context>
chip_gen: v7x
topology: tpu7x:2x2x1
jax: 0.10.0
libtpu: 0.0.40
codegen_flags: <defaults>
</compile_context>

<pallas_src>
import functools

import jax
import jax.numpy as jnp
from jax import lax
from jax.experimental import pallas as pl
from jax.experimental.pallas import tpu as pltpu

LANE = 128


def _round_up(x, m):
    return (x + m - 1) // m * m


# ----------------------------------------------------------------------------
# Fused Pallas kernel: the whole residual stack for one batch tile.
# grid = (num_batch_tiles, num_blocks); this body runs once per (tile, block).
# ----------------------------------------------------------------------------
def residual_stack_kernel(x_ref, w1_ref, b1_ref, w2_ref, b2_ref, out_ref,
                          xpad_ref, hpad_ref, colx_ref, colh_ref):
    # x_ref   : (bt, H, W, Cx)      input tile (true channels), f32
    # w1_ref  : (9*Cp, Rp)          conv1 weights, channel-padded, compute dtype
    # b1_ref  : (1, Rp)             conv1 bias, f32
    # w2_ref  : (9*Rp, Cp)          conv2 weights, compute dtype
    # b2_ref  : (1, Cp)             conv2 bias, f32
    # out_ref : (bt, H, W, Cx)      output tile (written at the last block only)
    # xpad_ref: (bt, H+2, W+2, Cp)  resident padded activation (carried across blocks)
    # hpad_ref: (bt, H+2, W+2, Rp)  padded hidden activation
    # colx_ref: (bt*H*W, 9*Cp)      im2col scratch for conv1
    # colh_ref: (bt*H*W, 9*Rp)      im2col scratch for conv2
    blk = pl.program_id(1)
    nblk = pl.num_programs(1)

    bt, H, W, Cx = x_ref.shape
    Cp = xpad_ref.shape[-1]
    Rp = hpad_ref.shape[-1]
    M = bt * H * W
    cdt = colx_ref.dtype

    # ---- once per batch tile: zero halo / channel-pad, load x into interior ----
    @pl.when(blk == 0)
    def _init_tile():
        xpad_ref[...] = jnp.zeros_like(xpad_ref)
        hpad_ref[...] = jnp.zeros_like(hpad_ref)
        xpad_ref[:, 1:H + 1, 1:W + 1, :Cx] = x_ref[...].astype(jnp.float32)

    # ---- conv1: im2col (K = 9*Cp) + single MXU matmul + bias + relu ----
    for ky in range(3):
        for kx in range(3):
            t = 3 * ky + kx
            colx_ref[:, t * Cp:(t + 1) * Cp] = (
                xpad_ref[:, ky:ky + H, kx:kx + W, :].reshape(M, Cp).astype(cdt))
    h = jnp.dot(colx_ref[...], w1_ref[...], preferred_element_type=jnp.float32)
    h = jnp.maximum(h + b1_ref[...], 0.0)
    hpad_ref[:, 1:H + 1, 1:W + 1, :] = h.reshape(bt, H, W, Rp)

    # ---- conv2: im2col (K = 9*Rp) + matmul + bias + residual add + relu ----
    for ky in range(3):
        for kx in range(3):
            t = 3 * ky + kx
            colh_ref[:, t * Rp:(t + 1) * Rp] = (
                hpad_ref[:, ky:ky + H, kx:kx + W, :].reshape(M, Rp).astype(cdt))
    y = jnp.dot(colh_ref[...], w2_ref[...], preferred_element_type=jnp.float32)
    x_center = xpad_ref[:, 1:H + 1, 1:W + 1, :].reshape(M, Cp)
    y = jnp.maximum(y + b2_ref[...] + x_center, 0.0)

    # ---- carry activation to the next block (padded channels stay exactly 0) ----
    xpad_ref[:, 1:H + 1, 1:W + 1, :] = y.reshape(bt, H, W, Cp)

    # ---- last block: write the (true-channel) result back to HBM ----
    @pl.when(blk == nblk - 1)
    def _store_output():
        out_ref[...] = y.reshape(bt, H, W, Cp)[..., :Cx].astype(out_ref.dtype)


# ----------------------------------------------------------------------------
# Wrapper: pack/pad params, build the fused pallas_call.
# ----------------------------------------------------------------------------
def _pack_params(params, Cx, Cr, Cp, Rp, compute_dtype):
    w1_l, b1_l, w2_l, b2_l = [], [], [], []
    for (w1, b1, w2, b2) in params:
        w1p = jnp.zeros((3, 3, Cp, Rp), jnp.float32).at[:, :, :Cx, :Cr].set(
            w1.astype(jnp.float32))
        w2p = jnp.zeros((3, 3, Rp, Cp), jnp.float32).at[:, :, :Cr, :Cx].set(
            w2.astype(jnp.float32))
        b1p = jnp.zeros((Rp,), jnp.float32).at[:Cr].set(b1.astype(jnp.float32))
        b2p = jnp.zeros((Cp,), jnp.float32).at[:Cx].set(b2.astype(jnp.float32))
        # Row ordering of the flattened weights matches the im2col column blocks:
        # row = (3*ky + kx) * Cin_padded + cin.
        w1_l.append(w1p.reshape(9 * Cp, Rp))
        w2_l.append(w2p.reshape(9 * Rp, Cp))
        b1_l.append(b1p.reshape(1, Rp))
        b2_l.append(b2p.reshape(1, Cp))
    return (jnp.stack(w1_l).astype(compute_dtype),
            jnp.stack(b1_l),
            jnp.stack(w2_l).astype(compute_dtype),
            jnp.stack(b2_l))


@functools.partial(jax.jit, static_argnames=("compute_dtype", "batch_tile"))
def residual_stack_forward_nhwc(x_nhwc, params, compute_dtype=jnp.bfloat16,
                                batch_tile=1):
    """Residual stack forward, NHWC in / NHWC out (no layout transposes)."""
    N, H, W, Cx = x_nhwc.shape
    Cr = params[0][0].shape[-1]
    num_blocks = len(params)
    bt = batch_tile
    assert N % bt == 0, "batch must be divisible by batch_tile"

    Cp = _round_up(Cx, LANE)
    Rp = _round_up(Cr, LANE)
    itemsize = jnp.dtype(compute_dtype).itemsize

    w1_all, b1_all, w2_all, b2_all = _pack_params(params, Cx, Cr, Cp, Rp,
                                                  compute_dtype)
    x = x_nhwc.astype(jnp.float32)

    # --- VMEM budget / cost hints ---------------------------------------------
    scratch_bytes = (bt * (H + 2) * (W + 2) * (Cp + Rp) * 4
                     + bt * H * W * 9 * (Cp + Rp) * itemsize)
    io_bytes = (2 * 2 * bt * H * W * Cx * 4
                + 2 * (9 * Cp * Rp + 9 * Rp * Cp) * itemsize
                + 2 * (Rp + Cp) * 4)
    vmem_limit = int(min(48 * 1024 * 1024,
                         max(32 * 1024 * 1024, 2 * (scratch_bytes + io_bytes))))
    flops = 2 * num_blocks * N * H * W * 9 * (Cp * Rp + Rp * Cp)
    bytes_accessed = (2 * N * H * W * Cx * 4
                      + num_blocks * (9 * Cp * Rp + 9 * Rp * Cp) * itemsize
                      + num_blocks * (Rp + Cp) * 4)

    grid = (N // bt, num_blocks)
    return pl.pallas_call(
        residual_stack_kernel,
        out_shape=jax.ShapeDtypeStruct((N, H, W, Cx), jnp.float32),
        grid_spec=pltpu.PrefetchScalarGridSpec(
            num_scalar_prefetch=0,
            grid=grid,
            in_specs=[
                pl.BlockSpec((bt, H, W, Cx), lambda i, b: (i, 0, 0, 0)),
                pl.BlockSpec((None, 9 * Cp, Rp), lambda i, b: (b, 0, 0)),
                pl.BlockSpec((None, 1, Rp), lambda i, b: (b, 0, 0)),
                pl.BlockSpec((None, 9 * Rp, Cp), lambda i, b: (b, 0, 0)),
                pl.BlockSpec((None, 1, Cp), lambda i, b: (b, 0, 0)),
            ],
            out_specs=pl.BlockSpec((bt, H, W, Cx), lambda i, b: (i, 0, 0, 0)),
            scratch_shapes=[
                pltpu.VMEM((bt, H + 2, W + 2, Cp), jnp.float32),
                pltpu.VMEM((bt, H + 2, W + 2, Rp), jnp.float32),
                pltpu.VMEM((bt * H * W, 9 * Cp), compute_dtype),
                pltpu.VMEM((bt * H * W, 9 * Rp), compute_dtype),
            ],
        ),
        compiler_params=pltpu.CompilerParams(
            dimension_semantics=("parallel", "arbitrary"),
            vmem_limit_bytes=vmem_limit,
        ),
        cost_estimate=pl.CostEstimate(flops=flops, transcendentals=0,
                                      bytes_accessed=bytes_accessed),
    )(x, w1_all, b1_all, w2_all, b2_all)


def residual_stack_forward(x_nchw, params, compute_dtype=jnp.bfloat16,
                           batch_tile=1):
    """NCHW in / NCHW out wrapper matching the PyTorch module's convention."""
    x = jnp.transpose(x_nchw, (0, 2, 3, 1))
    y = residual_stack_forward_nhwc(x, params, compute_dtype=compute_dtype,
                                    batch_tile=batch_tile)
    return jnp.transpose(y, (0, 3, 1, 2))


# ----------------------------------------------------------------------------
# Deterministic parameter init (PyTorch-style uniform bounds, HWIO weights)
# ----------------------------------------------------------------------------
def init_params(key, num_blocks, x_channels, residual_channels):
    params = []
    for _ in range(num_blocks):
        key, k1, k2, k3, k4 = jax.random.split(key, 5)
        bnd1 = 1.0 / jnp.sqrt(x_channels * 9)
        bnd2 = 1.0 / jnp.sqrt(residual_channels * 9)
        w1 = jax.random.uniform(k1, (3, 3, x_channels, residual_channels),
                                jnp.float32, -bnd1, bnd1)
        b1 = jax.random.uniform(k2, (residual_channels,), jnp.float32, -bnd1, bnd1)
        w2 = jax.random.uniform(k3, (3, 3, residual_channels, x_channels),
                                jnp.float32, -bnd2, bnd2)
        b2 = jax.random.uniform(k4, (x_channels,), jnp.float32, -bnd2, bnd2)
        params.append((w1, b1, w2, b2))
    return params


# ----------------------------------------------------------------------------
# Pure-JAX reference (correctness check)
# ----------------------------------------------------------------------------
def residual_stack_ref(x_nchw, params):
    x = jnp.transpose(x_nchw, (0, 2, 3, 1)).astype(jnp.float32)
    dn = lax.conv_dimension_numbers(x.shape, (3, 3, 1, 1), ("NHWC", "HWIO", "NHWC"))
    for (w1, b1, w2, b2) in params:
        h = lax.conv_general_dilated(x, w1, (1, 1), "SAME", dimension_numbers=dn) + b1
        h = jax.nn.relu(h)
        y = lax.conv_general_dilated(h, w2, (1, 1), "SAME", dimension_numbers=dn) + b2
        x = jax.nn.relu(y + x)
    return jnp.transpose(x, (0, 3, 1, 2))


if __name__ == "__main__":
    num_blocks = 2
    x_channels = 4
    residual_channels = 8
    N, H, W = 2, 16, 16

    key = jax.random.PRNGKey(0)
    key, kx = jax.random.split(key)
    x = jax.random.normal(kx, (N, x_channels, H, W), jnp.float32)  # NCHW like PyTorch
    params = init_params(key, num_blocks, x_channels, residual_channels)

    ref = residual_stack_ref(x, params)

    # Exact-path check (f32 matmul operands).
    out_f32 = jax.block_until_ready(
        residual_stack_forward(x, params, compute_dtype=jnp.float32))
    assert out_f32.shape == (N, x_channels, H, W)
    assert jnp.allclose(out_f32, ref, atol=1e-4, rtol=1e-4), "f32 mismatch vs reference"

    # Performance default: bf16 matmul operands, f32 accumulation.
    out_bf16 = jax.block_until_ready(
        residual_stack_forward(x, params, compute_dtype=jnp.bfloat16))
    assert out_bf16.shape == (N, x_channels, H, W)
    assert jnp.allclose(out_bf16, ref, atol=2e-2, rtol=2e-2), "bf16 mismatch vs reference"

    print("KERNEL_OK")
</pallas_src>

<mosaic_0001>
module attributes {stable_mosaic.version = 11 : i64} {
  func.func @residual_stack_kernel(%arg0: i32, %arg1: i32, %arg2: memref<1x16x16x4xf32, #tpu.memory_space<vmem>>, %arg3: memref<1x1152x128xf32, #tpu.memory_space<vmem>>, %arg4: memref<1x1x128xf32, #tpu.memory_space<vmem>>, %arg5: memref<1x1152x128xf32, #tpu.memory_space<vmem>>, %arg6: memref<1x1x128xf32, #tpu.memory_space<vmem>>, %arg7: memref<1x16x16x4xf32, #tpu.memory_space<vmem>>, %arg8: memref<1x18x18x128xf32, #tpu.memory_space<vmem>>, %arg9: memref<1x18x18x128xf32, #tpu.memory_space<vmem>>, %arg10: memref<256x1152xf32, #tpu.memory_space<vmem>>, %arg11: memref<256x1152xf32, #tpu.memory_space<vmem>>) attributes {dimension_semantics = [#tpu.dimension_semantics<parallel>, #tpu.dimension_semantics<arbitrary>], iteration_bounds = array<i64: 2, 2>, scalar_prefetch = 0 : i64, scratch_operands = 4 : i64, tpu.core_type = #tpu.core_type<tc>, window_params = [{transform_indices = @transform_0, window_bounds = array<i64: 1, 16, 16, 4>}, {transform_indices = @transform_1, window_bounds = array<i64: 1, 1152, 128>}, {transform_indices = @transform_2, window_bounds = array<i64: 1, 1, 128>}, {transform_indices = @transform_3, window_bounds = array<i64: 1, 1152, 128>}, {transform_indices = @transform_4, window_bounds = array<i64: 1, 1, 128>}, {transform_indices = @transform_5, window_bounds = array<i64: 1, 16, 16, 4>}]} {
    %c0_i32 = arith.constant 0 : i32
    %0 = arith.cmpi eq, %arg1, %c0_i32 : i32
    %1 = arith.extui %0 : i1 to i32
    %c0_i32_0 = arith.constant 0 : i32
    %2 = arith.cmpi ne, %1, %c0_i32_0 : i32
    scf.if %2 {
      %cst_130 = arith.constant 0.000000e+00 : f32
      %87 = vector.broadcast %cst_130 : f32 to vector<1x18x18x128xf32>
      %c0_131 = arith.constant 0 : index
      %c0_132 = arith.constant 0 : index
      %c0_133 = arith.constant 0 : index
      %c0_134 = arith.constant 0 : index
      %88 = vector.load %arg8[%c0_131, %c0_132, %c0_133, %c0_134] : memref<1x18x18x128xf32, #tpu.memory_space<vmem>>, vector<1x18x18x128xf32>
      tpu.vector_store %arg8[%c0_131, %c0_132, %c0_133, %c0_134], %87 {strides = array<i32>} : memref<1x18x18x128xf32, #tpu.memory_space<vmem>>, vector<1x18x18x128xf32>,
      %cst_135 = arith.constant 0.000000e+00 : f32
      %89 = vector.broadcast %cst_135 : f32 to vector<1x18x18x128xf32>
      %c0_136 = arith.constant 0 : index
      %c0_137 = arith.constant 0 : index
      %c0_138 = arith.constant 0 : index
      %c0_139 = arith.constant 0 : index
      %90 = vector.load %arg9[%c0_136, %c0_137, %c0_138, %c0_139] : memref<1x18x18x128xf32, #tpu.memory_space<vmem>>, vector<1x18x18x128xf32>
      tpu.vector_store %arg9[%c0_136, %c0_137, %c0_138, %c0_139], %89 {strides = array<i32>} : memref<1x18x18x128xf32, #tpu.memory_space<vmem>>, vector<1x18x18x128xf32>,
      %c0_140 = arith.constant 0 : index
      %c0_141 = arith.constant 0 : index
      %c0_142 = arith.constant 0 : index
      %c0_143 = arith.constant 0 : index
      %91 = vector.load %arg2[%c0_140, %c0_141, %c0_142, %c0_143] : memref<1x16x16x4xf32, #tpu.memory_space<vmem>>, vector<1x16x16x4xf32>
      %c0_144 = arith.constant 0 : index
      %c1_145 = arith.constant 1 : index
      %c1_146 = arith.constant 1 : index
      %c0_147 = arith.constant 0 : index
      %92 = vector.load %arg8[%c0_144, %c1_145, %c1_146, %c0_147] : memref<1x18x18x128xf32, #tpu.memory_space<vmem>>, vector<1x16x16x4xf32>
      tpu.vector_store %arg8[%c0_144, %c1_145, %c1_146, %c0_147], %91 {strides = array<i32>} : memref<1x18x18x128xf32, #tpu.memory_space<vmem>>, vector<1x16x16x4xf32>,
    } else {
    }
    %c0 = arith.constant 0 : index
    %c0_1 = arith.constant 0 : index
    %c0_2 = arith.constant 0 : index
    %c0_3 = arith.constant 0 : index
    %3 = vector.load %arg8[%c0, %c0_1, %c0_2, %c0_3] : memref<1x18x18x128xf32, #tpu.memory_space<vmem>>, vector<1x16x16x128xf32>
    %4 = vector.shape_cast %3 : vector<1x16x16x128xf32> to vector<256x128xf32>
    %c0_4 = arith.constant 0 : index
    %c0_5 = arith.constant 0 : index
    %5 = vector.load %arg10[%c0_4, %c0_5] : memref<256x1152xf32, #tpu.memory_space<vmem>>, vector<256x128xf32>
    tpu.vector_store %arg10[%c0_4, %c0_5], %4 {strides = array<i32>} : memref<256x1152xf32, #tpu.memory_space<vmem>>, vector<256x128xf32>,
    %c0_6 = arith.constant 0 : index
    %c0_7 = arith.constant 0 : index
    %c1 = arith.constant 1 : index
    %c0_8 = arith.constant 0 : index
    %6 = vector.load %arg8[%c0_6, %c0_7, %c1, %c0_8] : memref<1x18x18x128xf32, #tpu.memory_space<vmem>>, vector<1x16x16x128xf32>
    %7 = vector.shape_cast %6 : vector<1x16x16x128xf32> to vector<256x128xf32>
    %c0_9 = arith.constant 0 : index
    %c128 = arith.constant 128 : index
    %8 = vector.load %arg10[%c0_9, %c128] : memref<256x1152xf32, #tpu.memory_space<vmem>>, vector<256x128xf32>
    tpu.vector_store %arg10[%c0_9, %c128], %7 {strides = array<i32>} : memref<256x1152xf32, #tpu.memory_space<vmem>>, vector<256x128xf32>,
    %c0_10 = arith.constant 0 : index
    %c0_11 = arith.constant 0 : index
    %c2 = arith.constant 2 : index
    %c0_12 = arith.constant 0 : index
    %9 = vector.load %arg8[%c0_10, %c0_11, %c2, %c0_12] : memref<1x18x18x128xf32, #tpu.memory_space<vmem>>, vector<1x16x16x128xf32>
    %10 = vector.shape_cast %9 : vector<1x16x16x128xf32> to vector<256x128xf32>
    %c0_13 = arith.constant 0 : index
    %c256 = arith.constant 256 : index
    %11 = vector.load %arg10[%c0_13, %c256] : memref<256x1152xf32, #tpu.memory_space<vmem>>, vector<256x128xf32>
    tpu.vector_store %arg10[%c0_13, %c256], %10 {strides = array<i32>} : memref<256x1152xf32, #tpu.memory_space<vmem>>, vector<256x128xf32>,
    %c0_14 = arith.constant 0 : index
    %c1_15 = arith.constant 1 : index
    %c0_16 = arith.constant 0 : index
    %c0_17 = arith.constant 0 : index
    %12 = vector.load %arg8[%c0_14, %c1_15, %c0_16, %c0_17] : memref<1x18x18x128xf32, #tpu.memory_space<vmem>>, vector<1x16x16x128xf32>
    %13 = vector.shape_cast %12 : vector<1x16x16x128xf32> to vector<256x128xf32>
    %c0_18 = arith.constant 0 : index
    %c384 = arith.constant 384 : index
    %14 = vector.load %arg10[%c0_18, %c384] : memref<256x1152xf32, #tpu.memory_space<vmem>>, vector<256x128xf32>
    tpu.vector_store %arg10[%c0_18, %c384], %13 {strides = array<i32>} : memref<256x1152xf32, #tpu.memory_space<vmem>>, vector<256x128xf32>,
    %c0_19 = arith.constant 0 : index
    %c1_20 = arith.constant 1 : index
    %c1_21 = arith.constant 1 : index
    %c0_22 = arith.constant 0 : index
    %15 = vector.load %arg8[%c0_19, %c1_20, %c1_21, %c0_22] : memref<1x18x18x128xf32, #tpu.memory_space<vmem>>, vector<1x16x16x128xf32>
    %16 = vector.shape_cast %15 : vector<1x16x16x128xf32> to vector<256x128xf32>
    %c0_23 = arith.constant 0 : index
    %c512 = arith.constant 512 : index
    %17 = vector.load %arg10[%c0_23, %c512] : memref<256x1152xf32, #tpu.memory_space<vmem>>, vector<256x128xf32>
    tpu.vector_store %arg10[%c0_23, %c512], %16 {strides = array<i32>} : memref<256x1152xf32, #tpu.memory_space<vmem>>, vector<256x128xf32>,
    %c0_24 = arith.constant 0 : index
    %c1_25 = arith.constant 1 : index
    %c2_26 = arith.constant 2 : index
    %c0_27 = arith.constant 0 : index
    %18 = vector.load %arg8[%c0_24, %c1_25, %c2_26, %c0_27] : memref<1x18x18x128xf32, #tpu.memory_space<vmem>>, vector<1x16x16x128xf32>
    %19 = vector.shape_cast %18 : vector<1x16x16x128xf32> to vector<256x128xf32>
    %c0_28 = arith.constant 0 : index
    %c640 = arith.constant 640 : index
    %20 = vector.load %arg10[%c0_28, %c640] : memref<256x1152xf32, #tpu.memory_space<vmem>>, vector<256x128xf32>
    tpu.vector_store %arg10[%c0_28, %c640], %19 {strides = array<i32>} : memref<256x1152xf32, #tpu.memory_space<vmem>>, vector<256x128xf32>,
    %c0_29 = arith.constant 0 : index
    %c2_30 = arith.constant 2 : index
    %c0_31 = arith.constant 0 : index
    %c0_32 = arith.constant 0 : index
    %21 = vector.load %arg8[%c0_29, %c2_30, %c0_31, %c0_32] : memref<1x18x18x128xf32, #tpu.memory_space<vmem>>, vector<1x16x16x128xf32>
    %22 = vector.shape_cast %21 : vector<1x16x16x128xf32> to vector<256x128xf32>
    %c0_33 = arith.constant 0 : index
    %c768 = arith.constant 768 : index
    %23 = vector.load %arg10[%c0_33, %c768] : memref<256x1152xf32, #tpu.memory_space<vmem>>, vector<256x128xf32>
    tpu.vector_store %arg10[%c0_33, %c768], %22 {strides = array<i32>} : memref<256x1152xf32, #tpu.memory_space<vmem>>, vector<256x128xf32>,
    %c0_34 = arith.constant 0 : index
    %c2_35 = arith.constant 2 : index
    %c1_36 = arith.constant 1 : index
    %c0_37 = arith.constant 0 : index
    %24 = vector.load %arg8[%c0_34, %c2_35, %c1_36, %c0_37] : memref<1x18x18x128xf32, #tpu.memory_space<vmem>>, vector<1x16x16x128xf32>
    %25 = vector.shape_cast %24 : vector<1x16x16x128xf32> to vector<256x128xf32>
    %c0_38 = arith.constant 0 : index
    %c896 = arith.constant 896 : index
    %26 = vector.load %arg10[%c0_38, %c896] : memref<256x1152xf32, #tpu.memory_space<vmem>>, vector<256x128xf32>
    tpu.vector_store %arg10[%c0_38, %c896], %25 {strides = array<i32>} : memref<256x1152xf32, #tpu.memory_space<vmem>>, vector<256x128xf32>,
    %c0_39 = arith.constant 0 : index
    %c2_40 = arith.constant 2 : index
    %c2_41 = arith.constant 2 : index
    %c0_42 = arith.constant 0 : index
    %27 = vector.load %arg8[%c0_39, %c2_40, %c2_41, %c0_42] : memref<1x18x18x128xf32, #tpu.memory_space<vmem>>, vector<1x16x16x128xf32>
    %28 = vector.shape_cast %27 : vector<1x16x16x128xf32> to vector<256x128xf32>
    %c0_43 = arith.constant 0 : index
    %c1024 = arith.constant 1024 : index
    %29 = vector.load %arg10[%c0_43, %c1024] : memref<256x1152xf32, #tpu.memory_space<vmem>>, vector<256x128xf32>
    tpu.vector_store %arg10[%c0_43, %c1024], %28 {strides = array<i32>} : memref<256x1152xf32, #tpu.memory_space<vmem>>, vector<256x128xf32>,
    %c0_44 = arith.constant 0 : index
    %c0_45 = arith.constant 0 : index
    %30 = vector.load %arg10[%c0_44, %c0_45] : memref<256x1152xf32, #tpu.memory_space<vmem>>, vector<256x1152xf32>
    %c0_46 = arith.constant 0 : index
    %c0_47 = arith.constant 0 : index
    %c0_48 = arith.constant 0 : index
    %31 = vector.load %arg3[%c0_46, %c0_47, %c0_48] : memref<1x1152x128xf32, #tpu.memory_space<vmem>>, vector<1x1152x128xf32>
    %32 = vector.shape_cast %31 : vector<1x1152x128xf32> to vector<1152x128xf32>
    %cst = arith.constant dense<0.000000e+00> : vector<256x128xf32>
    %33 = tpu.matmul %30, %32, %cst {dimension_numbers = #tpu.dot_dimension_numbers<[1], [0], [0], [1], [0, 0, 1, 1], [], []>} : vector<256x1152xf32>, vector<1152x128xf32>, vector<256x128xf32> -> vector<256x128xf32>
    %c0_49 = arith.constant 0 : index
    %c0_50 = arith.constant 0 : index
    %c0_51 = arith.constant 0 : index
    %34 = vector.load %arg4[%c0_49, %c0_50, %c0_51] : memref<1x1x128xf32, #tpu.memory_space<vmem>>, vector<1x1x128xf32>
    %35 = vector.shape_cast %34 : vector<1x1x128xf32> to vector<1x128xf32>
    %36 = vector.broadcast %35 : vector<1x128xf32> to vector<256x128xf32>
    %37 = arith.addf %33, %36 : vector<256x128xf32>
    %cst_52 = arith.constant 0.000000e+00 : f32
    %38 = vector.broadcast %cst_52 : f32 to vector<256x128xf32>
    %39 = arith.maximumf %37, %38 : vector<256x128xf32>
    %40 = vector.shape_cast %39 : vector<256x128xf32> to vector<1x16x16x128xf32>
    %c0_53 = arith.constant 0 : index
    %c1_54 = arith.constant 1 : index
    %c1_55 = arith.constant 1 : index
    %c0_56 = arith.constant 0 : index
    %41 = vector.load %arg9[%c0_53, %c1_54, %c1_55, %c0_56] : memref<1x18x18x128xf32, #tpu.memory_space<vmem>>, vector<1x16x16x128xf32>
    tpu.vector_store %arg9[%c0_53, %c1_54, %c1_55, %c0_56], %40 {strides = array<i32>} : memref<1x18x18x128xf32, #tpu.memory_space<vmem>>, vector<1x16x16x128xf32>,
    %c0_57 = arith.constant 0 : index
    %c0_58 = arith.constant 0 : index
    %c0_59 = arith.constant 0 : index
    %c0_60 = arith.constant 0 : index
    %42 = vector.load %arg9[%c0_57, %c0_58, %c0_59, %c0_60] : memref<1x18x18x128xf32, #tpu.memory_space<vmem>>, vector<1x16x16x128xf32>
    %43 = vector.shape_cast %42 : vector<1x16x16x128xf32> to vector<256x128xf32>
    %c0_61 = arith.constant 0 : index
    %c0_62 = arith.constant 0 : index
    %44 = vector.load %arg11[%c0_61, %c0_62] : memref<256x1152xf32, #tpu.memory_space<vmem>>, vector<256x128xf32>
    tpu.vector_store %arg11[%c0_61, %c0_62], %43 {strides = array<i32>} : memref<256x1152xf32, #tpu.memory_space<vmem>>, vector<256x128xf32>,
    %c0_63 = arith.constant 0 : index
    %c0_64 = arith.constant 0 : index
    %c1_65 = arith.constant 1 : index
    %c0_66 = arith.constant 0 : index
    %45 = vector.load %arg9[%c0_63, %c0_64, %c1_65, %c0_66] : memref<1x18x18x128xf32, #tpu.memory_space<vmem>>, vector<1x16x16x128xf32>
    %46 = vector.shape_cast %45 : vector<1x16x16x128xf32> to vector<256x128xf32>
    %c0_67 = arith.constant 0 : index
    %c128_68 = arith.constant 128 : index
    %47 = vector.load %arg11[%c0_67, %c128_68] : memref<256x1152xf32, #tpu.memory_space<vmem>>, vector<256x128xf32>
    tpu.vector_store %arg11[%c0_67, %c128_68], %46 {strides = array<i32>} : memref<256x1152xf32, #tpu.memory_space<vmem>>, vector<256x128xf32>,
    %c0_69 = arith.constant 0 : index
    %c0_70 = arith.constant 0 : index
    %c2_71 = arith.constant 2 : index
    %c0_72 = arith.constant 0 : index
    %48 = vector.load %arg9[%c0_69, %c0_70, %c2_71, %c0_72] : memref<1x18x18x128xf32, #tpu.memory_space<vmem>>, vector<1x16x16x128xf32>
    %49 = vector.shape_cast %48 : vector<1x16x16x128xf32> to vector<256x128xf32>
    %c0_73 = arith.constant 0 : index
    %c256_74 = arith.constant 256 : index
    %50 = vector.load %arg11[%c0_73, %c256_74] : memref<256x1152xf32, #tpu.memory_space<vmem>>, vector<256x128xf32>
    tpu.vector_store %arg11[%c0_73, %c256_74], %49 {strides = array<i32>} : memref<256x1152xf32, #tpu.memory_space<vmem>>, vector<256x128xf32>,
    %c0_75 = arith.constant 0 : index
    %c1_76 = arith.constant 1 : index
    %c0_77 = arith.constant 0 : index
    %c0_78 = arith.constant 0 : index
    %51 = vector.load %arg9[%c0_75, %c1_76, %c0_77, %c0_78] : memref<1x18x18x128xf32, #tpu.memory_space<vmem>>, vector<1x16x16x128xf32>
    %52 = vector.shape_cast %51 : vector<1x16x16x128xf32> to vector<256x128xf32>
    %c0_79 = arith.constant 0 : index
    %c384_80 = arith.constant 384 : index
    %53 = vector.load %arg11[%c0_79, %c384_80] : memref<256x1152xf32, #tpu.memory_space<vmem>>, vector<256x128xf32>
    tpu.vector_store %arg11[%c0_79, %c384_80], %52 {strides = array<i32>} : memref<256x1152xf32, #tpu.memory_space<vmem>>, vector<256x128xf32>,
    %c0_81 = arith.constant 0 : index
    %c1_82 = arith.constant 1 : index
    %c1_83 = arith.constant 1 : index
    %c0_84 = arith.constant 0 : index
    %54 = vector.load %arg9[%c0_81, %c1_82, %c1_83, %c0_84] : memref<1x18x18x128xf32, #tpu.memory_space<vmem>>, vector<1x16x16x128xf32>
    %55 = vector.shape_cast %54 : vector<1x16x16x128xf32> to vector<256x128xf32>
    %c0_85 = arith.constant 0 : index
    %c512_86 = arith.constant 512 : index
    %56 = vector.load %arg11[%c0_85, %c512_86] : memref<256x1152xf32, #tpu.memory_space<vmem>>, vector<256x128xf32>
    tpu.vector_store %arg11[%c0_85, %c512_86], %55 {strides = array<i32>} : memref<256x1152xf32, #tpu.memory_space<vmem>>, vector<256x128xf32>,
    %c0_87 = arith.constant 0 : index
    %c1_88 = arith.constant 1 : index
    %c2_89 = arith.constant 2 : index
    %c0_90 = arith.constant 0 : index
    %57 = vector.load %arg9[%c0_87, %c1_88, %c2_89, %c0_90] : memref<1x18x18x128xf32, #tpu.memory_space<vmem>>, vector<1x16x16x128xf32>
    %58 = vector.shape_cast %57 : vector<1x16x16x128xf32> to vector<256x128xf32>
    %c0_91 = arith.constant 0 : index
    %c640_92 = arith.constant 640 : index
    %59 = vector.load %arg11[%c0_91, %c640_92] : memref<256x1152xf32, #tpu.memory_space<vmem>>, vector<256x128xf32>
    tpu.vector_store %arg11[%c0_91, %c640_92], %58 {strides = array<i32>} : memref<256x1152xf32, #tpu.memory_space<vmem>>, vector<256x128xf32>,
    %c0_93 = arith.constant 0 : index
    %c2_94 = arith.constant 2 : index
    %c0_95 = arith.constant 0 : index
    %c0_96 = arith.constant 0 : index
    %60 = vector.load %arg9[%c0_93, %c2_94, %c0_95, %c0_96] : memref<1x18x18x128xf32, #tpu.memory_space<vmem>>, vector<1x16x16x128xf32>
    %61 = vector.shape_cast %60 : vector<1x16x16x128xf32> to vector<256x128xf32>
    %c0_97 = arith.constant 0 : index
    %c768_98 = arith.constant 768 : index
    %62 = vector.load %arg11[%c0_97, %c768_98] : memref<256x1152xf32, #tpu.memory_space<vmem>>, vector<256x128xf32>
    tpu.vector_store %arg11[%c0_97, %c768_98], %61 {strides = array<i32>} : memref<256x1152xf32, #tpu.memory_space<vmem>>, vector<256x128xf32>,
    %c0_99 = arith.constant 0 : index
    %c2_100 = arith.constant 2 : index
    %c1_101 = arith.constant 1 : index
    %c0_102 = arith.constant 0 : index
    %63 = vector.load %arg9[%c0_99, %c2_100, %c1_101, %c0_102] : memref<1x18x18x128xf32, #tpu.memory_space<vmem>>, vector<1x16x16x128xf32>
    %64 = vector.shape_cast %63 : vector<1x16x16x128xf32> to vector<256x128xf32>
    %c0_103 = arith.constant 0 : index
    %c896_104 = arith.constant 896 : index
    %65 = vector.load %arg11[%c0_103, %c896_104] : memref<256x1152xf32, #tpu.memory_space<vmem>>, vector<256x128xf32>
    tpu.vector_store %arg11[%c0_103, %c896_104], %64 {strides = array<i32>} : memref<256x1152xf32, #tpu.memory_space<vmem>>, vector<256x128xf32>,
    %c0_105 = arith.constant 0 : index
    %c2_106 = arith.constant 2 : index
    %c2_107 = arith.constant 2 : index
    %c0_108 = arith.constant 0 : index
    %66 = vector.load %arg9[%c0_105, %c2_106, %c2_107, %c0_108] : memref<1x18x18x128xf32, #tpu.memory_space<vmem>>, vector<1x16x16x128xf32>
    %67 = vector.shape_cast %66 : vector<1x16x16x128xf32> to vector<256x128xf32>
    %c0_109 = arith.constant 0 : index
    %c1024_110 = arith.constant 1024 : index
    %68 = vector.load %arg11[%c0_109, %c1024_110] : memref<256x1152xf32, #tpu.memory_space<vmem>>, vector<256x128xf32>
    tpu.vector_store %arg11[%c0_109, %c1024_110], %67 {strides = array<i32>} : memref<256x1152xf32, #tpu.memory_space<vmem>>, vector<256x128xf32>,
    %c0_111 = arith.constant 0 : index
    %c0_112 = arith.constant 0 : index
    %69 = vector.load %arg11[%c0_111, %c0_112] : memref<256x1152xf32, #tpu.memory_space<vmem>>, vector<256x1152xf32>
    %c0_113 = arith.constant 0 : index
    %c0_114 = arith.constant 0 : index
    %c0_115 = arith.constant 0 : index
    %70 = vector.load %arg5[%c0_113, %c0_114, %c0_115] : memref<1x1152x128xf32, #tpu.memory_space<vmem>>, vector<1x1152x128xf32>
    %71 = vector.shape_cast %70 : vector<1x1152x128xf32> to vector<1152x128xf32>
    %cst_116 = arith.constant dense<0.000000e+00> : vector<256x128xf32>
    %72 = tpu.matmul %69, %71, %cst_116 {dimension_numbers = #tpu.dot_dimension_numbers<[1], [0], [0], [1], [0, 0, 1, 1], [], []>} : vector<256x1152xf32>, vector<1152x128xf32>, vector<256x128xf32> -> vector<256x128xf32>
    %c0_117 = arith.constant 0 : index
    %c1_118 = arith.constant 1 : index
    %c1_119 = arith.constant 1 : index
    %c0_120 = arith.constant 0 : index
    %73 = vector.load %arg8[%c0_117, %c1_118, %c1_119, %c0_120] : memref<1x18x18x128xf32, #tpu.memory_space<vmem>>, vector<1x16x16x128xf32>
    %74 = vector.shape_cast %73 : vector<1x16x16x128xf32> to vector<256x128xf32>
    %c0_121 = arith.constant 0 : index
    %c0_122 = arith.constant 0 : index
    %c0_123 = arith.constant 0 : index
    %75 = vector.load %arg6[%c0_121, %c0_122, %c0_123] : memref<1x1x128xf32, #tpu.memory_space<vmem>>, vector<1x1x128xf32>
    %76 = vector.shape_cast %75 : vector<1x1x128xf32> to vector<1x128xf32>
    %77 = vector.broadcast %76 : vector<1x128xf32> to vector<256x128xf32>
    %78 = arith.addf %72, %77 : vector<256x128xf32>
    %79 = arith.addf %78, %74 : vector<256x128xf32>
    %cst_124 = arith.constant 0.000000e+00 : f32
    %80 = vector.broadcast %cst_124 : f32 to vector<256x128xf32>
    %81 = arith.maximumf %79, %80 : vector<256x128xf32>
    %82 = vector.shape_cast %81 : vector<256x128xf32> to vector<1x16x16x128xf32>
    %c0_125 = arith.constant 0 : index
    %c1_126 = arith.constant 1 : index
    %c1_127 = arith.constant 1 : index
    %c0_128 = arith.constant 0 : index
    %83 = vector.load %arg8[%c0_125, %c1_126, %c1_127, %c0_128] : memref<1x18x18x128xf32, #tpu.memory_space<vmem>>, vector<1x16x16x128xf32>
    tpu.vector_store %arg8[%c0_125, %c1_126, %c1_127, %c0_128], %82 {strides = array<i32>} : memref<1x18x18x128xf32, #tpu.memory_space<vmem>>, vector<1x16x16x128xf32>,
    %c1_i32 = arith.constant 1 : i32
    %84 = arith.cmpi eq, %arg1, %c1_i32 : i32
    %85 = arith.extui %84 : i1 to i32
    %c0_i32_129 = arith.constant 0 : i32
    %86 = arith.cmpi ne, %85, %c0_i32_129 : i32
    scf.if %86 {
      %87 = vector.shape_cast %81 : vector<256x128xf32> to vector<1x16x16x128xf32>
      %88 = vector.extract_strided_slice %87 {offsets = [0, 0, 0, 0], sizes = [1, 16, 16, 4], strides = [1, 1, 1, 1]} : vector<1x16x16x128xf32> to vector<1x16x16x4xf32>
      %c0_130 = arith.constant 0 : index
      %c0_131 = arith.constant 0 : index
      %c0_132 = arith.constant 0 : index
      %c0_133 = arith.constant 0 : index
      %89 = vector.load %arg7[%c0_130, %c0_131, %c0_132, %c0_133] : memref<1x16x16x4xf32, #tpu.memory_space<vmem>>, vector<1x16x16x4xf32>
      tpu.vector_store %arg7[%c0_130, %c0_131, %c0_132, %c0_133], %88 {strides = array<i32>} : memref<1x16x16x4xf32, #tpu.memory_space<vmem>>, vector<1x16x16x4xf32>,
    } else {
    }
    return
  }
  func.func @transform_0(%arg0: i32, %arg1: i32) -> (i32, i32, i32, i32) {
    %c0_i32 = arith.constant 0 : i32
    %c0_i32_0 = arith.constant 0 : i32
    %c0_i32_1 = arith.constant 0 : i32
    %c0_i32_2 = arith.constant 0 : i32
    return %arg0, %c0_i32, %c0_i32_0, %c0_i32_1 : i32, i32, i32, i32
  }
  func.func @transform_1(%arg0: i32, %arg1: i32) -> (i32, i32, i32) {
    %c0_i32 = arith.constant 0 : i32
    %c0_i32_0 = arith.constant 0 : i32
    %c0_i32_1 = arith.constant 0 : i32
    return %arg1, %c0_i32, %c0_i32_0 : i32, i32, i32
  }
  func.func @transform_2(%arg0: i32, %arg1: i32) -> (i32, i32, i32) {
    %c0_i32 = arith.constant 0 : i32
    %c0_i32_0 = arith.constant 0 : i32
    %c0_i32_1 = arith.constant 0 : i32
    return %arg1, %c0_i32, %c0_i32_0 : i32, i32, i32
  }
  func.func @transform_3(%arg0: i32, %arg1: i32) -> (i32, i32, i32) {
    %c0_i32 = arith.constant 0 : i32
    %c0_i32_0 = arith.constant 0 : i32
    %c0_i32_1 = arith.constant 0 : i32
    return %arg1, %c0_i32, %c0_i32_0 : i32, i32, i32
  }
  func.func @transform_4(%arg0: i32, %arg1: i32) -> (i32, i32, i32) {
    %c0_i32 = arith.constant 0 : i32
    %c0_i32_0 = arith.constant 0 : i32
    %c0_i32_1 = arith.constant 0 : i32
    return %arg1, %c0_i32, %c0_i32_0 : i32, i32, i32
  }
  func.func @transform_5(%arg0: i32, %arg1: i32) -> (i32, i32, i32, i32) {
    %c0_i32 = arith.constant 0 : i32
    %c0_i32_0 = arith.constant 0 : i32
    %c0_i32_1 = arith.constant 0 : i32
    %c0_i32_2 = arith.constant 0 : i32
    return %arg0, %c0_i32, %c0_i32_0, %c0_i32_1 : i32, i32, i32, i32
  }
}

</mosaic_0001>

<bundles_post_ra>
// kernel: residual_stack_forward_nhwc.1
= control target key start
LH: loop header
LB: loop body
LE: loop exit
PB: predicated region body
PF: predicated region fallthrough
CT: control target
= control target key end

     0   :  { %s6406_s18 = smov 0   ;;  %s6408_s19 = smov 0   ;;  %s8434_s0 = inlined_call_operand.vmem [shape: f32[2,16,16,4], index: 0, kind: input, shape index: {}]   ;;  %s8435_s1 = inlined_call_operand.vmem [shape: f32[2,1152,128], index: 1, kind: input, shape index: {}]   ;;  %s8436_s2 = inlined_call_operand.vmem [shape: f32[2,1,128], index: 2, kind: input, shape index: {}]   ;;  %s8437_s3 = inlined_call_operand.vmem [shape: f32[2,1152,128], index: 3, kind: input, shape index: {}]   ;;  %s8438_s4 = inlined_call_operand.vmem [shape: f32[2,1,128], index: 4, kind: input, shape index: {}]   ;;  %s8439_s5 = inlined_call_operand.vmem [shape: f32[2,16,16,4], index: 5, kind: output, shape index: {}]  }
   0x1   :  { %s6410_s20 = smov 0   ;;  %s6412_s21 = smov 0  }
   0x2   :  { %s6414_s22 = smov 0  }
   0x3 LB: > { %s24_s23 = sadd.s32 1, %s6364_s20  ;;  %s27_s24 = sadd.s32 1, %s6368_s21  ;;  %s6372_s22 = sphi %s6414_s22, %s15_s22   ;;  %s6368_s21 = sphi %s6412_s21, %s8562_s21   ;;  %s6364_s20 = sphi %s6410_s20, %s8561_s20   ;;  %s6360_s19 = sphi %s6408_s19, %s8560_s19   ;;  %s6356_s18 = sphi %s6406_s18, %s8559_s18  }
   0x4   : > { %p25_p0 = scmp.ge.s32.totalorder %s24_s23, 2  ;;  %p5108_p1 = scmp.ge.s32.totalorder %s6372_s22, 1 }
   0x5   : > { %p235_p2 = scmp.lt.s32.totalorder %s6372_s22, 5 }
   0x6   : > { %s8564_s23 = smov (%p25_p0, %s24_s23), 0  ;;  %s8566_s24 = smov (!%p25_p0, %s27_s24), %s6368_s21 }
   0x7   : > { %p236_p3 = pnand %p5108_p1, %p235_p2  ;;  %p29_p4 = scmp.ge.s32.totalorder %s8566_s24, 2 }
   0x9   : > { %s8568_s24 = smov (%p29_p4, %s8566_s24), 0  ;;  %239 = sbr.rel (%p236_p3) target bundleno = 1505 (0x5e1), region = 40 }
  0x10   : > { %p279_p5 = scmp.lt.s32.totalorder %s6360_s19, 1  ;;  %p284_p6 = scmp.lt.s32.totalorder %s6356_s18, 1 }
  0x11   : > { %p5115_p7 = scmp.ne.s32.totalorder %s6356_s18, 0 }
  0x12   : > { %s8570_s19 = smov (!%p279_p5, %s6360_s19), 1  ;;  %vm450_vm0 = vcmask (!%p5115_p7), 31744   ;;  %v6374_v3 = vmov (!%p5115_p7), 0.0  }
  0x13   : > { %s6440_s25 = scalar_select %p284_p6, %s6356_s18, 1 }
  0x14   : > { %s5121_s26 = sshll.u32 %s8570_s19, 8  ;;  %308 = sbr.rel (%p5115_p7) target bundleno = 91 (0x5b), region = 44  ;;  %312 = vst [vmem:[#allocation2 + $0x18] sm:$0xff] (!%p5115_p7), %v6374_v3  ;;  %309 = vst [vmem:[#allocation2] sm:$0xff] (!%p5115_p7), %v6374_v3 }
  0x15   : > { %s6445_s29 = scalar_lea.vmem %s8434_s0, %s5121_s26  ;;  %s6291_s30 = smul.u32 1152, %s6440_s25  ;;  %310 = vst [vmem:[#allocation2 + $0x8] sm:$0xff] (!%p5115_p7), %v6374_v3  ;;  %311 = vst [vmem:[#allocation2 + $0x10] sm:$0x3] (!%p5115_p7), %v6374_v3 }
  0x16   : > { %s291_s8 = scalar_lea.vmem %s8436_s2, %s6440_s25  ;;  %s299_s11 = scalar_lea.vmem %s8438_s4, %s6440_s25  ;;  %v6473_v0 = vld [vmem:[%s6445_s29] sm:$0xff] (!%p5115_p7)  ;;  %v6476_v1 = vld [vmem:[%s6445_s29 + $0x8] sm:$0xff] (!%p5115_p7)  ;;  %v6479_v2 = vld [vmem:[%s6445_s29 + $0x10] sm:$0xff] (!%p5115_p7)  ;;  %313 = vst [vmem:[#allocation2 + $0x20] sm:$0xff] (!%p5115_p7), %v6374_v3 }
  0x17   : > { %s6459_s14 = scalar_lea.vmem %s8435_s1, %s6291_s30  ;;  %s6464_s17 = scalar_lea.vmem %s8437_s3, %s6291_s30  ;;  %314 = vst [vmem:[#allocation2 + $0x28] sm:$0x3] (!%p5115_p7), %v6374_v3  ;;  %315 = vst [vmem:[#allocation2 + $0x30] sm:$0xff] (!%p5115_p7), %v6374_v3  ;;  %v420_v4 = vld [vmem:[%s6445_s29 + $0x18] sm:$0xff] (!%p5115_p7)  ;;  %v421_v5 = vld [vmem:[%s6445_s29 + $0x20] sm:$0xff] (!%p5115_p7) }
  0x18   : > { %s6469_s28 = scalar_lea.vmem %s8439_s5, %s5121_s26  ;;  %316 = vst [vmem:[#allocation2 + $0x38] sm:$0xff] (!%p5115_p7), %v6374_v3  ;;  %317 = vst [vmem:[#allocation2 + $0x40] sm:$0x3] (!%p5115_p7), %v6374_v3  ;;  %v422_v6 = vld [vmem:[%s6445_s29 + $0x28] sm:$0xff] (!%p5115_p7)  ;;  %v423_v7 = vld [vmem:[%s6445_s29 + $0x30] sm:$0xff] (!%p5115_p7) }
  0x19   : > { %318 = vst [vmem:[#allocation2 + $0x48] sm:$0xff] (!%p5115_p7), %v6374_v3  ;;  %319 = vst [vmem:[#allocation2 + $0x50] sm:$0xff] (!%p5115_p7), %v6374_v3  ;;  %v424_v8 = vld [vmem:[%s6445_s29 + $0x38] sm:$0xff] (!%p5115_p7)  ;;  %v425_v9 = vld [vmem:[%s6445_s29 + $0x40] sm:$0xff] (!%p5115_p7) }
  0x1a   : > { %320 = vst [vmem:[#allocation2 + $0x58] sm:$0x3] (!%p5115_p7), %v6374_v3  ;;  %321 = vst [vmem:[#allocation2 + $0x60] sm:$0xff] (!%p5115_p7), %v6374_v3  ;;  %v426_v10 = vld [vmem:[%s6445_s29 + $0x48] sm:$0xff] (!%p5115_p7)  ;;  %v427_v11 = vld [vmem:[%s6445_s29 + $0x50] sm:$0xff] (!%p5115_p7) }
  0x1b   : > { %322 = vst [vmem:[#allocation2 + $0x68] sm:$0xff] %v6374_v3  ;;  %323 = vst [vmem:[#allocation2 + $0x70] sm:$0x3] %v6374_v3  ;;  %v428_v12 = vld [vmem:[%s6445_s29 + $0x58] sm:$0xff]  ;;  %v429_v13 = vld [vmem:[%s6445_s29 + $0x60] sm:$0xff] }
  0x1c   : > { %324 = vst [vmem:[#allocation2 + $0x78] sm:$0xff] %v6374_v3  ;;  %325 = vst [vmem:[#allocation2 + $0x80] sm:$0xff] %v6374_v3  ;;  %v430_v14 = vld [vmem:[%s6445_s29 + $0x68] sm:$0xff]  ;;  %v431_v15 = vld [vmem:[%s6445_s29 + $0x70] sm:$0xff] }
  0x1d   : > { %326 = vst [vmem:[#allocation2 + $0x88] sm:$0x3] %v6374_v3  ;;  %327 = vst [vmem:[#allocation2 + $0x90] sm:$0xff] %v6374_v3  ;;  %v432_v16 = vld [vmem:[%s6445_s29 + $0x78] sm:$0xff]  ;;  %v433_v17 = vld [vmem:[%s6445_s29 + $0x80] sm:$0xff] }
  0x1e   : > { %328 = vst [vmem:[#allocation2 + $0x98] sm:$0xff] %v6374_v3  ;;  %329 = vst [vmem:[#allocation2 + $0xa0] sm:$0x3] %v6374_v3  ;;  %v434_v18 = vld [vmem:[%s6445_s29 + $0x88] sm:$0xff]  ;;  %v435_v19 = vld [vmem:[%s6445_s29 + $0x90] sm:$0xff] }
  0x1f   : > { %330 = vst [vmem:[#allocation2 + $0xa8] sm:$0xff] %v6374_v3  ;;  %331 = vst [vmem:[#allocation2 + $0xb0] sm:$0xff] %v6374_v3  ;;  %v436_v20 = vld [vmem:[%s6445_s29 + $0x98] sm:$0xff]  ;;  %v437_v21 = vld [vmem:[%s6445_s29 + $0xa0] sm:$0xff] }
  0x20   : > { %332 = vst [vmem:[#allocation2 + $0xb8] sm:$0x3] %v6374_v3  ;;  %333 = vst [vmem:[#allocation2 + $0xc0] sm:$0xff] %v6374_v3  ;;  %v438_v22 = vld [vmem:[%s6445_s29 + $0xa8] sm:$0xff]  ;;  %v439_v23 = vld [vmem:[%s6445_s29 + $0xb0] sm:$0xff] }
  0x21   : > { %334 = vst [vmem:[#allocation2 + $0xc8] sm:$0xff] %v6374_v3  ;;  %335 = vst [vmem:[#allocation2 + $0xd0] sm:$0x3] %v6374_v3  ;;  %v440_v24 = vld [vmem:[%s6445_s29 + $0xb8] sm:$0xff]  ;;  %v441_v25 = vld [vmem:[%s6445_s29 + $0xc0] sm:$0xff] }
  0x22   : > { %336 = vst [vmem:[#allocation2 + $0xd8] sm:$0xff] %v6374_v3  ;;  %337 = vst [vmem:[#allocation2 + $0xe0] sm:$0xff] %v6374_v3  ;;  %v442_v26 = vld [vmem:[%s6445_s29 + $0xc8] sm:$0xff]  ;;  %v443_v27 = vld [vmem:[%s6445_s29 + $0xd0] sm:$0xff] }
  0x23   : > { %338 = vst [vmem:[#allocation2 + $0xe8] sm:$0x3] %v6374_v3  ;;  %339 = vst [vmem:[#allocation2 + $0xf0] sm:$0xff] %v6374_v3  ;;  %v444_v28 = vld [vmem:[%s6445_s29 + $0xd8] sm:$0xff]  ;;  %v445_v29 = vld [vmem:[%s6445_s29 + $0xe0] sm:$0xff] }
  0x24   : > { %340 = vst [vmem:[#allocation2 + $0xf8] sm:$0xff] %v6374_v3  ;;  %341 = vst [vmem:[#allocation2 + $0x100] sm:$0x3] %v6374_v3  ;;  %v446_v30 = vld [vmem:[%s6445_s29 + $0xe8] sm:$0xff]  ;;  %v447_v31 = vld [vmem:[%s6445_s29 + $0xf0] sm:$0xff] }
  0x25   : > { %342 = vst [vmem:[#allocation2 + $0x108] sm:$0xff] %v6374_v3  ;;  %343 = vst [vmem:[#allocation2 + $0x110] sm:$0xff] %v6374_v3  ;;  %v448_v32 = vld [vmem:[%s6445_s29 + $0xf8] sm:$0xff] }
  0x26   : > { %344 = vst [vmem:[#allocation2 + $0x118] sm:$0x3] %v6374_v3  ;;  %345 = vst [vmem:[#allocation2 + $0x120] sm:$0xff] %v6374_v3 }
  0x27   : > { %346 = vst [vmem:[#allocation2 + $0x128] sm:$0xff] %v6374_v3  ;;  %347 = vst [vmem:[#allocation2 + $0x130] sm:$0x3] %v6374_v3 }
  0x28   : > { %348 = vst [vmem:[#allocation2 + $0x138] sm:$0xff] %v6374_v3  ;;  %349 = vst [vmem:[#allocation2 + $0x140] sm:$0xff] %v6374_v3 }
  0x29   : > { %350 = vst [vmem:[#allocation2 + $0x148] sm:$0x3] %v6374_v3  ;;  %351 = vst [vmem:[#allocation2 + $0x150] sm:$0xff] %v6374_v3 }
  0x2a   : > { %352 = vst [vmem:[#allocation2 + $0x158] sm:$0xff] %v6374_v3  ;;  %353 = vst [vmem:[#allocation2 + $0x160] sm:$0x3] %v6374_v3 }
  0x2b   : > { %354 = vst [vmem:[#allocation2 + $0x168] sm:$0xff] %v6374_v3  ;;  %355 = vst [vmem:[#allocation2 + $0x170] sm:$0xff] %v6374_v3 }
  0x2c   : > { %356 = vst [vmem:[#allocation2 + $0x178] sm:$0x3] %v6374_v3  ;;  %357 = vst [vmem:[#allocation2 + $0x180] sm:$0xff] %v6374_v3 }
  0x2d   : > { %358 = vst [vmem:[#allocation2 + $0x188] sm:$0xff] %v6374_v3  ;;  %359 = vst [vmem:[#allocation2 + $0x190] sm:$0x3] %v6374_v3 }
  0x2e   : > { %360 = vst [vmem:[#allocation2 + $0x198] sm:$0xff] %v6374_v3  ;;  %361 = vst [vmem:[#allocation2 + $0x1a0] sm:$0xff] %v6374_v3 }
  0x2f   : > { %362 = vst [vmem:[#allocation2 + $0x1a8] sm:$0x3] %v6374_v3  ;;  %363 = vst [vmem:[#allocation3] sm:$0xff] %v6374_v3 }
  0x30   : > { %364 = vst [vmem:[#allocation3 + $0x8] sm:$0xff] %v6374_v3  ;;  %365 = vst [vmem:[#allocation3 + $0x10] sm:$0x3] %v6374_v3 }
  0x31   : > { %366 = vst [vmem:[#allocation3 + $0x18] sm:$0xff] %v6374_v3  ;;  %367 = vst [vmem:[#allocation3 + $0x20] sm:$0xff] %v6374_v3 }
  0x32   : > { %368 = vst [vmem:[#allocation3 + $0x28] sm:$0x3] %v6374_v3  ;;  %369 = vst [vmem:[#allocation3 + $0x30] sm:$0xff] %v6374_v3 }
  0x33   : > { %370 = vst [vmem:[#allocation3 + $0x38] sm:$0xff] %v6374_v3  ;;  %371 = vst [vmem:[#allocation3 + $0x40] sm:$0x3] %v6374_v3 }
  0x34   : > { %372 = vst [vmem:[#allocation3 + $0x48] sm:$0xff] %v6374_v3  ;;  %373 = vst [vmem:[#allocation3 + $0x50] sm:$0xff] %v6374_v3 }
  0x35   : > { %374 = vst [vmem:[#allocation3 + $0x58] sm:$0x3] %v6374_v3  ;;  %375 = vst [vmem:[#allocation3 + $0x60] sm:$0xff] %v6374_v3 }
  0x36   : > { %376 = vst [vmem:[#allocation3 + $0x68] sm:$0xff] %v6374_v3  ;;  %377 = vst [vmem:[#allocation3 + $0x70] sm:$0x3] %v6374_v3 }
  0x37   : > { %378 = vst [vmem:[#allocation3 + $0x78] sm:$0xff] %v6374_v3  ;;  %379 = vst [vmem:[#allocation3 + $0x80] sm:$0xff] %v6374_v3 }
  0x38   : > { %380 = vst [vmem:[#allocation3 + $0x88] sm:$0x3] %v6374_v3  ;;  %381 = vst [vmem:[#allocation3 + $0x90] sm:$0xff] %v6374_v3 }
  0x39   : > { %382 = vst [vmem:[#allocation3 + $0x98] sm:$0xff] %v6374_v3  ;;  %383 = vst [vmem:[#allocation3 + $0xa0] sm:$0x3] %v6374_v3 }
  0x3a   : > { %384 = vst [vmem:[#allocation3 + $0xa8] sm:$0xff] %v6374_v3  ;;  %385 = vst [vmem:[#allocation3 + $0xb0] sm:$0xff] %v6374_v3 }
  0x3b   : > { %386 = vst [vmem:[#allocation3 + $0xb8] sm:$0x3] %v6374_v3  ;;  %387 = vst [vmem:[#allocation3 + $0xc0] sm:$0xff] %v6374_v3 }
  0x3c   : > { %388 = vst [vmem:[#allocation3 + $0xc8] sm:$0xff] %v6374_v3  ;;  %389 = vst [vmem:[#allocation3 + $0xd0] sm:$0x3] %v6374_v3 }
  0x3d   : > { %390 = vst [vmem:[#allocation3 + $0xd8] sm:$0xff] %v6374_v3  ;;  %391 = vst [vmem:[#allocation3 + $0xe0] sm:$0xff] %v6374_v3 }
  0x3e   : > { %392 = vst [vmem:[#allocation3 + $0xe8] sm:$0x3] %v6374_v3  ;;  %393 = vst [vmem:[#allocation3 + $0xf0] sm:$0xff] %v6374_v3 }
  0x3f   : > { %394 = vst [vmem:[#allocation3 + $0xf8] sm:$0xff] %v6374_v3  ;;  %395 = vst [vmem:[#allocation3 + $0x100] sm:$0x3] %v6374_v3 }
  0x40   : > { %396 = vst [vmem:[#allocation3 + $0x108] sm:$0xff] %v6374_v3  ;;  %397 = vst [vmem:[#allocation3 + $0x110] sm:$0xff] %v6374_v3 }
  0x41   : > { %398 = vst [vmem:[#allocation3 + $0x118] sm:$0x3] %v6374_v3  ;;  %399 = vst [vmem:[#allocation3 + $0x120] sm:$0xff] %v6374_v3 }
  0x42   : > { %400 = vst [vmem:[#allocation3 + $0x128] sm:$0xff] %v6374_v3  ;;  %401 = vst [vmem:[#allocation3 + $0x130] sm:$0x3] %v6374_v3 }
  0x43   : > { %402 = vst [vmem:[#allocation3 + $0x138] sm:$0xff] %v6374_v3  ;;  %403 = vst [vmem:[#allocation3 + $0x140] sm:$0xff] %v6374_v3 }
  0x44   : > { %404 = vst [vmem:[#allocation3 + $0x148] sm:$0x3] %v6374_v3  ;;  %405 = vst [vmem:[#allocation3 + $0x150] sm:$0xff] %v6374_v3 }
  0x45   : > { %406 = vst [vmem:[#allocation3 + $0x158] sm:$0xff] %v6374_v3  ;;  %407 = vst [vmem:[#allocation3 + $0x160] sm:$0x3] %v6374_v3 }
  0x46   : > { %408 = vst [vmem:[#allocation3 + $0x168] sm:$0xff] %v6374_v3  ;;  %409 = vst [vmem:[#allocation3 + $0x170] sm:$0xff] %v6374_v3 }
  0x47   : > { %410 = vst [vmem:[#allocation3 + $0x178] sm:$0x3] %v6374_v3  ;;  %411 = vst [vmem:[#allocation3 + $0x180] sm:$0xff] %v6374_v3 }
  0x48   : > { %412 = vst [vmem:[#allocation3 + $0x188] sm:$0xff] %v6374_v3  ;;  %413 = vst [vmem:[#allocation3 + $0x190] sm:$0x3] %v6374_v3 }
  0x49   : > { %414 = vst [vmem:[#allocation3 + $0x198] sm:$0xff] %v6374_v3  ;;  %415 = vst [vmem:[#allocation3 + $0x1a0] sm:$0xff] %v6374_v3 }
  0x4a   : > { %416 = vst [vmem:[#allocation3 + $0x1a8] sm:$0x3] %v6374_v3  ;;  %451 = vst.msk [vmem:[#allocation2 + $0x19] sm:$0xff] %vm450_vm0, %v6473_v0 }
  0x4b   : > { %452 = vst.msk [vmem:[#allocation2 + $0x21] sm:$0xff] %vm450_vm0, %v6476_v1  ;;  %453 = vst.msk [vmem:[#allocation2 + $0x31] sm:$0xff] %vm450_vm0, %v6479_v2 }
  0x4c   : > { %454 = vst.msk [vmem:[#allocation2 + $0x39] sm:$0xff] %vm450_vm0, %v420_v4  ;;  %455 = vst.msk [vmem:[#allocation2 + $0x49] sm:$0xff] %vm450_vm0, %v421_v5 }
  0x4d   : > { %456 = vst.msk [vmem:[#allocation2 + $0x51] sm:$0xff] %vm450_vm0, %v422_v6  ;;  %457 = vst.msk [vmem:[#allocation2 + $0x61] sm:$0xff] %vm450_vm0, %v423_v7 }
  0x4e   : > { %458 = vst.msk [vmem:[#allocation2 + $0x69] sm:$0xff] %vm450_vm0, %v424_v8  ;;  %459 = vst.msk [vmem:[#allocation2 + $0x79] sm:$0xff] %vm450_vm0, %v425_v9 }
  0x4f   : > { %460 = vst.msk [vmem:[#allocation2 + $0x81] sm:$0xff] %vm450_vm0, %v426_v10  ;;  %461 = vst.msk [vmem:[#allocation2 + $0x91] sm:$0xff] %vm450_vm0, %v427_v11 }
  0x50   : > { %462 = vst.msk [vmem:[#allocation2 + $0x99] sm:$0xff] %vm450_vm0, %v428_v12  ;;  %463 = vst.msk [vmem:[#allocation2 + $0xa9] sm:$0xff] %vm450_vm0, %v429_v13 }
  0x51   : > { %464 = vst.msk [vmem:[#allocation2 + $0xb1] sm:$0xff] %vm450_vm0, %v430_v14  ;;  %465 = vst.msk [vmem:[#allocation2 + $0xc1] sm:$0xff] %vm450_vm0, %v431_v15 }
  0x52   : > { %466 = vst.msk [vmem:[#allocation2 + $0xc9] sm:$0xff] %vm450_vm0, %v432_v16  ;;  %467 = vst.msk [vmem:[#allocation2 + $0xd9] sm:$0xff] %vm450_vm0, %v433_v17 }
  0x53   : > { %468 = vst.msk [vmem:[#allocation2 + $0xe1] sm:$0xff] %vm450_vm0, %v434_v18  ;;  %469 = vst.msk [vmem:[#allocation2 + $0xf1] sm:$0xff] %vm450_vm0, %v435_v19 }
  0x54   : > { %470 = vst.msk [vmem:[#allocation2 + $0xf9] sm:$0xff] %vm450_vm0, %v436_v20  ;;  %471 = vst.msk [vmem:[#allocation2 + $0x109] sm:$0xff] %vm450_vm0, %v437_v21 }
  0x55   : > { %472 = vst.msk [vmem:[#allocation2 + $0x111] sm:$0xff] %vm450_vm0, %v438_v22  ;;  %473 = vst.msk [vmem:[#allocation2 + $0x121] sm:$0xff] %vm450_vm0, %v439_v23 }
  0x56   : > { %474 = vst.msk [vmem:[#allocation2 + $0x129] sm:$0xff] %vm450_vm0, %v440_v24  ;;  %475 = vst.msk [vmem:[#allocation2 + $0x139] sm:$0xff] %vm450_vm0, %v441_v25 }
  0x57   : > { %476 = vst.msk [vmem:[#allocation2 + $0x141] sm:$0xff] %vm450_vm0, %v442_v26  ;;  %477 = vst.msk [vmem:[#allocation2 + $0x151] sm:$0xff] %vm450_vm0, %v443_v27 }
  0x58   : > { %478 = vst.msk [vmem:[#allocation2 + $0x159] sm:$0xff] %vm450_vm0, %v444_v28  ;;  %479 = vst.msk [vmem:[#allocation2 + $0x169] sm:$0xff] %vm450_vm0, %v445_v29 }
  0x59   : > { %480 = vst.msk [vmem:[#allocation2 + $0x171] sm:$0xff] %vm450_vm0, %v446_v30  ;;  %481 = vst.msk [vmem:[#allocation2 + $0x181] sm:$0xff] %vm450_vm0, %v447_v31 }
  0x5a   : > { %482 = vst.msk [vmem:[#allocation2 + $0x189] sm:$0xff] %vm450_vm0, %v448_v32 }
  0x5b PF: > { %v1349_v33 = vld [vmem:[%s6459_s14] sm:$0xff]  ;;  %v1350_v34 = vld [vmem:[%s6459_s14 + $0x8] sm:$0xff]  ;;  %v1351_v35 = vld [vmem:[%s6459_s14 + $0x10] sm:$0xff]  ;;  %v8440_v36 = vmov 0.0|0.0   ;;  %p5118_p8 = scmp.ne.s32.totalorder %s6356_s18, 1 }
  0x5c   : > { %5379 = vmatprep.subr.bf16.mxu0 %v8440_v36  ;;  %v5380_v37 = vpack.c.bf16 %v1350_v34, %v1349_v33  ;;  %v1352_v38 = vld [vmem:[%s6459_s14 + $0x18] sm:$0xff]  ;;  %v1353_v40 = vld [vmem:[%s6459_s14 + $0x20] sm:$0xff]  ;;  %v1354_v41 = vld [vmem:[%s6459_s14 + $0x28] sm:$0xff]  ;;  %vm4963_vm1 = vcmask (!%p5118_p8), 31744  }
  0x5d   : > { %v5383_v39 = vpack.c.bf16 %v1352_v38, %v1351_v35  ;;  %v5386_v42 = vpack.c.bf16 %v1354_v41, %v1353_v40  ;;  %v1355_v43 = vld [vmem:[%s6459_s14 + $0x30] sm:$0xff]  ;;  %v1356_v44 = vld [vmem:[%s6459_s14 + $0x38] sm:$0xff]  ;;  %v547_v45 = vld [vmem:[#allocation2 + $0x1] sm:$0xff] }
  0x5e   : > { %5381 = vmatpush1.bf16.msra.mxu0 %v5380_v37  ;;  %v5389_v46 = vpack.c.bf16 %v1356_v44, %v1355_v43  ;;  %1564 = vmatprep.mubr.f32.mxu0 %v547_v45  ;;  %v1357_v47 = vld [vmem:[%s6459_s14 + $0x40] sm:$0xff]  ;;  %v1358_v48 = vld [vmem:[%s6459_s14 + $0x48] sm:$0xff]  ;;  %v1359_v50 = vld [vmem:[%s6459_s14 + $0x50] sm:$0xff] }
  0x5f   : > { %5382 = vmatprep.subr.bf16.mxu0 %v8440_v36  ;;  %v5392_v49 = vpack.c.bf16 %v1358_v48, %v1357_v47  ;;  %v1360_v51 = vld [vmem:[%s6459_s14 + $0x58] sm:$0xff]  ;;  %v1361_v53 = vld [vmem:[%s6459_s14 + $0x60] sm:$0xff]  ;;  %v1362_v54 = vld [vmem:[%s6459_s14 + $0x68] sm:$0xff] }
  0x60   : > { %v5395_v52 = vpack.c.bf16 %v1360_v51, %v1359_v50  ;;  %v5398_v55 = vpack.c.bf16 %v1362_v54, %v1361_v53  ;;  %v1363_v56 = vld [vmem:[%s6459_s14 + $0x70] sm:$0xff]  ;;  %v1364_v57 = vld [vmem:[%s6459_s14 + $0x78] sm:$0xff]  ;;  %v1365_v59 = vld [vmem:[%s6459_s14 + $0x80] sm:$0xff] }
  0x61   : > { %v5401_v58 = vpack.c.bf16 %v1364_v57, %v1363_v56  ;;  %v1366_v60 = vld [vmem:[%s6459_s14 + $0x88] sm:$0xff]  ;;  %v1367_v62 = vld [vmem:[%s6459_s14 + $0x90] sm:$0xff]  ;;  %v1368_v63 = vld [vmem:[%s6459_s14 + $0x98] sm:$0xff] }
  0x62   : > { %5384 = vmatpush1.bf16.msra.mxu0 %v5383_v39  ;;  %v5404_v61 = vpack.c.bf16 %v1366_v60, %v1365_v59  ;;  %v5407_v0 = vpack.c.bf16 %v1368_v63, %v1367_v62  ;;  %v1369_v1 = vld [vmem:[%s6459_s14 + $0xa0] sm:$0xff]  ;;  %v1370_v2 = vld [vmem:[%s6459_s14 + $0xa8] sm:$0xff]  ;;  %v1371_v4 = vld [vmem:[%s6459_s14 + $0xb0] sm:$0xff] }
  0x63   : > { %5385 = vmatprep.subr.bf16.mxu0 %v8440_v36  ;;  %v5410_v3 = vpack.c.bf16 %v1370_v2, %v1369_v1  ;;  %v1372_v5 = vld [vmem:[%s6459_s14 + $0xb8] sm:$0xff]  ;;  %v1373_v7 = vld [vmem:[%s6459_s14 + $0xc0] sm:$0xff]  ;;  %v1374_v8 = vld [vmem:[%s6459_s14 + $0xc8] sm:$0xff] }
  0x64   : > { %v5413_v6 = vpack.c.bf16 %v1372_v5, %v1371_v4  ;;  %v5416_v9 = vpack.c.bf16 %v1374_v8, %v1373_v7  ;;  %v1375_v10 = vld [vmem:[%s6459_s14 + $0xd0] sm:$0xff]  ;;  %v1376_v11 = vld [vmem:[%s6459_s14 + $0xd8] sm:$0xff]  ;;  %v1377_v13 = vld [vmem:[%s6459_s14 + $0xe0] sm:$0xff] }
  0x65   : > { %v5419_v12 = vpack.c.bf16 %v1376_v11, %v1375_v10  ;;  %v1378_v14 = vld [vmem:[%s6459_s14 + $0xe8] sm:$0xff]  ;;  %v1379_v16 = vld [vmem:[%s6459_s14 + $0xf0] sm:$0xff]  ;;  %v1380_v17 = vld [vmem:[%s6459_s14 + $0xf8] sm:$0xff] }
  0x66   : > { %5387 = vmatpush1.bf16.msra.mxu0 %v5386_v42  ;;  %v5422_v15 = vpack.c.bf16 %v1378_v14, %v1377_v13  ;;  %v5425_v18 = vpack.c.bf16 %v1380_v17, %v1379_v16  ;;  %v1381_v19 = vld [vmem:[%s6459_s14 + $0x100] sm:$0xff]  ;;  %v1382_v20 = vld [vmem:[%s6459_s14 + $0x108] sm:$0xff]  ;;  %v1383_v24 = vld [vmem:[%s6459_s14 + $0x110] sm:$0xff] }
  0x67   : > { %5388 = vmatprep.subr.bf16.mxu0 %v8440_v36  ;;  %v483_v21 = vld [vmem:[#allocation2] sm:$0xff]  ;;  %v5428_v22 = vpack.c.bf16 %v1382_v20, %v1381_v19  ;;  %v548_v23 = vld [vmem:[#allocation2 + $0x9] sm:$0xff]  ;;  %v1384_v25 = vld [vmem:[%s6459_s14 + $0x118] sm:$0xff] }
  0x68   : > { %v484_v26 = vld [vmem:[#allocation2 + $0x8] sm:$0xff]  ;;  %v5431_v27 = vpack.c.bf16 %v1384_v25, %v1383_v24  ;;  %v6706_v28 = vld [vmem:[#allocation2 + $0x19] sm:$0xff]  ;;  %v1387_v34 = vld [vmem:[%s6459_s14 + $0x130] sm:$0xff] }
  0x69   : > { %v1385_v29 = vld [vmem:[%s6459_s14 + $0x120] sm:$0xff]  ;;  %v1386_v30 = vld [vmem:[%s6459_s14 + $0x128] sm:$0xff]  ;;  %v6712_v31 = vld [vmem:[#allocation2 + $0x18] sm:$0xff] }
  0x6a   : > { %5390 = vmatpush1.bf16.msra.mxu0 %v5389_v46  ;;  %v5434_v32 = vpack.c.bf16 %v1386_v30, %v1385_v29  ;;  %v6714_v33 = vld [vmem:[#allocation2 + $0x21] sm:$0xff]  ;;  %v1388_v35 = vld [vmem:[%s6459_s14 + $0x138] sm:$0xff]  ;;  %v6730_v42 = vld [vmem:[#allocation2 + $0x30] sm:$0xff] }
  0x6b   : > { %5391 = vmatprep.subr.bf16.mxu0 %v8440_v36  ;;  %v6721_v37 = vld [vmem:[#allocation2 + $0x20] sm:$0xff]  ;;  %v5437_v38 = vpack.c.bf16 %v1388_v35, %v1387_v34  ;;  %v6723_v39 = vld [vmem:[#allocation2 + $0x31] sm:$0xff]  ;;  %v1390_v41 = vld [vmem:[%s6459_s14 + $0x148] sm:$0xff] }
  0x6c   : > { %v1389_v40 = vld [vmem:[%s6459_s14 + $0x140] sm:$0xff]  ;;  %v6732_v44 = vld [vmem:[#allocation2 + $0x32] sm:$0xff]  ;;  %v6744_v50 = vld [vmem:[#allocation2 + $0x49] sm:$0xff] }
  0x6d   : > { %v5440_v43 = vpack.c.bf16 %v1390_v41, %v1389_v40  ;;  %v6734_v45 = vld [vmem:[#allocation2 + $0x39] sm:$0xff]  ;;  %v1391_v46 = vld [vmem:[%s6459_s14 + $0x150] sm:$0xff]  ;;  %5251 = vmatprep.mubr.f32.mxu1 %v6732_v44  ;;  %v6751_v53 = vld [vmem:[#allocation2 + $0x48] sm:$0xff] }
  0x6e   : > { %5393 = vmatpush1.bf16.msra.mxu0 %v5392_v49  ;;  %v1392_v47 = vld [vmem:[%s6459_s14 + $0x158] sm:$0xff]  ;;  %v1393_v51 = vld [vmem:[%s6459_s14 + $0x160] sm:$0xff]  ;;  %v1395_v56 = vld [vmem:[%s6459_s14 + $0x170] sm:$0xff] }
  0x6f   : > { %5394 = vmatprep.subr.bf16.mxu0 %v8440_v36  ;;  %v6742_v48 = vld [vmem:[#allocation2 + $0x38] sm:$0xff]  ;;  %v5443_v49 = vpack.c.bf16 %v1392_v47, %v1391_v46  ;;  %v6762_v60 = vld [vmem:[#allocation2 + $0x61] sm:$0xff]  ;;  %v6771_v1 = vld [vmem:[#allocation2 + $0x69] sm:$0xff] }
  0x70   : > { %v1396_v57 = vld [vmem:[%s6459_s14 + $0x178] sm:$0xff]  ;;  %v1398_v62 = vld [vmem:[%s6459_s14 + $0x188] sm:$0xff]  ;;  %v6769_v63 = vld [vmem:[#allocation2 + $0x60] sm:$0xff] }
  0x71   : > { %v5449_v59 = vpack.c.bf16 %v1396_v57, %v1395_v56  ;;  %v1399_v2 = vld [vmem:[%s6459_s14 + $0x190] sm:$0xff]  ;;  %v6778_v4 = vld [vmem:[#allocation2 + $0x68] sm:$0xff]  ;;  %v1401_v7 = vld [vmem:[%s6459_s14 + $0x1a0] sm:$0xff] }
  0x72   : > { %5396 = vmatpush1.bf16.msra.mxu0 %v5395_v52  ;;  %v1394_v52 = vld [vmem:[%s6459_s14 + $0x168] sm:$0xff]  ;;  %v1404_v13 = vld [vmem:[%s6459_s14 + $0x1b8] sm:$0xff]  ;;  %v6796_v14 = vld [vmem:[#allocation2 + $0x80] sm:$0xff] }
  0x73   : > { %5397 = vmatprep.subr.bf16.mxu0 %v8440_v36  ;;  %v5446_v54 = vpack.c.bf16 %v1394_v52, %v1393_v51  ;;  %v1402_v8 = vld [vmem:[%s6459_s14 + $0x1a8] sm:$0xff]  ;;  %v6798_v16 = vld [vmem:[#allocation2 + $0x91] sm:$0xff]  ;;  %v1405_v17 = vld [vmem:[%s6459_s14 + $0x1c0] sm:$0xff] }
  0x74   : > { %v5458_v10 = vpack.c.bf16 %v1402_v8, %v1401_v7  ;;  %v6789_v11 = vld [vmem:[#allocation2 + $0x81] sm:$0xff]  ;;  %v6805_v19 = vld [vmem:[#allocation2 + $0x90] sm:$0xff]  ;;  %v6814_v24 = vld [vmem:[#allocation2 + $0x98] sm:$0xff] }
  0x75   : > { %v1410_v29 = vld [vmem:[%s6459_s14 + $0x1e8] sm:$0xff]  ;;  %v6825_v34 = vld [vmem:[#allocation2 + $0xb1] sm:$0xff]  ;;  %v6839_v46 = vld [vmem:[#allocation2 + $0xc0] sm:$0xff] }
  0x76   : > { %5399 = vmatpush1.bf16.msra.mxu0 %v5398_v55  ;;  %v6753_v55 = vld [vmem:[#allocation2 + $0x51] sm:$0xff]  ;;  %v6823_v30 = vld [vmem:[#allocation2 + $0xa8] sm:$0xff]  ;;  %v6848_v51 = vld [vmem:[#allocation2 + $0xd9] sm:$0xff] }
  0x77   : > { %5400 = vmatprep.subr.bf16.mxu0 %v8440_v36  ;;  %v1411_v35 = vld [vmem:[%s6459_s14 + $0x1f0] sm:$0xff]  ;;  %v6852_v52 = vld [vmem:[#allocation2 + $0xd8] sm:$0xff]  ;;  %v6858_v56 = vld [vmem:[#allocation2 + $0xe0] sm:$0xff] }
  0x78   : > { %v6832_v40 = vld [vmem:[#allocation2 + $0xb0] sm:$0xff]  ;;  %v6884_v7 = vld [vmem:[#allocation2 + $0x121] sm:$0xff] }
  0x79   : > { %v6841_v47 = vld [vmem:[#allocation2 + $0xc9] sm:$0xff]  ;;  %v6860_v57 = vld [vmem:[#allocation2 + $0xf1] sm:$0xff]  ;;  %8493 = vst [vmem:[#allocation6_spill] sm:$0xff] %v6884_v7  ;;  %v6888_v8 = vld [vmem:[#allocation2 + $0x120] sm:$0xff] }
  0x7a   : > { %5402 = vmatpush1.bf16.msra.mxu0 %v5401_v58  ;;  %v6760_v58 = vld [vmem:[#allocation2 + $0x50] sm:$0xff] }
  0x7b   : > { %5403 = vmatprep.subr.bf16.mxu0 %v8440_v36 }
  0x7e   : > { %5405 = vmatpush1.bf16.msra.mxu0 %v5404_v61  ;;  %v1397_v61 = vld [vmem:[%s6459_s14 + $0x180] sm:$0xff] }
  0x7f   : > { %5406 = vmatprep.subr.bf16.mxu0 %v8440_v36 }
  0x82   : > { %5408 = vmatpush1.bf16.msra.mxu0 %v5407_v0  ;;  %v5452_v0 = vpack.c.bf16 %v1398_v62, %v1397_v61  ;;  %v6866_v61 = vld [vmem:[#allocation2 + $0xf9] sm:$0xff] }
  0x83   : > { %5409 = vmatprep.subr.bf16.mxu0 %v8440_v36  ;;  %v6870_v62 = vld [vmem:[#allocation2 + $0xf8] sm:$0xff] }
  0x86   : > { %5411 = vmatpush1.bf16.msra.mxu0 %v5410_v3  ;;  %v1400_v3 = vld [vmem:[%s6459_s14 + $0x198] sm:$0xff] }
  0x87   : > { %5412 = vmatprep.subr.bf16.mxu0 %v8440_v36  ;;  %v5455_v5 = vpack.c.bf16 %v1400_v3, %v1399_v2  ;;  %v6876_v2 = vld [vmem:[#allocation2 + $0x108] sm:$0xff]  ;;  %v6878_v3 = vld [vmem:[#allocation2 + $0x111] sm:$0xff] }
  0x8a   : > { %5414 = vmatpush1.bf16.msra.mxu0 %v5413_v6  ;;  %v6780_v6 = vld [vmem:[#allocation2 + $0x79] sm:$0xff] }
  0x8b   : > { %5415 = vmatprep.subr.bf16.mxu0 %v8440_v36 }
  0x8e   : > { %5417 = vmatpush1.bf16.msra.mxu0 %v5416_v9  ;;  %v6787_v9 = vld [vmem:[#allocation2 + $0x78] sm:$0xff] }
  0x8f   : > { %5418 = vmatprep.subr.bf16.mxu0 %v8440_v36 }
  0x92   : > { %5420 = vmatpush1.bf16.msra.mxu0 %v5419_v12  ;;  %v1403_v12 = vld [vmem:[%s6459_s14 + $0x1b0] sm:$0xff] }
  0x93   : > { %5421 = vmatprep.subr.bf16.mxu0 %v8440_v36 }
  0x96   : > { %5423 = vmatpush1.bf16.msra.mxu0 %v5422_v15  ;;  %v5461_v15 = vpack.c.bf16 %v1404_v13, %v1403_v12  ;;  %v6894_v12 = vld [vmem:[#allocation2 + $0x128] sm:$0xff]  ;;  %v6896_v13 = vld [vmem:[#allocation2 + $0x139] sm:$0xff] }
  0x97   : > { %5424 = vmatprep.subr.bf16.mxu0 %v8440_v36  ;;  %8495 = vst [vmem:[#allocation8_spill] sm:$0xff] %v6896_v13 }
  0x9a   : > { %5426 = vmatpush1.bf16.msra.mxu0 %v5425_v18  ;;  %v1406_v18 = vld [vmem:[%s6459_s14 + $0x1c8] sm:$0xff] }
  0x9b   : > { %5427 = vmatprep.subr.bf16.mxu0 %v8440_v36  ;;  %v5464_v20 = vpack.c.bf16 %v1406_v18, %v1405_v17  ;;  %v6902_v17 = vld [vmem:[#allocation2 + $0x141] sm:$0xff] }
  0x9c   : > { %8496 = vst [vmem:[#allocation9_spill] sm:$0xff] %v6902_v17  ;;  %v6906_v18 = vld [vmem:[#allocation2 + $0x140] sm:$0xff] }
  0x9d   : > { %1565 = vmatmul.mubr.f32.vlgmr.msra.gmra.mrb[0].mxu0 %v483_v21  ;;  %v6807_v21 = vld [vmem:[#allocation2 + $0x99] sm:$0xff] }
  0x9e   : > { %5429 = vmatpush1.bf16.msra.mxu0 %v5428_v22  ;;  %1569 = vmatprep.mubr.f32.mxu0 %v548_v23  ;;  %v1407_v22 = vld [vmem:[%s6459_s14 + $0x1d0] sm:$0xff]  ;;  %v1408_v23 = vld [vmem:[%s6459_s14 + $0x1d8] sm:$0xff] }
  0x9f   : > { %5430 = vmatprep.subr.bf16.mxu0 %v8440_v36  ;;  %v5467_v25 = vpack.c.bf16 %v1408_v23, %v1407_v22  ;;  %v6912_v22 = vld [vmem:[#allocation2 + $0x150] sm:$0xff]  ;;  %v6914_v23 = vld [vmem:[#allocation2 + $0x159] sm:$0xff] }
  0xa0   : > { %8498 = vst [vmem:[#allocation11_spill] sm:$0xff] %v6914_v23 }
  0xa1   : > { %1570 = vmatmul.mubr.f32.gmra.mrb[2].mxu0 %v484_v26  ;;  %v6816_v26 = vld [vmem:[#allocation2 + $0xa9] sm:$0xff] }
  0xa2   : > { %1574 = vmatprep.mubr.f32.mxu0 %v6706_v28  ;;  %5432 = vmatpush1.bf16.msra.mxu0 %v5431_v27  ;;  %v1409_v27 = vld [vmem:[%s6459_s14 + $0x1e0] sm:$0xff] }
  0xa3   : > { %5433 = vmatprep.subr.bf16.mxu0 %v8440_v36 }
  0xa5   : > { %1575 = vmatmul.mubr.f32.gmra.mrb[4].mxu0 %v6712_v31 }
  0xa6   : > { %1579 = vmatprep.mubr.f32.mxu0 %v6714_v33  ;;  %5435 = vmatpush1.bf16.msra.mxu0 %v5434_v32  ;;  %v5470_v32 = vpack.c.bf16 %v1410_v29, %v1409_v27  ;;  %v6920_v27 = vld [vmem:[#allocation2 + $0x169] sm:$0xff] }
  0xa7   : > { %5436 = vmatprep.subr.bf16.mxu0 %v8440_v36  ;;  %8499 = vst [vmem:[#allocation12_spill] sm:$0xff] %v6920_v27  ;;  %v6924_v29 = vld [vmem:[#allocation2 + $0x168] sm:$0xff] }
  0xa9   : > { %1580 = vmatmul.mubr.f32.gmra.mrb[6].mxu0 %v6721_v37 }
  0xaa   : > { %1584 = vmatprep.mubr.f32.mxu0 %v6723_v39  ;;  %5438 = vmatpush1.bf16.msra.mxu0 %v5437_v38  ;;  %v1412_v38 = vld [vmem:[%s6459_s14 + $0x1f8] sm:$0xff] }
  0xab   : > { %5439 = vmatprep.subr.bf16.mxu0 %v8440_v36  ;;  %v5473_v41 = vpack.c.bf16 %v1412_v38, %v1411_v35  ;;  %v6930_v35 = vld [vmem:[#allocation2 + $0x170] sm:$0xff]  ;;  %v1413_v38 = vld [vmem:[%s6459_s14 + $0x200] sm:$0xff] }
  0xad   : > { %1585 = vmatmul.mubr.f32.gmra.mrb[8].mxu0 %v6730_v42 }
  0xae   : > { %1589 = vmatprep.mubr.f32.mxu0 %v6734_v45  ;;  %5441 = vmatpush1.bf16.msra.mxu0 %v5440_v43  ;;  %v6834_v43 = vld [vmem:[#allocation2 + $0xc1] sm:$0xff] }
  0xaf   : > { %5442 = vmatprep.subr.bf16.mxu0 %v8440_v36 }
  0xb1   : > { %1590 = vmatmul.mubr.f32.gmra.mrb[10].mxu0 %v6742_v48 }
  0xb2   : > { %1594 = vmatprep.mubr.f32.mxu0 %v6744_v50  ;;  %5444 = vmatpush1.bf16.msra.mxu0 %v5443_v49  ;;  %v6846_v49 = vld [vmem:[#allocation2 + $0xc8] sm:$0xff] }
  0xb3   : > { %5445 = vmatprep.subr.bf16.mxu0 %v8440_v36 }
  0xb5   : > { %1595 = vmatmul.mubr.f32.gmra.mrb[12].mxu0 %v6751_v53 }
  0xb6   : > { %1599 = vmatprep.mubr.f32.mxu0 %v6753_v55  ;;  %5447 = vmatpush1.bf16.msra.mxu0 %v5446_v54  ;;  %v6854_v54 = vld [vmem:[#allocation2 + $0xe1] sm:$0xff] }
  0xb7   : > { %5448 = vmatprep.subr.bf16.mxu0 %v8440_v36 }
  0xb9   : > { %1600 = vmatmul.mubr.f32.gmra.mrb[14].mxu0 %v6760_v58 }
  0xba   : > { %1604 = vmatprep.mubr.f32.mxu0 %v6762_v60  ;;  %5450 = vmatpush1.bf16.msra.mxu0 %v5449_v59  ;;  %v6864_v59 = vld [vmem:[#allocation2 + $0xf0] sm:$0xff] }
  0xbb   : > { %5451 = vmatprep.subr.bf16.mxu0 %v8440_v36 }
  0xbd   : > { %1605 = vmatmul.mubr.f32.gmra.mrb[16].mxu0 %v6769_v63 }
  0xbe   : > { %1609 = vmatprep.mubr.f32.mxu0 %v6771_v1  ;;  %5453 = vmatpush1.bf16.msra.mxu0 %v5452_v0  ;;  %v6872_v0 = vld [vmem:[#allocation2 + $0x109] sm:$0xff] }
  0xbf   : > { %5454 = vmatprep.subr.bf16.mxu0 %v8440_v36 }
  0xc1   : > { %1610 = vmatmul.mubr.f32.gmra.mrb[18].mxu0 %v6778_v4 }
  0xc2   : > { %1614 = vmatprep.mubr.f32.mxu0 %v6780_v6  ;;  %5456 = vmatpush1.bf16.msra.mxu0 %v5455_v5  ;;  %v6882_v5 = vld [vmem:[#allocation2 + $0x110] sm:$0xff] }
  0xc3   : > { %5457 = vmatprep.subr.bf16.mxu0 %v8440_v36 }
  0xc5   : > { %1615 = vmatmul.mubr.f32.gmra.mrb[20].mxu0 %v6787_v9 }
  0xc6   : > { %1619 = vmatprep.mubr.f32.mxu0 %v6789_v11  ;;  %5459 = vmatpush1.bf16.msra.mxu0 %v5458_v10  ;;  %v6890_v10 = vld [vmem:[#allocation2 + $0x129] sm:$0xff] }
  0xc7   : > { %5460 = vmatprep.subr.bf16.mxu0 %v8440_v36  ;;  %8494 = vst [vmem:[#allocation7_spill] sm:$0xff] %v6890_v10 }
  0xc9   : > { %1620 = vmatmul.mubr.f32.gmra.mrb[22].mxu0 %v6796_v14 }
  0xca   : > { %1624 = vmatprep.mubr.f32.mxu0 %v6798_v16  ;;  %5462 = vmatpush1.bf16.msra.mxu0 %v5461_v15  ;;  %v6900_v15 = vld [vmem:[#allocation2 + $0x138] sm:$0xff] }
  0xcb   : > { %5463 = vmatprep.subr.bf16.mxu0 %v8440_v36 }
  0xcd   : > { %1625 = vmatmul.mubr.f32.gmra.mrb[24].mxu0 %v6805_v19 }
  0xce   : > { %1629 = vmatprep.mubr.f32.mxu0 %v6807_v21  ;;  %5465 = vmatpush1.bf16.msra.mxu0 %v5464_v20  ;;  %v6908_v20 = vld [vmem:[#allocation2 + $0x151] sm:$0xff] }
  0xcf   : > { %5466 = vmatprep.subr.bf16.mxu0 %v8440_v36  ;;  %8497 = vst [vmem:[#allocation10_spill] sm:$0xff] %v6908_v20 }
  0xd1   : > { %1630 = vmatmul.mubr.f32.gmra.mrb[26].mxu0 %v6814_v24 }
  0xd2   : > { %1634 = vmatprep.mubr.f32.mxu0 %v6816_v26  ;;  %5468 = vmatpush1.bf16.msra.mxu0 %v5467_v25  ;;  %v6918_v25 = vld [vmem:[#allocation2 + $0x158] sm:$0xff] }
  0xd3   : > { %5469 = vmatprep.subr.bf16.mxu0 %v8440_v36 }
  0xd5   : > { %1635 = vmatmul.mubr.f32.gmra.mrb[28].mxu0 %v6823_v30 }
  0xd6   : > { %1639 = vmatprep.mubr.f32.mxu0 %v6825_v34  ;;  %5471 = vmatpush1.bf16.msra.mxu0 %v5470_v32  ;;  %v6926_v32 = vld [vmem:[#allocation2 + $0x171] sm:$0xff] }
  0xd7   : > { %5472 = vmatprep.subr.bf16.mxu0 %v8440_v36  ;;  %8500 = vst [vmem:[#allocation13_spill] sm:$0xff] %v6926_v32 }
  0xd9   : > { %1640 = vmatmul.mubr.f32.gmra.mrb[30].mxu0 %v6832_v40 }
  0xda   : > { %1644 = vmatprep.mubr.f32.mxu0 %v6834_v43  ;;  %5474 = vmatpush1.bf16.msra.mxu0 %v5473_v41  ;;  %v1414_v41 = vld [vmem:[%s6459_s14 + $0x208] sm:$0xff] }
  0xdb   : > { %5475 = vmatprep.subr.bf16.mxu0 %v8440_v36  ;;  %v611_v36 = vld [vmem:[#allocation2 + $0x2] sm:$0xff] }
  0xdd   : > { %1645 = vmatmul.mubr.f32.gmra.mrb[32].mxu0 %v6839_v46 }
  0xde   : > { %1649 = vmatprep.mubr.f32.mxu0 %v6841_v47 }
  0xe1   : > { %1650 = vmatmul.mubr.f32.gmra.mrb[34].mxu0 %v6846_v49 }
  0xe2   : > { %1654 = vmatprep.mubr.f32.mxu0 %v6848_v51 }
  0xe5   : > { %1655 = vmatmul.mubr.f32.gmra.mrb[36].mxu0 %v6852_v52 }
  0xe6   : > { %1659 = vmatprep.mubr.f32.mxu0 %v6854_v54 }
  0xe9   : > { %1660 = vmatmul.mubr.f32.gmra.mrb[38].mxu0 %v6858_v56 }
  0xea   : > { %1664 = vmatprep.mubr.f32.mxu0 %v6860_v57 }
  0xed   : > { %1665 = vmatmul.mubr.f32.gmra.mrb[40].mxu0 %v6864_v59 }
  0xee   : > { %1669 = vmatprep.mubr.f32.mxu0 %v6866_v61 }
  0xf1   : > { %1670 = vmatmul.mubr.f32.gmra.mrb[42].mxu0 %v6870_v62 }
  0xf2   : > { %1674 = vmatprep.mubr.f32.mxu0 %v6872_v0 }
  0xf5   : > { %1675 = vmatmul.mubr.f32.gmra.mrb[44].mxu0 %v6876_v2 }
  0xf6   : > { %1679 = vmatprep.mubr.f32.mxu0 %v6878_v3 }
  0xf9   : > { %1680 = vmatmul.mubr.f32.gmra.mrb[46].mxu0 %v6882_v5 }
  0xfa   : > { %1684 = vmatprep.mubr.f32.mxu0 %v6884_v7  ;;  %v1418_v7 = vld [vmem:[%s6459_s14 + $0x228] sm:$0xff] }
  0xfd   : > { %1685 = vmatmul.mubr.f32.gmra.mrb[48].mxu0 %v6888_v8 }
  0xfe   : > { %1689 = vmatprep.mubr.f32.mxu0 %v6890_v10  ;;  %v1417_v10 = vld [vmem:[%s6459_s14 + $0x220] sm:$0xff] }
 0x101   : > { %1690 = vmatmul.mubr.f32.gmra.mrb[50].mxu0 %v6894_v12 }
 0x102   : > { %1694 = vmatprep.mubr.f32.mxu0 %v6896_v13  ;;  %v8501_v13 = vmov 0.0|0.0  }
 0x105   : > { %1695 = vmatmul.mubr.f32.gmra.mrb[52].mxu0 %v6900_v15 }
 0x106   : > { %1699 = vmatprep.mubr.f32.mxu0 %v6902_v17 }
 0x109   : > { %1700 = vmatmul.mubr.f32.gmra.mrb[54].mxu0 %v6906_v18 }
 0x10a   : > { %1704 = vmatprep.mubr.f32.mxu0 %v6908_v20  ;;  %v1416_v20 = vld [vmem:[%s6459_s14 + $0x218] sm:$0xff] }
 0x10d   : > { %1705 = vmatmul.mubr.f32.gmra.mrb[56].mxu0 %v6912_v22 }
 0x10e   : > { %1709 = vmatprep.mubr.f32.mxu0 %v6914_v23  ;;  %v1415_v23 = vld [vmem:[%s6459_s14 + $0x210] sm:$0xff] }
 0x10f   : > { %v5479_v17 = vpack.c.bf16 %v1416_v20, %v1415_v23  ;;  %v6950_v20 = vld [vmem:[#allocation2 + $0x22] sm:$0xff] }
 0x111   : > { %1710 = vmatmul.mubr.f32.gmra.mrb[58].mxu0 %v6918_v25 }
 0x112   : > { %1714 = vmatprep.mubr.f32.mxu0 %v6920_v27  ;;  %v5476_v27 = vpack.c.bf16 %v1414_v41, %v1413_v38  ;;  %v5482_v38 = vpack.c.bf16 %v1418_v7, %v1417_v10  ;;  %v1422_v7 = vld [vmem:[%s6459_s14 + $0x248] sm:$0xff]  ;;  %v1425_v41 = vld [vmem:[%s6459_s14 + $0x260] sm:$0xff] }
 0x115   : > { %1715 = vmatmul.mubr.f32.gmra.mrb[60].mxu0 %v6924_v29 }
 0x116   : > { %1719 = vmatprep.mubr.f32.mxu0 %v6926_v32  ;;  %v612_v32 = vld [vmem:[#allocation2 + $0xa] sm:$0xff] }
 0x119   : > { %1720 = vmatmul.mubr.f32.gmra.mrb[62].mxu0 %v6930_v35 }
 0x11a   : > { %1789 = vmatprep.mubr.f32.mxu0 %v6712_v31  ;;  %v6943_v31 = vld [vmem:[#allocation2 + $0x1a] sm:$0xff] }
 0x11d   : > { %1790 = vmatmul.mubr.f32.vlgmr.msra.gmra.mrb[0].mxu0 %v611_v36  ;;  %v1419_v36 = vld [vmem:[%s6459_s14 + $0x230] sm:$0xff] }
 0x11e   : > { %5477 = vmatpush1.bf16.msra.mxu0 %v5476_v27  ;;  %1794 = vmatprep.mubr.f32.mxu0 %v6721_v37  ;;  %v1420_v37 = vld [vmem:[%s6459_s14 + $0x238] sm:$0xff] }
 0x11f   : > { %5478 = vmatprep.subr.bf16.mxu0 %v8501_v13  ;;  %v5485_v23 = vpack.c.bf16 %v1420_v37, %v1419_v36  ;;  %v6962_v27 = vld [vmem:[#allocation2 + $0x3a] sm:$0xff] }
 0x120   : > { %v1428_v37 = vld [vmem:[%s6459_s14 + $0x278] sm:$0xff] }
 0x121   : > { %1795 = vmatmul.mubr.f32.gmra.mrb[2].mxu0 %v612_v32 }
 0x122   : > { %1799 = vmatprep.mubr.f32.mxu0 %v6730_v42  ;;  %5480 = vmatpush1.bf16.msra.mxu0 %v5479_v17  ;;  %v1421_v42 = vld [vmem:[%s6459_s14 + $0x240] sm:$0xff]  ;;  %v1423_v17 = vld [vmem:[%s6459_s14 + $0x250] sm:$0xff] }
 0x123   : > { %5481 = vmatprep.subr.bf16.mxu0 %v8501_v13  ;;  %v5488_v10 = vpack.c.bf16 %v1422_v7, %v1421_v42  ;;  %v1430_v7 = vld [vmem:[%s6459_s14 + $0x288] sm:$0xff] }
 0x125   : > { %1800 = vmatmul.mubr.f32.gmra.mrb[4].mxu0 %v6943_v31 }
 0x126   : > { %1804 = vmatprep.mubr.f32.mxu0 %v6742_v48  ;;  %5483 = vmatpush1.bf16.msra.mxu0 %v5482_v38  ;;  %v1424_v48 = vld [vmem:[%s6459_s14 + $0x258] sm:$0xff]  ;;  %v6969_v38 = vld [vmem:[#allocation2 + $0x4a] sm:$0xff] }
 0x127   : > { %5484 = vmatprep.subr.bf16.mxu0 %v8501_v13  ;;  %v5491_v32 = vpack.c.bf16 %v1424_v48, %v1423_v17  ;;  %v1432_v48 = vld [vmem:[%s6459_s14 + $0x298] sm:$0xff] }
 0x129   : > { %1805 = vmatmul.mubr.f32.gmra.mrb[6].mxu0 %v6950_v20 }
 0x12a   : > { %1809 = vmatprep.mubr.f32.mxu0 %v6751_v53  ;;  %5486 = vmatpush1.bf16.msra.mxu0 %v5485_v23  ;;  %v1426_v53 = vld [vmem:[%s6459_s14 + $0x268] sm:$0xff]  ;;  %v6976_v23 = vld [vmem:[#allocation2 + $0x52] sm:$0xff] }
 0x12b   : > { %5487 = vmatprep.subr.bf16.mxu0 %v8501_v13  ;;  %v5494_v36 = vpack.c.bf16 %v1426_v53, %v1425_v41  ;;  %v1434_v53 = vld [vmem:[%s6459_s14 + $0x2a8] sm:$0xff] }
 0x12d   : > { %1810 = vmatmul.mubr.f32.gmra.mrb[8].mxu0 %v6732_v44 }
 0x12e   : > { %1814 = vmatprep.mubr.f32.mxu0 %v6760_v58  ;;  %5489 = vmatpush1.bf16.msra.mxu0 %v5488_v10  ;;  %v1427_v58 = vld [vmem:[%s6459_s14 + $0x270] sm:$0xff]  ;;  %v6983_v10 = vld [vmem:[#allocation2 + $0x62] sm:$0xff] }
 0x12f   : > { %5490 = vmatprep.subr.bf16.mxu0 %v8501_v13  ;;  %v5497_v42 = vpack.c.bf16 %v1428_v37, %v1427_v58  ;;  %v1436_v37 = vld [vmem:[%s6459_s14 + $0x2b8] sm:$0xff] }
 0x131   : > { %1815 = vmatmul.mubr.f32.gmra.mrb[10].mxu0 %v6962_v27 }
 0x132   : > { %1819 = vmatprep.mubr.f32.mxu0 %v6769_v63  ;;  %5492 = vmatpush1.bf16.msra.mxu0 %v5491_v32  ;;  %v1429_v63 = vld [vmem:[%s6459_s14 + $0x280] sm:$0xff]  ;;  %v6990_v32 = vld [vmem:[#allocation2 + $0x6a] sm:$0xff] }
 0x133   : > { %5493 = vmatprep.subr.bf16.mxu0 %v8501_v13  ;;  %v5500_v17 = vpack.c.bf16 %v1430_v7, %v1429_v63  ;;  %v1438_v7 = vld [vmem:[%s6459_s14 + $0x2c8] sm:$0xff] }
 0x135   : > { %1820 = vmatmul.mubr.f32.gmra.mrb[12].mxu0 %v6969_v38 }
 0x136   : > { %1824 = vmatprep.mubr.f32.mxu0 %v6778_v4  ;;  %5495 = vmatpush1.bf16.msra.mxu0 %v5494_v36  ;;  %v1431_v4 = vld [vmem:[%s6459_s14 + $0x290] sm:$0xff]  ;;  %v6997_v36 = vld [vmem:[#allocation2 + $0x7a] sm:$0xff] }
 0x137   : > { %5496 = vmatprep.subr.bf16.mxu0 %v8501_v13  ;;  %v5503_v41 = vpack.c.bf16 %v1432_v48, %v1431_v4  ;;  %v1440_v48 = vld [vmem:[%s6459_s14 + $0x2d8] sm:$0xff] }
 0x139   : > { %1825 = vmatmul.mubr.f32.gmra.mrb[14].mxu0 %v6976_v23 }
 0x13a   : > { %1829 = vmatprep.mubr.f32.mxu0 %v6787_v9  ;;  %5498 = vmatpush1.bf16.msra.mxu0 %v5497_v42  ;;  %v1433_v9 = vld [vmem:[%s6459_s14 + $0x2a0] sm:$0xff] }
 0x13b   : > { %5499 = vmatprep.subr.bf16.mxu0 %v8501_v13  ;;  %v5506_v58 = vpack.c.bf16 %v1434_v53, %v1433_v9  ;;  %v7004_v42 = vld [vmem:[#allocation2 + $0x82] sm:$0xff] }
 0x13c   : > { %v1442_v53 = vld [vmem:[%s6459_s14 + $0x2e8] sm:$0xff] }
 0x13d   : > { %1830 = vmatmul.mubr.f32.gmra.mrb[16].mxu0 %v6983_v10 }
 0x13e   : > { %1834 = vmatprep.mubr.f32.mxu0 %v6796_v14  ;;  %5501 = vmatpush1.bf16.msra.mxu0 %v5500_v17  ;;  %v1435_v14 = vld [vmem:[%s6459_s14 + $0x2b0] sm:$0xff] }
 0x13f   : > { %5502 = vmatprep.subr.bf16.mxu0 %v8501_v13  ;;  %v5509_v63 = vpack.c.bf16 %v1436_v37, %v1435_v14  ;;  %v7011_v17 = vld [vmem:[#allocation2 + $0x92] sm:$0xff] }
 0x140   : > { %v1443_v37 = vld [vmem:[%s6459_s14 + $0x2f0] sm:$0xff] }
 0x141   : > { %1835 = vmatmul.mubr.f32.gmra.mrb[18].mxu0 %v6990_v32 }
 0x142   : > { %1839 = vmatprep.mubr.f32.mxu0 %v6805_v19  ;;  %5504 = vmatpush1.bf16.msra.mxu0 %v5503_v41  ;;  %v1437_v19 = vld [vmem:[%s6459_s14 + $0x2c0] sm:$0xff] }
 0x143   : > { %5505 = vmatprep.subr.bf16.mxu0 %v8501_v13  ;;  %v5512_v4 = vpack.c.bf16 %v1438_v7, %v1437_v19  ;;  %v7018_v41 = vld [vmem:[#allocation2 + $0x9a] sm:$0xff] }
 0x144   : > { %v7046_v7 = vld [vmem:[#allocation2 + $0xda] sm:$0xff] }
 0x145   : > { %1840 = vmatmul.mubr.f32.gmra.mrb[20].mxu0 %v6997_v36 }
 0x146   : > { %1844 = vmatprep.mubr.f32.mxu0 %v6814_v24  ;;  %5507 = vmatpush1.bf16.msra.mxu0 %v5506_v58  ;;  %v1439_v24 = vld [vmem:[%s6459_s14 + $0x2d0] sm:$0xff] }
 0x147   : > { %5508 = vmatprep.subr.bf16.mxu0 %v8501_v13  ;;  %v5515_v9 = vpack.c.bf16 %v1440_v48, %v1439_v24  ;;  %v7025_v58 = vld [vmem:[#allocation2 + $0xaa] sm:$0xff] }
 0x148   : > { %v1478_v24 = vld [vmem:[%s6459_s14 + $0x408] sm:$0xff] }
 0x149   : > { %1845 = vmatmul.mubr.f32.gmra.mrb[22].mxu0 %v7004_v42  ;;  %v7076_v48 = vld [vmem:[#allocation2 + $0x12a] sm:$0xff] }
 0x14a   : > { %1849 = vmatprep.mubr.f32.mxu0 %v6823_v30  ;;  %5510 = vmatpush1.bf16.msra.mxu0 %v5509_v63  ;;  %v1441_v30 = vld [vmem:[%s6459_s14 + $0x2e0] sm:$0xff]  ;;  %v7032_v63 = vld [vmem:[#allocation2 + $0xb2] sm:$0xff] }
 0x14b   : > { %5511 = vmatprep.subr.bf16.mxu0 %v8501_v13  ;;  %v5518_v14 = vpack.c.bf16 %v1442_v53, %v1441_v30  ;;  %v7082_v30 = vld [vmem:[#allocation2 + $0x13a] sm:$0xff] }
 0x14c   : > { %v1481_v53 = vld [vmem:[%s6459_s14 + $0x420] sm:$0xff] }
 0x14d   : > { %1850 = vmatmul.mubr.f32.gmra.mrb[24].mxu0 %v7011_v17 }
 0x14e   : > { %1854 = vmatprep.mubr.f32.mxu0 %v6832_v40  ;;  %5513 = vmatpush1.bf16.msra.mxu0 %v5512_v4  ;;  %v1444_v40 = vld [vmem:[%s6459_s14 + $0x2f8] sm:$0xff]  ;;  %v1477_v4 = vld [vmem:[%s6459_s14 + $0x400] sm:$0xff] }
 0x14f   : > { %5514 = vmatprep.subr.bf16.mxu0 %v8501_v13  ;;  %v5521_v19 = vpack.c.bf16 %v1444_v40, %v1443_v37  ;;  %v7088_v37 = vld [vmem:[#allocation2 + $0x142] sm:$0xff]  ;;  %v1483_v40 = vld [vmem:[%s6459_s14 + $0x430] sm:$0xff] }
 0x151   : > { %1855 = vmatmul.mubr.f32.gmra.mrb[26].mxu0 %v7018_v41 }
 0x152   : > { %1859 = vmatprep.mubr.f32.mxu0 %v6839_v46  ;;  %5516 = vmatpush1.bf16.msra.mxu0 %v5515_v9  ;;  %v7037_v46 = vld [vmem:[#allocation2 + $0xc2] sm:$0xff]  ;;  %v1480_v9 = vld [vmem:[%s6459_s14 + $0x418] sm:$0xff] }
 0x153   : > { %5517 = vmatprep.subr.bf16.mxu0 %v8501_v13 }
 0x155   : > { %1860 = vmatmul.mubr.f32.gmra.mrb[28].mxu0 %v7025_v58 }
 0x156   : > { %1864 = vmatprep.mubr.f32.mxu0 %v6846_v49  ;;  %5519 = vmatpush1.bf16.msra.mxu0 %v5518_v14  ;;  %v7042_v49 = vld [vmem:[#allocation2 + $0xca] sm:$0xff] }
 0x157   : > { %5520 = vmatprep.subr.bf16.mxu0 %v8501_v13  ;;  %v1482_v14 = vld [vmem:[%s6459_s14 + $0x428] sm:$0xff] }
 0x159   : > { %1865 = vmatmul.mubr.f32.gmra.mrb[30].mxu0 %v7032_v63 }
 0x15a   : > { %1869 = vmatprep.mubr.f32.mxu0 %v6852_v52  ;;  %5522 = vmatpush1.bf16.msra.mxu0 %v5521_v19  ;;  %v7050_v52 = vld [vmem:[#allocation2 + $0xe2] sm:$0xff]  ;;  %v1484_v19 = vld [vmem:[%s6459_s14 + $0x438] sm:$0xff] }
 0x15b   : > { %5523 = vmatprep.subr.bf16.mxu0 %v8501_v13 }
 0x15d   : > { %1870 = vmatmul.mubr.f32.gmra.mrb[32].mxu0 %v7037_v46 }
 0x15e   : > { %1874 = vmatprep.mubr.f32.mxu0 %v6858_v56  ;;  %v7054_v56 = vld [vmem:[#allocation2 + $0xf2] sm:$0xff] }
 0x161   : > { %1875 = vmatmul.mubr.f32.gmra.mrb[34].mxu0 %v7042_v49 }
 0x162   : > { %1879 = vmatprep.mubr.f32.mxu0 %v6864_v59  ;;  %v7058_v59 = vld [vmem:[#allocation2 + $0xfa] sm:$0xff] }
 0x165   : > { %1880 = vmatmul.mubr.f32.gmra.mrb[36].mxu0 %v7046_v7 }
 0x166   : > { %1884 = vmatprep.mubr.f32.mxu0 %v6870_v62  ;;  %v7062_v62 = vld [vmem:[#allocation2 + $0x10a] sm:$0xff] }
 0x169   : > { %1885 = vmatmul.mubr.f32.gmra.mrb[38].mxu0 %v7050_v52 }
 0x16a   : > { %1889 = vmatprep.mubr.f32.mxu0 %v6876_v2  ;;  %v7066_v2 = vld [vmem:[#allocation2 + $0x112] sm:$0xff] }
 0x16d   : > { %1890 = vmatmul.mubr.f32.gmra.mrb[40].mxu0 %v7054_v56 }
 0x16e   : > { %1894 = vmatprep.mubr.f32.mxu0 %v6882_v5  ;;  %v7070_v5 = vld [vmem:[#allocation2 + $0x122] sm:$0xff] }
 0x171   : > { %1895 = vmatmul.mubr.f32.gmra.mrb[42].mxu0 %v7058_v59 }
 0x172   : > { %1899 = vmatprep.mubr.f32.mxu0 %v6888_v8  ;;  %v5571_v8 = vpack.c.bf16 %v1478_v24, %v1477_v4  ;;  %v7094_v4 = vld [vmem:[#allocation2 + $0x152] sm:$0xff]  ;;  %v1485_v24 = vld [vmem:[%s6459_s14 + $0x440] sm:$0xff] }
 0x174   : > { %5572 = vmatprep.subr.bf16.mxu1 %v5571_v8 }
 0x175   : > { %1900 = vmatmul.mubr.f32.gmra.mrb[44].mxu0 %v7062_v62  ;;  %5574 = vmatpush3.bf16.msra.mxu1 %v5571_v8  ;;  %v1486_v8 = vld [vmem:[%s6459_s14 + $0x448] sm:$0xff] }
 0x176   : > { %1904 = vmatprep.mubr.f32.mxu0 %v6894_v12  ;;  %v1479_v12 = vld [vmem:[%s6459_s14 + $0x410] sm:$0xff] }
 0x179   : > { %1905 = vmatmul.mubr.f32.gmra.mrb[46].mxu0 %v7066_v2 }
 0x17a   : > { %1909 = vmatprep.mubr.f32.mxu0 %v6900_v15  ;;  %v5575_v15 = vpack.c.bf16 %v1480_v9, %v1479_v12  ;;  %v7100_v12 = vld [vmem:[#allocation2 + $0x15a] sm:$0xff]  ;;  %v1487_v9 = vld [vmem:[%s6459_s14 + $0x450] sm:$0xff] }
 0x17c   : > { %5576 = vmatprep.subr.bf16.mxu1 %v5575_v15 }
 0x17d   : > { %1910 = vmatmul.mubr.f32.gmra.mrb[48].mxu0 %v7070_v5  ;;  %5578 = vmatpush3.bf16.msra.mxu1 %v5575_v15  ;;  %v1488_v15 = vld [vmem:[%s6459_s14 + $0x458] sm:$0xff] }
 0x17e   : > { %1914 = vmatprep.mubr.f32.mxu0 %v6906_v18  ;;  %v5579_v18 = vpack.c.bf16 %v1482_v14, %v1481_v53  ;;  %v7104_v53 = vld [vmem:[#allocation2 + $0x180] sm:$0xff]  ;;  %v7108_v14 = vld [vmem:[#allocation2 + $0x16a] sm:$0xff] }
 0x180   : > { %5580 = vmatprep.subr.bf16.mxu1 %v5579_v18 }
 0x181   : > { %1915 = vmatmul.mubr.f32.gmra.mrb[50].mxu0 %v7076_v48  ;;  %5582 = vmatpush3.bf16.msra.mxu1 %v5579_v18  ;;  %v1490_v18 = vld [vmem:[%s6459_s14 + $0x468] sm:$0xff] }
 0x182   : > { %1919 = vmatprep.mubr.f32.mxu0 %v6912_v22  ;;  %v5583_v22 = vpack.c.bf16 %v1484_v19, %v1483_v40  ;;  %v7112_v40 = vld [vmem:[#allocation2 + $0x188] sm:$0xff] }
 0x184   : > { %5584 = vmatprep.subr.bf16.mxu1 %v5583_v22 }
 0x185   : > { %1920 = vmatmul.mubr.f32.gmra.mrb[52].mxu0 %v7082_v30  ;;  %5586 = vmatpush3.bf16.msra.mxu1 %v5583_v22  ;;  %v7116_v22 = vld [vmem:[#allocation2 + $0x172] sm:$0xff] }
 0x186   : > { %1924 = vmatprep.mubr.f32.mxu0 %v6918_v25  ;;  %v5587_v25 = vpack.c.bf16 %v1486_v8, %v1485_v24  ;;  %v1491_v24 = vld [vmem:[%s6459_s14 + $0x470] sm:$0xff]  ;;  %v1492_v8 = vld [vmem:[%s6459_s14 + $0x478] sm:$0xff] }
 0x188   : > { %5588 = vmatprep.subr.bf16.mxu1 %v5587_v25 }
 0x189   : > { %1925 = vmatmul.mubr.f32.gmra.mrb[54].mxu0 %v7088_v37  ;;  %5590 = vmatpush3.bf16.msra.mxu1 %v5587_v25  ;;  %v1445_v25 = vld [vmem:[%s6459_s14 + $0x300] sm:$0xff] }
 0x18a   : > { %1929 = vmatprep.mubr.f32.mxu0 %v6924_v29  ;;  %v5591_v29 = vpack.c.bf16 %v1488_v15, %v1487_v9  ;;  %v1446_v9 = vld [vmem:[%s6459_s14 + $0x308] sm:$0xff]  ;;  %v5599_v15 = vpack.c.bf16 %v1492_v8, %v1491_v24  ;;  %v1449_v24 = vld [vmem:[%s6459_s14 + $0x320] sm:$0xff]  ;;  %v1452_v8 = vld [vmem:[%s6459_s14 + $0x338] sm:$0xff] }
 0x18c   : > { %5592 = vmatprep.subr.bf16.mxu1 %v5591_v29 }
 0x18d   : > { %1930 = vmatmul.mubr.f32.gmra.mrb[56].mxu0 %v7094_v4  ;;  %5594 = vmatpush3.bf16.msra.mxu1 %v5591_v29  ;;  %v5524_v29 = vpack.c.bf16 %v1446_v9, %v1445_v25  ;;  %v1454_v25 = vld [vmem:[%s6459_s14 + $0x348] sm:$0xff]  ;;  %v1456_v9 = vld [vmem:[%s6459_s14 + $0x358] sm:$0xff] }
 0x18e   : > { %1934 = vmatprep.mubr.f32.mxu0 %v6930_v35  ;;  %v1489_v35 = vld [vmem:[%s6459_s14 + $0x460] sm:$0xff] }
 0x18f   : > { %v5595_v19 = vpack.c.bf16 %v1490_v18, %v1489_v35  ;;  %v1447_v35 = vld [vmem:[%s6459_s14 + $0x310] sm:$0xff]  ;;  %v1448_v18 = vld [vmem:[%s6459_s14 + $0x318] sm:$0xff] }
 0x191   : > { %1935 = vmatmul.mubr.f32.gmra.mrb[58].mxu0 %v7100_v12  ;;  %5596 = vmatprep.subr.bf16.mxu1 %v5595_v19 }
 0x192   : > { %1939 = vmatprep.mubr.f32.mxu0 %v7104_v53  ;;  %5598 = vmatpush3.bf16.msra.mxu1 %v5595_v19  ;;  %v5527_v19 = vpack.c.bf16 %v1448_v18, %v1447_v35  ;;  %v1462_v35 = vld [vmem:[%s6459_s14 + $0x388] sm:$0xff]  ;;  %v1464_v18 = vld [vmem:[%s6459_s14 + $0x398] sm:$0xff] }
 0x193   : > { %5600 = vmatprep.subr.bf16.mxu1 %v5599_v15 }
 0x195   : > { %1940 = vmatmul.mubr.f32.gmra.mrb[60].mxu0 %v7108_v14 }
 0x196   : > { %1944 = vmatprep.mubr.f32.mxu0 %v7112_v40  ;;  %5602 = vmatpush3.bf16.msra.mxu1 %v5599_v15  ;;  %v1458_v15 = vld [vmem:[%s6459_s14 + $0x368] sm:$0xff] }
 0x197   : > { %5603 = vmatprep.subr.bf16.mxu1 %v8501_v13 }
 0x199   : > { %1945 = vmatmul.mubr.f32.gmra.mrb[62].mxu0 %v7116_v22  ;;  %5252 = vmatmul.mubr.f32.vlgmr.msra.gmra.mrb[0].mxu1 %v6962_v27 }
 0x19a   : > { %2014 = vmatprep.mubr.f32.mxu0 %v6943_v31  ;;  %v1450_v31 = vld [vmem:[%s6459_s14 + $0x328] sm:$0xff]  ;;  %5254 = vmatprep.mubr.f32.mxu1 %v6969_v38 }
 0x19d   : > { %2015 = vmatmul.mubr.f32.vlgmr.msra.gmra.mrb[0].mxu0 %v6706_v28  ;;  %5255 = vmatmul.mubr.f32.gmra.mrb[2].mxu1 %v6976_v23  ;;  %v5530_v28 = vpack.c.bf16 %v1450_v31, %v1449_v24  ;;  %v1468_v24 = vld [vmem:[%s6459_s14 + $0x3b8] sm:$0xff]  ;;  %v1470_v31 = vld [vmem:[%s6459_s14 + $0x3c8] sm:$0xff] }
 0x19e   : > { %5525 = vmatpush1.bf16.msra.mxu0 %v5524_v29  ;;  %2019 = vmatprep.mubr.f32.mxu0 %v6950_v20  ;;  %v1451_v20 = vld [vmem:[%s6459_s14 + $0x330] sm:$0xff]  ;;  %v1460_v29 = vld [vmem:[%s6459_s14 + $0x378] sm:$0xff] }
 0x19f   : > { %5526 = vmatprep.subr.bf16.mxu0 %v8501_v13  ;;  %5257 = vmatprep.mubr.f32.mxu1 %v6983_v10 }
 0x1a1   : > { %2020 = vmatmul.mubr.f32.gmra.mrb[2].mxu0 %v6714_v33  ;;  %5258 = vmatmul.mubr.f32.gmra.mrb[4].mxu1 %v6990_v32  ;;  %v5533_v33 = vpack.c.bf16 %v1452_v8, %v1451_v20  ;;  %v1474_v20 = vld [vmem:[%s6459_s14 + $0x3e8] sm:$0xff] }
 0x1a2   : > { %2024 = vmatprep.mubr.f32.mxu0 %v6732_v44  ;;  %5528 = vmatpush1.bf16.msra.mxu0 %v5527_v19  ;;  %v1453_v44 = vld [vmem:[%s6459_s14 + $0x340] sm:$0xff]  ;;  %v1466_v19 = vld [vmem:[%s6459_s14 + $0x3a8] sm:$0xff] }
 0x1a3   : > { %5529 = vmatprep.subr.bf16.mxu0 %v8501_v13  ;;  %5260 = vmatprep.mubr.f32.mxu1 %v6997_v36  ;;  %v834_v8 = vld [vmem:[#allocation2 + $0x182] sm:$0xff] }
 0x1a5   : > { %2025 = vmatmul.mubr.f32.gmra.mrb[4].mxu0 %v6723_v39  ;;  %5261 = vmatmul.mubr.f32.gmra.mrb[6].mxu1 %v7004_v42  ;;  %v5536_v39 = vpack.c.bf16 %v1454_v25, %v1453_v44  ;;  %v835_v44 = vld [vmem:[#allocation2 + $0x18a] sm:$0xff] }
 0x1a6   : > { %2029 = vmatprep.mubr.f32.mxu0 %v6962_v27  ;;  %5531 = vmatpush1.bf16.msra.mxu0 %v5530_v28  ;;  %v1455_v27 = vld [vmem:[%s6459_s14 + $0x350] sm:$0xff]  ;;  %v1472_v28 = vld [vmem:[%s6459_s14 + $0x3d8] sm:$0xff] }
 0x1a7   : > { %5532 = vmatprep.subr.bf16.mxu0 %v8501_v13  ;;  %5263 = vmatprep.mubr.f32.mxu1 %v7011_v17  ;;  %v935_v25 = vld [vmem:[#allocation2 + $0x49] sm:$0xff] }
 0x1a9   : > { %2030 = vmatmul.mubr.f32.gmra.mrb[6].mxu0 %v6734_v45  ;;  %5264 = vmatmul.mubr.f32.gmra.mrb[8].mxu1 %v7018_v41  ;;  %v5539_v45 = vpack.c.bf16 %v1456_v9, %v1455_v27  ;;  %v3561_v27 = vld [vmem:[%s6464_s17 + $0x30] sm:$0xff]  ;;  %v3562_v9 = vld [vmem:[%s6464_s17 + $0x38] sm:$0xff] }
 0x1aa   : > { %2034 = vmatprep.mubr.f32.mxu0 %v6969_v38  ;;  %5534 = vmatpush1.bf16.msra.mxu0 %v5533_v33  ;;  %v1457_v38 = vld [vmem:[%s6459_s14 + $0x360] sm:$0xff]  ;;  %v1476_v33 = vld [vmem:[%s6459_s14 + $0x3f8] sm:$0xff] }
 0x1ab   : > { %5535 = vmatprep.subr.bf16.mxu0 %v8501_v13  ;;  %5266 = vmatprep.mubr.f32.mxu1 %v7025_v58 }
 0x1ad   : > { %2035 = vmatmul.mubr.f32.gmra.mrb[8].mxu0 %v6744_v50  ;;  %5267 = vmatmul.mubr.f32.gmra.mrb[10].mxu1 %v7032_v63  ;;  %v5542_v50 = vpack.c.bf16 %v1458_v15, %v1457_v38  ;;  %v871_v38 = vld [vmem:[#allocation2 + $0x48] sm:$0xff] }
 0x1ae   : > { %2039 = vmatprep.mubr.f32.mxu0 %v6976_v23  ;;  %5537 = vmatpush1.bf16.msra.mxu0 %v5536_v39  ;;  %v1459_v23 = vld [vmem:[%s6459_s14 + $0x370] sm:$0xff]  ;;  %v3684_v15 = vld [vmem:[%s6464_s17 + $0x408] sm:$0xff] }
 0x1af   : > { %5538 = vmatprep.subr.bf16.mxu0 %v8501_v13  ;;  %5269 = vmatprep.mubr.f32.mxu1 %v7037_v46 }
 0x1b1   : > { %2040 = vmatmul.mubr.f32.gmra.mrb[10].mxu0 %v6753_v55  ;;  %5270 = vmatmul.mubr.f32.gmra.mrb[12].mxu1 %v7042_v49  ;;  %v5545_v55 = vpack.c.bf16 %v1460_v29, %v1459_v23  ;;  %v5613_v29 = vpack.c.bf16 %v3562_v9, %v3561_v27  ;;  %v947_v27 = vld [vmem:[#allocation2 + $0xd9] sm:$0xff] }
 0x1b2   : > { %2044 = vmatprep.mubr.f32.mxu0 %v6983_v10  ;;  %5540 = vmatpush1.bf16.msra.mxu0 %v5539_v45  ;;  %v1461_v10 = vld [vmem:[%s6459_s14 + $0x380] sm:$0xff]  ;;  %v883_v9 = vld [vmem:[#allocation2 + $0xd8] sm:$0xff] }
 0x1b3   : > { %5541 = vmatprep.subr.bf16.mxu0 %v8501_v13  ;;  %5272 = vmatprep.mubr.f32.mxu1 %v7046_v7  ;;  %v3683_v45 = vld [vmem:[%s6464_s17 + $0x400] sm:$0xff] }
 0x1b4   : > { %v7274_v23 = vpack.c.bf16 %v3684_v15, %v3683_v45  ;;  %v948_v45 = vld [vmem:[#allocation2 + $0xe1] sm:$0xff]  ;;  %v949_v15 = vld [vmem:[#allocation2 + $0xf1] sm:$0xff] }
 0x1b5   : > { %2045 = vmatmul.mubr.f32.gmra.mrb[12].mxu0 %v6762_v60  ;;  %5273 = vmatmul.mubr.f32.gmra.mrb[14].mxu1 %v7050_v52  ;;  %v5548_v60 = vpack.c.bf16 %v1462_v35, %v1461_v10  ;;  %v3564_v10 = vld [vmem:[%s6464_s17 + $0x48] sm:$0xff]  ;;  %v872_v35 = vld [vmem:[#allocation2 + $0x50] sm:$0xff] }
 0x1b6   : > { %2049 = vmatprep.mubr.f32.mxu0 %v6990_v32  ;;  %5543 = vmatpush1.bf16.msra.mxu0 %v5542_v50  ;;  %v1463_v32 = vld [vmem:[%s6459_s14 + $0x390] sm:$0xff] }
 0x1b7   : > { %5544 = vmatprep.subr.bf16.mxu0 %v8501_v13  ;;  %5275 = vmatprep.mubr.f32.mxu1 %v7054_v56  ;;  %v936_v50 = vld [vmem:[#allocation2 + $0x51] sm:$0xff] }
 0x1b9   : > { %2050 = vmatmul.mubr.f32.gmra.mrb[14].mxu0 %v6771_v1  ;;  %5276 = vmatmul.mubr.f32.gmra.mrb[16].mxu1 %v7058_v59  ;;  %v5551_v1 = vpack.c.bf16 %v1464_v18, %v1463_v32  ;;  %v3565_v18 = vld [vmem:[%s6464_s17 + $0x50] sm:$0xff] }
 0x1ba   : > { %2054 = vmatprep.mubr.f32.mxu0 %v6997_v36  ;;  %5546 = vmatpush1.bf16.msra.mxu0 %v5545_v55  ;;  %v1465_v36 = vld [vmem:[%s6459_s14 + $0x3a0] sm:$0xff] }
 0x1bb   : > { %5547 = vmatprep.subr.bf16.mxu0 %v8501_v13  ;;  %5278 = vmatprep.mubr.f32.mxu1 %v7062_v62  ;;  %v3563_v55 = vld [vmem:[%s6464_s17 + $0x40] sm:$0xff] }
 0x1bc   : > { %v5616_v32 = vpack.c.bf16 %v3564_v10, %v3563_v55  ;;  %v886_v55 = vld [vmem:[#allocation2 + $0xf8] sm:$0xff]  ;;  %v951_v10 = vld [vmem:[#allocation2 + $0x109] sm:$0xff] }
 0x1bd   : > { %2055 = vmatmul.mubr.f32.gmra.mrb[16].mxu0 %v6780_v6  ;;  %5279 = vmatmul.mubr.f32.gmra.mrb[18].mxu1 %v7066_v2  ;;  %v5554_v6 = vpack.c.bf16 %v1466_v19, %v1465_v36  ;;  %v873_v36 = vld [vmem:[#allocation2 + $0x60] sm:$0xff]  ;;  %v938_v19 = vld [vmem:[#allocation2 + $0x69] sm:$0xff] }
 0x1be   : > { %2059 = vmatprep.mubr.f32.mxu0 %v7004_v42  ;;  %5549 = vmatpush1.bf16.msra.mxu0 %v5548_v60  ;;  %v1467_v42 = vld [vmem:[%s6459_s14 + $0x3b0] sm:$0xff]  ;;  %v937_v60 = vld [vmem:[#allocation2 + $0x61] sm:$0xff] }
 0x1bf   : > { %5550 = vmatprep.subr.bf16.mxu0 %v8501_v13  ;;  %5281 = vmatprep.mubr.f32.mxu1 %v7070_v5 }
 0x1c1   : > { %2060 = vmatmul.mubr.f32.gmra.mrb[18].mxu0 %v6789_v11  ;;  %5282 = vmatmul.mubr.f32.gmra.mrb[20].mxu1 %v7076_v48  ;;  %v5557_v11 = vpack.c.bf16 %v1468_v24, %v1467_v42  ;;  %v3567_v42 = vld [vmem:[%s6464_s17 + $0x60] sm:$0xff]  ;;  %v3568_v24 = vld [vmem:[%s6464_s17 + $0x68] sm:$0xff] }
 0x1c2   : > { %2064 = vmatprep.mubr.f32.mxu0 %v7011_v17  ;;  %5552 = vmatpush1.bf16.msra.mxu0 %v5551_v1  ;;  %v1469_v17 = vld [vmem:[%s6459_s14 + $0x3c0] sm:$0xff]  ;;  %v3566_v1 = vld [vmem:[%s6464_s17 + $0x58] sm:$0xff] }
 0x1c3   : > { %5553 = vmatprep.subr.bf16.mxu0 %v8501_v13  ;;  %5284 = vmatprep.mubr.f32.mxu1 %v7082_v30 }
 0x1c5   : > { %2065 = vmatmul.mubr.f32.gmra.mrb[20].mxu0 %v6798_v16  ;;  %5285 = vmatmul.mubr.f32.gmra.mrb[22].mxu1 %v7088_v37  ;;  %v5560_v16 = vpack.c.bf16 %v1470_v31, %v1469_v17  ;;  %v939_v17 = vld [vmem:[#allocation2 + $0x79] sm:$0xff]  ;;  %v5622_v31 = vpack.c.bf16 %v3568_v24, %v3567_v42  ;;  %v954_v42 = vld [vmem:[#allocation2 + $0x129] sm:$0xff] }
 0x1c6   : > { %2069 = vmatprep.mubr.f32.mxu0 %v7018_v41  ;;  %5555 = vmatpush1.bf16.msra.mxu0 %v5554_v6  ;;  %v1471_v41 = vld [vmem:[%s6459_s14 + $0x3d0] sm:$0xff]  ;;  %v5619_v6 = vpack.c.bf16 %v3566_v1, %v3565_v18  ;;  %v953_v18 = vld [vmem:[#allocation2 + $0x121] sm:$0xff] }
 0x1c7   : > { %5556 = vmatprep.subr.bf16.mxu0 %v8501_v13  ;;  %5287 = vmatprep.mubr.f32.mxu1 %v7094_v4  ;;  %v3583_v1 = vld [vmem:[%s6464_s17 + $0xe0] sm:$0xff]  ;;  %v3585_v24 = vld [vmem:[%s6464_s17 + $0xf0] sm:$0xff] }
 0x1c9   : > { %2070 = vmatmul.mubr.f32.gmra.mrb[22].mxu0 %v6807_v21  ;;  %5288 = vmatmul.mubr.f32.gmra.mrb[24].mxu1 %v7100_v12  ;;  %v5563_v21 = vpack.c.bf16 %v1472_v28, %v1471_v41  ;;  %v3570_v41 = vld [vmem:[%s6464_s17 + $0x78] sm:$0xff] }
 0x1ca   : > { %2074 = vmatprep.mubr.f32.mxu0 %v7025_v58  ;;  %5558 = vmatpush1.bf16.msra.mxu0 %v5557_v11  ;;  %v1473_v58 = vld [vmem:[%s6459_s14 + $0x3e0] sm:$0xff]  ;;  %v874_v11 = vld [vmem:[#allocation2 + $0x68] sm:$0xff]  ;;  %v875_v28 = vld [vmem:[#allocation2 + $0x78] sm:$0xff] }
 0x1cb   : > { %5559 = vmatprep.subr.bf16.mxu0 %v8501_v13  ;;  %5290 = vmatprep.mubr.f32.mxu1 %v7108_v14 }
 0x1cd   : > { %2075 = vmatmul.mubr.f32.gmra.mrb[24].mxu0 %v6816_v26  ;;  %5291 = vmatmul.mubr.f32.gmra.mrb[26].mxu1 %v7116_v22  ;;  %v5566_v26 = vpack.c.bf16 %v1474_v20, %v1473_v58  ;;  %v3571_v20 = vld [vmem:[%s6464_s17 + $0x80] sm:$0xff] }
 0x1ce   : > { %2079 = vmatprep.mubr.f32.mxu0 %v7032_v63  ;;  %5561 = vmatpush1.bf16.msra.mxu0 %v5560_v16  ;;  %v1475_v63 = vld [vmem:[%s6459_s14 + $0x3f0] sm:$0xff] }
 0x1cf   : > { %5562 = vmatprep.subr.bf16.mxu0 %v8501_v13  ;;  %5293 = vmatprep.mubr.f32.mxu1 %v834_v8  ;;  %v3569_v16 = vld [vmem:[%s6464_s17 + $0x70] sm:$0xff] }
 0x1d0   : > { %v5625_v58 = vpack.c.bf16 %v3570_v41, %v3569_v16  ;;  %v890_v41 = vld [vmem:[#allocation2 + $0x128] sm:$0xff] }
 0x1d1   : > { %2080 = vmatmul.mubr.f32.gmra.mrb[26].mxu0 %v6825_v34  ;;  %5294 = vmatmul.mubr.f32.gmra.mrb[28].mxu1 %v835_v44  ;;  %v5569_v34 = vpack.c.bf16 %v1476_v33, %v1475_v63  ;;  %v941_v63 = vld [vmem:[#allocation2 + $0x91] sm:$0xff] }
 0x1d2   : > { %2084 = vmatprep.mubr.f32.mxu0 %v7037_v46  ;;  %5564 = vmatpush1.bf16.msra.mxu0 %v5563_v21  ;;  %v7256_v46 = vld [vmem:[#allocation2 + $0x181] sm:$0xff] }
 0x1d3   : > { %5565 = vmatprep.subr.bf16.mxu0 %v8501_v13  ;;  %v940_v21 = vld [vmem:[#allocation2 + $0x81] sm:$0xff] }
 0x1d5   : > { %2085 = vmatmul.mubr.f32.gmra.mrb[28].mxu0 %v6834_v43  ;;  %v8502_v43 = vld [vmem:[#allocation6_spill] sm:$0xff] }
 0x1d6   : > { %2089 = vmatprep.mubr.f32.mxu0 %v7042_v49  ;;  %5567 = vmatpush1.bf16.msra.mxu0 %v5566_v26  ;;  %v1027_v49 = vld [vmem:[#allocation2 + $0x19a] sm:$0xff]  ;;  %8510 = vst [vmem:[#allocation6_spill] sm:$0xff] %v7274_v23  ;;  %v3572_v26 = vld [vmem:[%s6464_s17 + $0x88] sm:$0xff] }
 0x1d7   : > { %5568 = vmatprep.subr.bf16.mxu0 %v8501_v13  ;;  %5296 = vmatprep.mubr.f32.mxu1 %v1027_v49  ;;  %v5628_v33 = vpack.c.bf16 %v3572_v26, %v3571_v20  ;;  %v3577_v49 = vld [vmem:[%s6464_s17 + $0xb0] sm:$0xff] }
 0x1d8   : > { %v2754_v20 = vld [vmem:[#allocation3 + $0x1] sm:$0xff] }
 0x1d9   : > { %2090 = vmatmul.mubr.f32.gmra.mrb[30].mxu0 %v6841_v47  ;;  %v8503_v47 = vld [vmem:[#allocation7_spill] sm:$0xff] }
 0x1da   : > { %2094 = vmatprep.mubr.f32.mxu0 %v7046_v7  ;;  %5570 = vmatpush1.bf16.msra.mxu0 %v5569_v34  ;;  %v1028_v7 = vld [vmem:[#allocation2 + $0x1a2] sm:$0xff]  ;;  %v3574_v34 = vld [vmem:[%s6464_s17 + $0x98] sm:$0xff] }
 0x1db   : > { %5297 = vmatmul.mubr.f32.gmra.mrb[30].mxu1 %v1028_v7  ;;  %5796 = vmatprep.subr.bf16.mxu0 %v7274_v23  ;;  %v3578_v7 = vld [vmem:[%s6464_s17 + $0xb8] sm:$0xff] }
 0x1dc   : > { %3802 = vmatprep.mubr.f32.mxu1 %v2754_v20  ;;  %v3595_v20 = vld [vmem:[%s6464_s17 + $0x140] sm:$0xff] }
 0x1dd   : > { %2095 = vmatmul.mubr.f32.gmra.mrb[32].mxu0 %v6848_v51  ;;  %v8504_v51 = vld [vmem:[#allocation8_spill] sm:$0xff] }
 0x1de   : > { %2099 = vmatprep.mubr.f32.mxu0 %v7050_v52  ;;  %v7259_v52 = vld [vmem:[#allocation2 + $0x189] sm:$0xff] }
 0x1e1   : > { %2100 = vmatmul.mubr.f32.gmra.mrb[34].mxu0 %v6854_v54  ;;  %v8505_v54 = vld [vmem:[#allocation9_spill] sm:$0xff] }
 0x1e2   : > { %2104 = vmatprep.mubr.f32.mxu0 %v7054_v56  ;;  %v933_v56 = vld [vmem:[#allocation2 + $0x31] sm:$0xff] }
 0x1e5   : > { %2105 = vmatmul.mubr.f32.gmra.mrb[36].mxu0 %v6860_v57  ;;  %v8506_v57 = vld [vmem:[#allocation10_spill] sm:$0xff] }
 0x1e6   : > { %2109 = vmatprep.mubr.f32.mxu0 %v7058_v59  ;;  %v3555_v59 = vld [vmem:[%s6464_s17] sm:$0xff] }
 0x1e9   : > { %2110 = vmatmul.mubr.f32.gmra.mrb[38].mxu0 %v6866_v61  ;;  %v8507_v61 = vld [vmem:[#allocation11_spill] sm:$0xff] }
 0x1ea   : > { %2114 = vmatprep.mubr.f32.mxu0 %v7062_v62  ;;  %v3556_v62 = vld [vmem:[%s6464_s17 + $0x8] sm:$0xff] }
 0x1ed   : > { %2115 = vmatmul.mubr.f32.gmra.mrb[40].mxu0 %v6872_v0  ;;  %v8508_v0 = vld [vmem:[#allocation12_spill] sm:$0xff] }
 0x1ee   : > { %2119 = vmatprep.mubr.f32.mxu0 %v7066_v2  ;;  %v3557_v2 = vld [vmem:[%s6464_s17 + $0x10] sm:$0xff] }
 0x1f1   : > { %2120 = vmatmul.mubr.f32.gmra.mrb[42].mxu0 %v6878_v3  ;;  %v8509_v3 = vld [vmem:[#allocation13_spill] sm:$0xff] }
 0x1f2   : > { %2124 = vmatprep.mubr.f32.mxu0 %v7070_v5  ;;  %v869_v5 = vld [vmem:[#allocation2 + $0x30] sm:$0xff] }
 0x1f5   : > { %2125 = vmatmul.mubr.f32.gmra.mrb[44].mxu0 %v8502_v43  ;;  %v877_v43 = vld [vmem:[#allocation2 + $0x90] sm:$0xff] }
 0x1f6   : > { %2129 = vmatprep.mubr.f32.mxu0 %v7076_v48  ;;  %v5604_v48 = vpack.c.bf16 %v3556_v62, %v3555_v59  ;;  %v944_v59 = vld [vmem:[#allocation2 + $0xb1] sm:$0xff]  ;;  %v5637_v62 = vpack.c.bf16 %v3578_v7, %v3577_v49 }
 0x1f8   : > { %5605 = vmatpush1.bf16.msra.mxu1 %v5604_v48  ;;  %v880_v48 = vld [vmem:[#allocation2 + $0xb0] sm:$0xff] }
 0x1f9   : > { %2130 = vmatmul.mubr.f32.gmra.mrb[46].mxu0 %v8503_v47  ;;  %5606 = vmatprep.subr.bf16.mxu1 %v8501_v13  ;;  %v942_v47 = vld [vmem:[#allocation2 + $0x99] sm:$0xff] }
 0x1fa   : > { %2134 = vmatprep.mubr.f32.mxu0 %v7082_v30  ;;  %v3558_v30 = vld [vmem:[%s6464_s17 + $0x18] sm:$0xff] }
 0x1fd   : > { %2135 = vmatmul.mubr.f32.gmra.mrb[48].mxu0 %v8504_v51 }
 0x1fe   : > { %2139 = vmatprep.mubr.f32.mxu0 %v7088_v37  ;;  %v934_v37 = vld [vmem:[#allocation2 + $0x39] sm:$0xff] }
 0x201   : > { %2140 = vmatmul.mubr.f32.gmra.mrb[50].mxu0 %v8505_v54  ;;  %v3575_v54 = vld [vmem:[%s6464_s17 + $0xa0] sm:$0xff] }
 0x202   : > { %2144 = vmatprep.mubr.f32.mxu0 %v7094_v4  ;;  %v5607_v4 = vpack.c.bf16 %v3558_v30, %v3557_v2  ;;  %v3579_v2 = vld [vmem:[%s6464_s17 + $0xc0] sm:$0xff] }
 0x203   : > { %v945_v30 = vld [vmem:[#allocation2 + $0xc1] sm:$0xff] }
 0x204   : > { %5608 = vmatpush1.bf16.msra.mxu1 %v5607_v4  ;;  %v3581_v4 = vld [vmem:[%s6464_s17 + $0xd0] sm:$0xff] }
 0x205   : > { %2145 = vmatmul.mubr.f32.gmra.mrb[52].mxu0 %v8506_v57  ;;  %5609 = vmatprep.subr.bf16.mxu1 %v8501_v13  ;;  %v3576_v57 = vld [vmem:[%s6464_s17 + $0xa8] sm:$0xff] }
 0x206   : > { %2149 = vmatprep.mubr.f32.mxu0 %v7100_v12  ;;  %v3559_v12 = vld [vmem:[%s6464_s17 + $0x20] sm:$0xff] }
 0x209   : > { %2150 = vmatmul.mubr.f32.gmra.mrb[54].mxu0 %v8507_v61  ;;  %v878_v61 = vld [vmem:[#allocation2 + $0x98] sm:$0xff] }
 0x20a   : > { %2154 = vmatprep.mubr.f32.mxu0 %v7108_v14  ;;  %v3560_v14 = vld [vmem:[%s6464_s17 + $0x28] sm:$0xff] }
 0x20b   : > { %v5610_v39 = vpack.c.bf16 %v3560_v14, %v3559_v12  ;;  %v3582_v12 = vld [vmem:[%s6464_s17 + $0xd8] sm:$0xff]  ;;  %v881_v14 = vld [vmem:[#allocation2 + $0xc0] sm:$0xff] }
 0x20d   : > { %2155 = vmatmul.mubr.f32.gmra.mrb[56].mxu0 %v8508_v0  ;;  %5611 = vmatpush1.bf16.msra.mxu1 %v5610_v39  ;;  %v943_v0 = vld [vmem:[#allocation2 + $0xa9] sm:$0xff] }
 0x20e   : > { %2159 = vmatprep.mubr.f32.mxu0 %v7116_v22  ;;  %v870_v22 = vld [vmem:[#allocation2 + $0x38] sm:$0xff]  ;;  %5612 = vmatprep.subr.bf16.mxu1 %v8501_v13  ;;  %v882_v39 = vld [vmem:[#allocation2 + $0xc8] sm:$0xff] }
 0x211   : > { %2160 = vmatmul.mubr.f32.gmra.mrb[58].mxu0 %v8509_v3  ;;  %5614 = vmatpush1.bf16.msra.mxu1 %v5613_v29  ;;  %v5634_v3 = vpack.c.bf16 %v3576_v57, %v3575_v54  ;;  %v950_v29 = vld [vmem:[#allocation2 + $0xf9] sm:$0xff] }
 0x212   : > { %2164 = vmatprep.mubr.f32.mxu0 %v834_v8  ;;  %5615 = vmatprep.subr.bf16.mxu1 %v8501_v13  ;;  %v876_v8 = vld [vmem:[#allocation2 + $0x80] sm:$0xff]  ;;  %v3690_v54 = vld [vmem:[%s6464_s17 + $0x438] sm:$0xff] }
 0x213   : > { %v2691_v57 = vld [vmem:[#allocation3 + $0x8] sm:$0xff] }
 0x215   : > { %2165 = vmatmul.mubr.f32.gmra.mrb[60].mxu0 %v7256_v46  ;;  %5617 = vmatpush1.bf16.msra.mxu1 %v5616_v32  ;;  %v888_v32 = vld [vmem:[#allocation2 + $0x110] sm:$0xff] }
 0x216   : > { %2169 = vmatprep.mubr.f32.mxu0 %v835_v44  ;;  %5618 = vmatprep.subr.bf16.mxu1 %v8501_v13  ;;  %v3573_v44 = vld [vmem:[%s6464_s17 + $0x90] sm:$0xff] }
 0x217   : > { %v5631_v51 = vpack.c.bf16 %v3574_v34, %v3573_v44  ;;  %v891_v44 = vld [vmem:[#allocation2 + $0x138] sm:$0xff] }
 0x219   : > { %2170 = vmatmul.mubr.f32.gmra.mrb[62].mxu0 %v7259_v52  ;;  %5620 = vmatpush1.bf16.msra.mxu1 %v5619_v6  ;;  %v889_v6 = vld [vmem:[#allocation2 + $0x120] sm:$0xff] }
 0x21a   : > { %2239 = vmatprep.mubr.f32.mxu0 %v933_v56  ;;  %5621 = vmatprep.subr.bf16.mxu1 %v8501_v13  ;;  %v879_v56 = vld [vmem:[#allocation2 + $0xa8] sm:$0xff] }
 0x21d   : > { %2240 = vmatmul.mubr.f32.vlgmr.msra.gmra.mrb[0].mxu0 %v869_v5  ;;  %5623 = vmatpush1.bf16.msra.mxu1 %v5622_v31  ;;  %v3580_v5 = vld [vmem:[%s6464_s17 + $0xc8] sm:$0xff]  ;;  %v3686_v31 = vld [vmem:[%s6464_s17 + $0x418] sm:$0xff] }
 0x21e   : > { %2244 = vmatprep.mubr.f32.mxu0 %v934_v37  ;;  %5798 = vmatpush3.bf16.msra.mxu0 %v7274_v23  ;;  %v5640_v37 = vpack.c.bf16 %v3580_v5, %v3579_v2  ;;  %v958_v5 = vld [vmem:[#allocation2 + $0x159] sm:$0xff] }
 0x21f   : > { %5624 = vmatprep.subr.bf16.mxu1 %v8501_v13 }
 0x221   : > { %2245 = vmatmul.mubr.f32.gmra.mrb[2].mxu0 %v870_v22  ;;  %5626 = vmatpush1.bf16.msra.mxu1 %v5625_v58  ;;  %v946_v22 = vld [vmem:[#allocation2 + $0xc9] sm:$0xff] }
 0x222   : > { %2249 = vmatprep.mubr.f32.mxu0 %v935_v25  ;;  %5627 = vmatprep.subr.bf16.mxu1 %v8501_v13  ;;  %v5643_v25 = vpack.c.bf16 %v3582_v12, %v3581_v4  ;;  %v3693_v4 = vld [vmem:[%s6464_s17 + $0x450] sm:$0xff]  ;;  %v3694_v12 = vld [vmem:[%s6464_s17 + $0x458] sm:$0xff] }
 0x225   : > { %2250 = vmatmul.mubr.f32.gmra.mrb[4].mxu0 %v871_v38  ;;  %5629 = vmatpush1.bf16.msra.mxu1 %v5628_v33  ;;  %v884_v38 = vld [vmem:[#allocation2 + $0xe0] sm:$0xff]  ;;  %v2690_v33 = vld [vmem:[#allocation3] sm:$0xff] }
 0x226   : > { %2254 = vmatprep.mubr.f32.mxu0 %v936_v50  ;;  %5630 = vmatprep.subr.bf16.mxu1 %v8501_v13  ;;  %v885_v50 = vld [vmem:[#allocation2 + $0xf0] sm:$0xff] }
 0x229   : > { %2255 = vmatmul.mubr.f32.gmra.mrb[6].mxu0 %v872_v35  ;;  %5632 = vmatpush1.bf16.msra.mxu1 %v5631_v51  ;;  %v887_v35 = vld [vmem:[#allocation2 + $0x108] sm:$0xff]  ;;  %v3689_v51 = vld [vmem:[%s6464_s17 + $0x430] sm:$0xff] }
 0x22a   : > { %2259 = vmatprep.mubr.f32.mxu0 %v937_v60  ;;  %5633 = vmatprep.subr.bf16.mxu1 %v8501_v13  ;;  %v952_v60 = vld [vmem:[#allocation2 + $0x111] sm:$0xff] }
 0x22d   : > { %2260 = vmatmul.mubr.f32.gmra.mrb[8].mxu0 %v873_v36  ;;  %5635 = vmatpush1.bf16.msra.mxu1 %v5634_v3  ;;  %v3584_v36 = vld [vmem:[%s6464_s17 + $0xe8] sm:$0xff]  ;;  %v957_v3 = vld [vmem:[#allocation2 + $0x151] sm:$0xff] }
 0x22e   : > { %2264 = vmatprep.mubr.f32.mxu0 %v938_v19  ;;  %5636 = vmatprep.subr.bf16.mxu1 %v8501_v13  ;;  %v5646_v19 = vpack.c.bf16 %v3584_v36, %v3583_v1 }
 0x231   : > { %2265 = vmatmul.mubr.f32.gmra.mrb[10].mxu0 %v874_v11  ;;  %5638 = vmatpush1.bf16.msra.mxu1 %v5637_v62  ;;  %v3586_v11 = vld [vmem:[%s6464_s17 + $0xf8] sm:$0xff]  ;;  %v893_v62 = vld [vmem:[#allocation2 + $0x150] sm:$0xff] }
 0x232   : > { %2269 = vmatprep.mubr.f32.mxu0 %v939_v17  ;;  %5639 = vmatprep.subr.bf16.mxu1 %v8501_v13  ;;  %v3685_v17 = vld [vmem:[%s6464_s17 + $0x410] sm:$0xff]  ;;  %v5649_v16 = vpack.c.bf16 %v3586_v11, %v3585_v24  ;;  %v963_v24 = vld [vmem:[#allocation2 + $0x199] sm:$0xff] }
 0x235   : > { %2270 = vmatmul.mubr.f32.gmra.mrb[12].mxu0 %v875_v28  ;;  %5641 = vmatpush1.bf16.msra.mxu1 %v5640_v37  ;;  %v7317_v28 = vpack.c.bf16 %v3686_v31, %v3685_v17  ;;  %v899_v17 = vld [vmem:[#allocation2 + $0x198] sm:$0xff]  ;;  %v964_v31 = vld [vmem:[#allocation2 + $0x1a1] sm:$0xff] }
 0x236   : > { %2274 = vmatprep.mubr.f32.mxu0 %v940_v21  ;;  %5642 = vmatprep.subr.bf16.mxu1 %v8501_v13  ;;  %v955_v21 = vld [vmem:[#allocation2 + $0x139] sm:$0xff] }
 0x237   : > { %8511 = vst [vmem:[#allocation7_spill] sm:$0xff] %v7317_v28  ;;  %5800 = vmatprep.subr.bf16.mxu0 %v7317_v28 }
 0x238   : > { %5802 = vmatpush3.bf16.msra.mxu0 %v7317_v28 }
 0x239   : > { %2275 = vmatmul.mubr.f32.gmra.mrb[14].mxu0 %v876_v8  ;;  %5644 = vmatpush1.bf16.msra.mxu1 %v5643_v25  ;;  %v3687_v8 = vld [vmem:[%s6464_s17 + $0x420] sm:$0xff]  ;;  %v959_v25 = vld [vmem:[#allocation2 + $0x169] sm:$0xff] }
 0x23a   : > { %2279 = vmatprep.mubr.f32.mxu0 %v941_v63  ;;  %5645 = vmatprep.subr.bf16.mxu1 %v8501_v13  ;;  %v3688_v63 = vld [vmem:[%s6464_s17 + $0x428] sm:$0xff] }
 0x23b   : > { %v7328_v34 = vpack.c.bf16 %v3688_v63, %v3687_v8  ;;  %v3596_v8 = vld [vmem:[%s6464_s17 + $0x148] sm:$0xff] }
 0x23c   : > { %v5664_v63 = vpack.c.bf16 %v3596_v8, %v3595_v20 }
 0x23d   : > { %2280 = vmatmul.mubr.f32.gmra.mrb[16].mxu0 %v877_v43  ;;  %5647 = vmatpush1.bf16.msra.mxu1 %v5646_v19  ;;  %8512 = vst [vmem:[#allocation8_spill] sm:$0xff] %v7328_v34  ;;  %v956_v43 = vld [vmem:[#allocation2 + $0x141] sm:$0xff] }
 0x23e   : > { %2284 = vmatprep.mubr.f32.mxu0 %v942_v47  ;;  %5648 = vmatprep.subr.bf16.mxu1 %v8501_v13  ;;  %v2755_v47 = vld [vmem:[#allocation3 + $0x9] sm:$0xff] }
 0x23f   : > { %5804 = vmatprep.subr.bf16.mxu0 %v7328_v34  ;;  %v3591_v19 = vld [vmem:[%s6464_s17 + $0x120] sm:$0xff] }
 0x240   : > { %5806 = vmatpush3.bf16.msra.mxu0 %v7328_v34 }
 0x241   : > { %2285 = vmatmul.mubr.f32.gmra.mrb[18].mxu0 %v878_v61  ;;  %5650 = vmatpush1.bf16.msra.mxu1 %v5649_v16  ;;  %v892_v61 = vld [vmem:[#allocation2 + $0x140] sm:$0xff]  ;;  %v3593_v16 = vld [vmem:[%s6464_s17 + $0x130] sm:$0xff] }
 0x242   : > { %2289 = vmatprep.mubr.f32.mxu0 %v943_v0  ;;  %5651 = vmatprep.subr.bf16.mxu1 %v8501_v13  ;;  %v7334_v0 = vpack.c.bf16 %v3690_v54, %v3689_v51 }
 0x244   : > { %3803 = vmatmul.mubr.f32.vlgmr.msra.gmra.mrb[32].mxu1 %v2690_v33  ;;  %8513 = vst [vmem:[#allocation9_spill] sm:$0xff] %v7334_v0  ;;  %5808 = vmatprep.subr.bf16.mxu0 %v7334_v0 }
 0x245   : > { %2290 = vmatmul.mubr.f32.gmra.mrb[20].mxu0 %v879_v56  ;;  %3807 = vmatprep.mubr.f32.mxu1 %v2755_v47  ;;  %v3691_v56 = vld [vmem:[%s6464_s17 + $0x440] sm:$0xff]  ;;  %v3598_v47 = vld [vmem:[%s6464_s17 + $0x158] sm:$0xff] }
 0x246   : > { %2294 = vmatprep.mubr.f32.mxu0 %v944_v59  ;;  %v3692_v59 = vld [vmem:[%s6464_s17 + $0x448] sm:$0xff]  ;;  %5810 = vmatpush3.bf16.msra.mxu0 %v7334_v0 }
 0x247   : > { %v7344_v2 = vpack.c.bf16 %v3692_v59, %v3691_v56 }
 0x248   : > { %3808 = vmatmul.mubr.f32.gmra.mrb[34].mxu1 %v2691_v57 }
 0x249   : > { %2295 = vmatmul.mubr.f32.gmra.mrb[22].mxu0 %v880_v48  ;;  %8514 = vst [vmem:[#allocation10_spill] sm:$0xff] %v7344_v2  ;;  %v3587_v48 = vld [vmem:[%s6464_s17 + $0x100] sm:$0xff]  ;;  %5812 = vmatprep.subr.bf16.mxu0 %v7344_v2 }
 0x24a   : > { %2299 = vmatprep.mubr.f32.mxu0 %v945_v30  ;;  %v3588_v30 = vld [vmem:[%s6464_s17 + $0x108] sm:$0xff]  ;;  %5814 = vmatpush3.bf16.msra.mxu0 %v7344_v2 }
 0x24b   : > { %v5652_v37 = vpack.c.bf16 %v3588_v30, %v3587_v48  ;;  %v3602_v48 = vld [vmem:[%s6464_s17 + $0x178] sm:$0xff] }
 0x24d   : > { %2300 = vmatmul.mubr.f32.gmra.mrb[24].mxu0 %v881_v14  ;;  %v894_v14 = vld [vmem:[#allocation2 + $0x158] sm:$0xff]  ;;  %5653 = vmatpush1.bf16.msra.mxu1 %v5652_v37 }
 0x24e   : > { %2304 = vmatprep.mubr.f32.mxu0 %v946_v22  ;;  %v7351_v22 = vpack.c.bf16 %v3694_v12, %v3693_v4  ;;  %5654 = vmatprep.subr.bf16.mxu1 %v8501_v13  ;;  %v3603_v12 = vld [vmem:[%s6464_s17 + $0x180] sm:$0xff] }
 0x250   : > { %8515 = vst [vmem:[#allocation11_spill] sm:$0xff] %v7351_v22  ;;  %5816 = vmatprep.subr.bf16.mxu0 %v7351_v22 }
 0x251   : > { %2305 = vmatmul.mubr.f32.gmra.mrb[26].mxu0 %v882_v39 }
 0x252   : > { %2309 = vmatprep.mubr.f32.mxu0 %v947_v27  ;;  %5818 = vmatpush3.bf16.msra.mxu0 %v7351_v22 }
 0x255   : > { %2310 = vmatmul.mubr.f32.gmra.mrb[28].mxu0 %v883_v9  ;;  %v3695_v9 = vld [vmem:[%s6464_s17 + $0x460] sm:$0xff] }
 0x256   : > { %2314 = vmatprep.mubr.f32.mxu0 %v948_v45  ;;  %v3696_v45 = vld [vmem:[%s6464_s17 + $0x468] sm:$0xff] }
 0x259   : > { %2315 = vmatmul.mubr.f32.gmra.mrb[30].mxu0 %v884_v38  ;;  %v895_v38 = vld [vmem:[#allocation2 + $0x168] sm:$0xff] }
 0x25a   : > { %2319 = vmatprep.mubr.f32.mxu0 %v949_v15  ;;  %v7362_v15 = vpack.c.bf16 %v3696_v45, %v3695_v9 }
 0x25c   : > { %8516 = vst [vmem:[#allocation12_spill] sm:$0xff] %v7362_v15  ;;  %5820 = vmatprep.subr.bf16.mxu0 %v7362_v15 }
 0x25d   : > { %2320 = vmatmul.mubr.f32.gmra.mrb[32].mxu0 %v885_v50  ;;  %v960_v50 = vld [vmem:[#allocation2 + $0x171] sm:$0xff] }
 0x25e   : > { %2324 = vmatprep.mubr.f32.mxu0 %v950_v29  ;;  %v3589_v29 = vld [vmem:[%s6464_s17 + $0x110] sm:$0xff]  ;;  %5822 = vmatpush3.bf16.msra.mxu0 %v7362_v15 }
 0x261   : > { %2325 = vmatmul.mubr.f32.gmra.mrb[34].mxu0 %v886_v55  ;;  %v3590_v55 = vld [vmem:[%s6464_s17 + $0x118] sm:$0xff] }
 0x262   : > { %2329 = vmatprep.mubr.f32.mxu0 %v951_v10  ;;  %v5655_v10 = vpack.c.bf16 %v3590_v55, %v3589_v29 }
 0x264   : > { %5656 = vmatpush1.bf16.msra.mxu1 %v5655_v10 }
 0x265   : > { %2330 = vmatmul.mubr.f32.gmra.mrb[36].mxu0 %v887_v35  ;;  %v3697_v35 = vld [vmem:[%s6464_s17 + $0x470] sm:$0xff]  ;;  %5657 = vmatprep.subr.bf16.mxu1 %v8501_v13 }
 0x266   : > { %2334 = vmatprep.mubr.f32.mxu0 %v952_v60  ;;  %v3698_v60 = vld [vmem:[%s6464_s17 + $0x478] sm:$0xff] }
 0x269   : > { %2335 = vmatmul.mubr.f32.gmra.mrb[38].mxu0 %v888_v32  ;;  %v896_v32 = vld [vmem:[#allocation2 + $0x170] sm:$0xff] }
 0x26a   : > { %2339 = vmatprep.mubr.f32.mxu0 %v953_v18  ;;  %v7370_v18 = vpack.c.bf16 %v3698_v60, %v3697_v35  ;;  %v3607_v35 = vld [vmem:[%s6464_s17 + $0x1a0] sm:$0xff]  ;;  %v3608_v60 = vld [vmem:[%s6464_s17 + $0x1a8] sm:$0xff] }
 0x26c   : > { %v7320_v58 = vpop.f32.mrb[0].mxu1  ;;  %8517 = vst [vmem:[#allocation13_spill] sm:$0xff] %v7370_v18  ;;  %5824 = vmatprep.subr.bf16.mxu0 %v7370_v18 }
 0x26d   : > { %2340 = vmatmul.mubr.f32.gmra.mrb[40].mxu0 %v889_v6  ;;  %v7323_v26 = vpop.f32.mrb[1].mxu1  ;;  %v3592_v6 = vld [vmem:[%s6464_s17 + $0x128] sm:$0xff] }
 0x26e   : > { %2344 = vmatprep.mubr.f32.mxu0 %v954_v42  ;;  %5826 = vmatpush3.bf16.msra.mxu0 %v7370_v18  ;;  %v5658_v42 = vpack.c.bf16 %v3592_v6, %v3591_v19 }
 0x270   : > { %v7337_v49 = vpop.f32.mrb[2].mxu1  ;;  %5659 = vmatpush1.bf16.msra.mxu1 %v5658_v42  ;;  %v3609_v42 = vld [vmem:[%s6464_s17 + $0x1b0] sm:$0xff] }
 0x271   : > { %2345 = vmatmul.mubr.f32.gmra.mrb[42].mxu0 %v890_v41  ;;  %v7339_v7 = vpop.f32.mrb[3].mxu1  ;;  %5660 = vmatprep.subr.bf16.mxu1 %v8501_v13  ;;  %v3594_v41 = vld [vmem:[%s6464_s17 + $0x138] sm:$0xff] }
 0x272   : > { %2349 = vmatprep.mubr.f32.mxu0 %v955_v21 }
 0x274   : > { %v7356_v39 = vpop.f32.mrb[4].mxu1 }
 0x275   : > { %2350 = vmatmul.mubr.f32.gmra.mrb[44].mxu0 %v891_v44  ;;  %v7358_v27 = vpop.f32.mrb[5].mxu1 }
 0x276   : > { %2354 = vmatprep.mubr.f32.mxu0 %v956_v43  ;;  %v3597_v43 = vld [vmem:[%s6464_s17 + $0x150] sm:$0xff] }
 0x277   : > { %v5667_v51 = vpack.c.bf16 %v3598_v47, %v3597_v43  ;;  %v3614_v43 = vld [vmem:[%s6464_s17 + $0x1d8] sm:$0xff] }
 0x278   : > { %v7375_v1 = vpop.f32.mrb[6].mxu1 }
 0x279   : > { %2355 = vmatmul.mubr.f32.gmra.mrb[46].mxu0 %v892_v61  ;;  %v7377_v36 = vpop.f32.mrb[7].mxu1  ;;  %v3599_v61 = vld [vmem:[%s6464_s17 + $0x160] sm:$0xff] }
 0x27a   : > { %2359 = vmatprep.mubr.f32.mxu0 %v957_v3  ;;  %v3600_v3 = vld [vmem:[%s6464_s17 + $0x168] sm:$0xff] }
 0x27b   : > { %v5670_v56 = vpack.c.bf16 %v3600_v3, %v3599_v61  ;;  %v3615_v3 = vld [vmem:[%s6464_s17 + $0x1e0] sm:$0xff] }
 0x27c   : > { %v7386_v11 = vpop.f32.mrb[8].mxu1 }
 0x27d   : > { %2360 = vmatmul.mubr.f32.gmra.mrb[48].mxu0 %v893_v62 }
 0x27e   : > { %2364 = vmatprep.mubr.f32.mxu0 %v958_v5  ;;  %v3601_v5 = vld [vmem:[%s6464_s17 + $0x170] sm:$0xff] }
 0x27f   : > { %v5673_v30 = vpack.c.bf16 %v3602_v48, %v3601_v5  ;;  %v7475_v48 = vld [vmem:[%s291_s8] ss:$0 sm:$0xff] }
 0x281   : > { %2365 = vmatmul.mubr.f32.gmra.mrb[50].mxu0 %v894_v14  ;;  %v3604_v14 = vld [vmem:[%s6464_s17 + $0x188] sm:$0xff] }
 0x282   : > { %2369 = vmatprep.mubr.f32.mxu0 %v959_v25  ;;  %v5676_v25 = vpack.c.bf16 %v3604_v14, %v3603_v12 }
 0x285   : > { %2370 = vmatmul.mubr.f32.gmra.mrb[52].mxu0 %v895_v38  ;;  %v3605_v38 = vld [vmem:[%s6464_s17 + $0x190] sm:$0xff] }
 0x286   : > { %2374 = vmatprep.mubr.f32.mxu0 %v960_v50  ;;  %v3606_v50 = vld [vmem:[%s6464_s17 + $0x198] sm:$0xff] }
 0x287   : > { %v5679_v29 = vpack.c.bf16 %v3606_v50, %v3605_v38  ;;  %v3618_v38 = vld [vmem:[%s6464_s17 + $0x1f8] sm:$0xff] }
 0x289   : > { %2375 = vmatmul.mubr.f32.gmra.mrb[54].mxu0 %v896_v32  ;;  %v5682_v32 = vpack.c.bf16 %v3608_v60, %v3607_v35 }
 0x28a   : > { %2379 = vmatprep.mubr.f32.mxu0 %v7256_v46  ;;  %v7389_v46 = vpop.f32.mrb[9].mxu1 }
 0x28b   : > { %v7394_v21 = vpop.f32.mrb[10].mxu1 }
 0x28d   : > { %2380 = vmatmul.mubr.f32.gmra.mrb[56].mxu0 %v7104_v53  ;;  %v5661_v53 = vpack.c.bf16 %v3594_v41, %v3593_v16  ;;  %v3611_v41 = vld [vmem:[%s6464_s17 + $0x1c0] sm:$0xff] }
 0x28e   : > { %2384 = vmatprep.mubr.f32.mxu0 %v7259_v52  ;;  %v900_v52 = vld [vmem:[#allocation2 + $0x1a0] sm:$0xff] }
 0x28f   : > { %5662 = vmatpush1.bf16.msra.mxu1 %v5661_v53  ;;  %v3612_v53 = vld [vmem:[%s6464_s17 + $0x1c8] sm:$0xff] }
 0x290   : > { %5663 = vmatprep.subr.bf16.mxu1 %v8501_v13 }
 0x291   : > { %2385 = vmatmul.mubr.f32.gmra.mrb[58].mxu0 %v7112_v40  ;;  %v7396_v40 = vpop.f32.mrb[11].mxu1 }
 0x292   : > { %2389 = vmatprep.mubr.f32.mxu0 %v963_v24  ;;  %v7401_v33 = vpop.f32.mrb[12].mxu1  ;;  %v3610_v24 = vld [vmem:[%s6464_s17 + $0x1b8] sm:$0xff] }
 0x293   : > { %5665 = vmatpush1.bf16.msra.mxu1 %v5664_v63  ;;  %v7403_v44 = vpop.f32.mrb[13].mxu1  ;;  %v3613_v63 = vld [vmem:[%s6464_s17 + $0x1d0] sm:$0xff] }
 0x294   : > { %5666 = vmatprep.subr.bf16.mxu1 %v8501_v13  ;;  %v7408_v54 = vpop.f32.mrb[14].mxu1  ;;  %v5691_v47 = vpack.c.bf16 %v3614_v43, %v3613_v63 }
 0x295   : > { %2390 = vmatmul.mubr.f32.gmra.mrb[60].mxu0 %v899_v17  ;;  %v7410_v57 = vpop.f32.mrb[15].mxu1  ;;  %v5685_v17 = vpack.c.bf16 %v3610_v24, %v3609_v42 }
 0x296   : > { %2394 = vmatprep.mubr.f32.mxu0 %v964_v31  ;;  %v7415_v59 = vpop.f32.mrb[16].mxu1 }
 0x297   : > { %5668 = vmatpush1.bf16.msra.mxu1 %v5667_v51  ;;  %v7417_v62 = vpop.f32.mrb[17].mxu1 }
 0x298   : > { %5669 = vmatprep.subr.bf16.mxu1 %v8501_v13  ;;  %v7422_v37 = vpop.f32.mrb[18].mxu1 }
 0x299   : > { %2395 = vmatmul.mubr.f32.gmra.mrb[62].mxu0 %v900_v52  ;;  %v7424_v4 = vpop.f32.mrb[19].mxu1  ;;  %v5688_v52 = vpack.c.bf16 %v3612_v53, %v3611_v41 }
 0x29a   : > { %v7429_v9 = vpop.f32.mrb[20].mxu1 }
 0x29b   : > { %5671 = vmatpush1.bf16.msra.mxu1 %v5670_v56  ;;  %v7431_v45 = vpop.f32.mrb[21].mxu1  ;;  %v3616_v56 = vld [vmem:[%s6464_s17 + $0x1e8] sm:$0xff] }
 0x29c   : > { %5672 = vmatprep.subr.bf16.mxu1 %v8501_v13  ;;  %v7436_v55 = vpop.f32.mrb[22].mxu1  ;;  %v5694_v5 = vpack.c.bf16 %v3616_v56, %v3615_v3 }
 0x29d   : > { %v7438_v10 = vpop.f32.mrb[23].mxu1 }
 0x29e   : > { %v7443_v19 = vpop.f32.mrb[24].mxu1 }
 0x29f   : > { %5674 = vmatpush1.bf16.msra.mxu1 %v5673_v30  ;;  %v7445_v6 = vpop.f32.mrb[25].mxu1 }
 0x2a0   : > { %5675 = vmatprep.subr.bf16.mxu1 %v8501_v13  ;;  %v7450_v31 = vpop.f32.mrb[26].mxu1 }
 0x2a1   : > { %v7452_v16 = vpop.f32.mrb[27].mxu1 }
 0x2a3   : > { %5677 = vmatpush1.bf16.msra.mxu1 %v5676_v25  ;;  %v3617_v25 = vld [vmem:[%s6464_s17 + $0x1f0] sm:$0xff] }
 0x2a4   : > { %5678 = vmatprep.subr.bf16.mxu1 %v8501_v13  ;;  %v7457_v20 = vpop.f32.mrb[28].mxu1  ;;  %v5697_v50 = vpack.c.bf16 %v3618_v38, %v3617_v25 }
 0x2a5   : > { %v7459_v8 = vpop.f32.mrb[29].mxu1 }
 0x2a7   : > { %5680 = vmatpush1.bf16.msra.mxu1 %v5679_v29 }
 0x2a8   : > { %5681 = vmatprep.subr.bf16.mxu1 %v8501_v13 }
 0x2ab   : > { %5683 = vmatpush1.bf16.msra.mxu1 %v5682_v32 }
 0x2ac   : > { %5684 = vmatprep.subr.bf16.mxu1 %v8501_v13 }
 0x2ae   : > { %v7464_v51 = vpop.f32.mrb[30].mxu1 }
 0x2af   : > { %5686 = vmatpush1.bf16.msra.mxu1 %v5685_v17  ;;  %v7466_v61 = vpop.f32.mrb[31].mxu1 }
 0x2b0   : > { %5687 = vmatprep.subr.bf16.mxu1 %v8501_v13 }
 0x2b3   : > { %5689 = vmatpush1.bf16.msra.mxu1 %v5688_v52 }
 0x2b4   : > { %5690 = vmatprep.subr.bf16.mxu1 %v8501_v13 }
 0x2b7   : > { %5692 = vmatpush1.bf16.msra.mxu1 %v5691_v47 }
 0x2b8   : > { %5693 = vmatprep.subr.bf16.mxu1 %v8501_v13 }
 0x2bb   : > { %5695 = vmatpush1.bf16.msra.mxu1 %v5694_v5 }
 0x2bc   : > { %5696 = vmatprep.subr.bf16.mxu1 %v8501_v13 }
 0x2bf   : > { %5698 = vmatpush1.bf16.msra.mxu1 %v5697_v50 }
 0x2c0   : > { %5699 = vmatprep.subr.bf16.mxu1 %v8501_v13 }
 0x2f0   : > { %v2241_v30 = vpop.f32.mrb[0].mxu0 }
 0x2f1   : > { %v5843_v12 = vadd.f32 %v7475_v48, %v2241_v30  ;;  %v2243_v14 = vpop.f32.mrb[1].mxu0 }
 0x2f3   : > { %v2467_v29 = vadd.f32 %v5843_v12, %v7323_v26 }
 0x2f4   : > { %v2246_v35 = vpop.f32.mrb[2].mxu0 }
 0x2f5   : > { %v2625_v60 = vmax.f32 %v2467_v29, 0.0  ;;  %v5844_v32 = vadd.f32 %v7475_v48, %v2246_v35  ;;  %v2248_v42 = vpop.f32.mrb[3].mxu0 }
 0x2f7   : > { %2658 = vst [vmem:[#allocation3 + $0x19] sm:$0xff] %v2625_v60  ;;  %v2472_v24 = vadd.f32 %v5844_v32, %v7320_v58  ;;  %3812 = vmatprep.mubr.f32.mxu1 %v2625_v60 }
 0x2f8   : > { %v2251_v17 = vpop.f32.mrb[4].mxu0 }
 0x2f9   : > { %v2626_v41 = vmax.f32 %v2472_v24, 0.0  ;;  %v5845_v53 = vadd.f32 %v7475_v48, %v2251_v17  ;;  %v2253_v52 = vpop.f32.mrb[5].mxu0 }
 0x2fb   : > { %2659 = vst [vmem:[#allocation3 + $0x21] sm:$0xff] %v2626_v41  ;;  %v2477_v26 = vadd.f32 %v5845_v53, %v7339_v7 }
 0x2fc   : > { %v2256_v63 = vpop.f32.mrb[6].mxu0 }
 0x2fd   : > { %v2627_v43 = vmax.f32 %v2477_v26, 0.0  ;;  %v5846_v47 = vadd.f32 %v7475_v48, %v2256_v63  ;;  %v2258_v3 = vpop.f32.mrb[7].mxu0 }
 0x2fe   : > { %v7488_v56 = vld [vmem:[#allocation3 + $0x18] sm:$0xff] }
 0x2ff   : > { %2660 = vst [vmem:[#allocation3 + $0x31] sm:$0xff] %v2627_v43  ;;  %v2482_v5 = vadd.f32 %v5846_v47, %v7337_v49  ;;  %3813 = vmatmul.mubr.f32.gmra.mrb[36].mxu1 %v7488_v56 }
 0x300   : > { %v2261_v58 = vpop.f32.mrb[8].mxu0  ;;  %3817 = vmatprep.mubr.f32.mxu1 %v2626_v41 }
 0x301   : > { %v2628_v30 = vmax.f32 %v2482_v5, 0.0  ;;  %v5847_v12 = vadd.f32 %v7475_v48, %v2261_v58  ;;  %v2263_v14 = vpop.f32.mrb[9].mxu0 }
 0x302   : > { %v7493_v25 = vld [vmem:[#allocation3 + $0x20] sm:$0xff] }
 0x303   : > { %2661 = vst [vmem:[#allocation3 + $0x39] sm:$0xff] %v2628_v30  ;;  %v2487_v7 = vadd.f32 %v5847_v12, %v7358_v27  ;;  %3818 = vmatmul.mubr.f32.gmra.mrb[38].mxu1 %v7493_v25 }
 0x304   : > { %v2266_v38 = vpop.f32.mrb[10].mxu0  ;;  %3822 = vmatprep.mubr.f32.mxu1 %v2627_v43 }
 0x305   : > { %v2629_v50 = vmax.f32 %v2487_v7, 0.0  ;;  %v5848_v49 = vadd.f32 %v7475_v48, %v2266_v38  ;;  %v2268_v29 = vpop.f32.mrb[11].mxu0 }
 0x306   : > { %v7498_v35 = vld [vmem:[#allocation3 + $0x30] sm:$0xff] }
 0x307   : > { %2662 = vst [vmem:[#allocation3 + $0x49] sm:$0xff] %v2629_v50  ;;  %v2492_v60 = vadd.f32 %v5848_v49, %v7356_v39  ;;  %3823 = vmatmul.mubr.f32.gmra.mrb[40].mxu1 %v7498_v35 }
 0x308   : > { %v2271_v32 = vpop.f32.mrb[12].mxu0  ;;  %3827 = vmatprep.mubr.f32.mxu1 %v2628_v30 }
 0x309   : > { %v2630_v42 = vmax.f32 %v2492_v60, 0.0  ;;  %v5849_v27 = vadd.f32 %v7475_v48, %v2271_v32  ;;  %v2273_v24 = vpop.f32.mrb[13].mxu0 }
 0x30a   : > { %v7503_v17 = vld [vmem:[#allocation3 + $0x32] sm:$0xff]  ;;  %v7507_v53 = vld [vmem:[#allocation3 + $0x3a] sm:$0xff] }
 0x30b   : > { %v7505_v41 = vld [vmem:[#allocation3 + $0x38] sm:$0xff]  ;;  %2663 = vst [vmem:[#allocation3 + $0x51] sm:$0xff] %v2630_v42  ;;  %v2497_v52 = vadd.f32 %v5849_v27, %v7377_v36  ;;  %5331 = vmatprep.mubr.f32.mxu0 %v7503_v17 }
 0x30c   : > { %3828 = vmatmul.mubr.f32.gmra.mrb[42].mxu1 %v7505_v41  ;;  %v2276_v39 = vpop.f32.mrb[14].mxu0  ;;  %5332 = vmatmul.mubr.f32.vlgmr.msra.gmra.mrb[64].mxu0 %v7507_v53 }
 0x30d   : > { %3832 = vmatprep.mubr.f32.mxu1 %v2629_v50  ;;  %v2631_v26 = vmax.f32 %v2497_v52, 0.0  ;;  %v5850_v63 = vadd.f32 %v7475_v48, %v2276_v39  ;;  %v2278_v43 = vpop.f32.mrb[15].mxu0 }
 0x30e   : > { %v7514_v47 = vld [vmem:[#allocation3 + $0x48] sm:$0xff] }
 0x30f   : > { %2664 = vst [vmem:[#allocation3 + $0x61] sm:$0xff] %v2631_v26  ;;  %v2502_v3 = vadd.f32 %v5850_v63, %v7375_v1 }
 0x310   : > { %3833 = vmatmul.mubr.f32.gmra.mrb[44].mxu1 %v7514_v47  ;;  %v2281_v36 = vpop.f32.mrb[16].mxu0 }
 0x311   : > { %3837 = vmatprep.mubr.f32.mxu1 %v2630_v42  ;;  %v2632_v5 = vmax.f32 %v2502_v3, 0.0  ;;  %v5851_v58 = vadd.f32 %v7475_v48, %v2281_v36  ;;  %v2283_v30 = vpop.f32.mrb[17].mxu0 }
 0x312   : > { %v7519_v12 = vld [vmem:[#allocation3 + $0x4a] sm:$0xff]  ;;  %v7523_v7 = vld [vmem:[#allocation3 + $0x52] sm:$0xff] }
 0x313   : > { %v7521_v14 = vld [vmem:[#allocation3 + $0x50] sm:$0xff]  ;;  %2665 = vst [vmem:[#allocation3 + $0x69] sm:$0xff] %v2632_v5  ;;  %v2507_v38 = vadd.f32 %v5851_v58, %v7389_v46  ;;  %5334 = vmatprep.mubr.f32.mxu0 %v7519_v12 }
 0x314   : > { %3838 = vmatmul.mubr.f32.gmra.mrb[46].mxu1 %v7521_v14  ;;  %v2286_v1 = vpop.f32.mrb[18].mxu0  ;;  %5335 = vmatmul.mubr.f32.gmra.mrb[66].mxu0 %v7523_v7 }
 0x315   : > { %3842 = vmatprep.mubr.f32.mxu1 %v2631_v26  ;;  %v2633_v50 = vmax.f32 %v2507_v38, 0.0  ;;  %v5852_v49 = vadd.f32 %v7475_v48, %v2286_v1  ;;  %v2288_v29 = vpop.f32.mrb[19].mxu0 }
 0x316   : > { %v7530_v60 = vld [vmem:[#allocation3 + $0x60] sm:$0xff] }
 0x317   : > { %2666 = vst [vmem:[#allocation3 + $0x79] sm:$0xff] %v2633_v50  ;;  %v2512_v32 = vadd.f32 %v5852_v49, %v7386_v11 }
 0x318   : > { %3843 = vmatmul.mubr.f32.gmra.mrb[48].mxu1 %v7530_v60  ;;  %v2291_v46 = vpop.f32.mrb[20].mxu0 }
 0x319   : > { %3847 = vmatprep.mubr.f32.mxu1 %v2632_v5  ;;  %v2634_v42 = vmax.f32 %v2512_v32, 0.0  ;;  %v5853_v27 = vadd.f32 %v7475_v48, %v2291_v46  ;;  %v2293_v24 = vpop.f32.mrb[21].mxu0 }
 0x31a   : > { %v7535_v52 = vld [vmem:[#allocation3 + $0x62] sm:$0xff]  ;;  %v7539_v26 = vld [vmem:[#allocation3 + $0x6a] sm:$0xff] }
 0x31b   : > { %v7537_v39 = vld [vmem:[#allocation3 + $0x68] sm:$0xff]  ;;  %2667 = vst [vmem:[#allocation3 + $0x81] sm:$0xff] %v2634_v42  ;;  %v2517_v63 = vadd.f32 %v5853_v27, %v7396_v40  ;;  %5337 = vmatprep.mubr.f32.mxu0 %v7535_v52 }
 0x31c   : > { %3848 = vmatmul.mubr.f32.gmra.mrb[50].mxu1 %v7537_v39  ;;  %v2296_v11 = vpop.f32.mrb[22].mxu0  ;;  %5338 = vmatmul.mubr.f32.gmra.mrb[68].mxu0 %v7539_v26 }
 0x31d   : > { %3852 = vmatprep.mubr.f32.mxu1 %v2633_v50  ;;  %v2635_v43 = vmax.f32 %v2517_v63, 0.0  ;;  %v5854_v3 = vadd.f32 %v7475_v48, %v2296_v11  ;;  %v2298_v36 = vpop.f32.mrb[23].mxu0 }
 0x31e   : > { %v7546_v5 = vld [vmem:[#allocation3 + $0x78] sm:$0xff] }
 0x31f   : > { %2668 = vst [vmem:[#allocation3 + $0x91] sm:$0xff] %v2635_v43  ;;  %v2522_v58 = vadd.f32 %v5854_v3, %v7394_v21 }
 0x320   : > { %3853 = vmatmul.mubr.f32.gmra.mrb[52].mxu1 %v7546_v5  ;;  %v2301_v40 = vpop.f32.mrb[24].mxu0 }
 0x321   : > { %3857 = vmatprep.mubr.f32.mxu1 %v2634_v42  ;;  %v2636_v30 = vmax.f32 %v2522_v58, 0.0  ;;  %v5855_v38 = vadd.f32 %v7475_v48, %v2301_v40  ;;  %v2303_v1 = vpop.f32.mrb[25].mxu0 }
 0x322   : > { %v7551_v49 = vld [vmem:[#allocation3 + $0x7a] sm:$0xff]  ;;  %v7555_v29 = vld [vmem:[#allocation3 + $0x82] sm:$0xff] }
 0x323   : > { %v7553_v50 = vld [vmem:[#allocation3 + $0x80] sm:$0xff]  ;;  %2669 = vst [vmem:[#allocation3 + $0x99] sm:$0xff] %v2636_v30  ;;  %v2527_v32 = vadd.f32 %v5855_v38, %v7403_v44  ;;  %5340 = vmatprep.mubr.f32.mxu0 %v7551_v49 }
 0x324   : > { %3858 = vmatmul.mubr.f32.gmra.mrb[54].mxu1 %v7553_v50  ;;  %v2306_v21 = vpop.f32.mrb[26].mxu0  ;;  %5341 = vmatmul.mubr.f32.gmra.mrb[70].mxu0 %v7555_v29 }
 0x325   : > { %3862 = vmatprep.mubr.f32.mxu1 %v2635_v43  ;;  %v2637_v46 = vmax.f32 %v2527_v32, 0.0  ;;  %v5856_v42 = vadd.f32 %v7475_v48, %v2306_v21  ;;  %v2308_v27 = vpop.f32.mrb[27].mxu0 }
 0x326   : > { %v7562_v24 = vld [vmem:[#allocation3 + $0x90] sm:$0xff] }
 0x327   : > { %2670 = vst [vmem:[#allocation3 + $0xa9] sm:$0xff] %v2637_v46  ;;  %v2532_v63 = vadd.f32 %v5856_v42, %v7401_v33 }
 0x328   : > { %3863 = vmatmul.mubr.f32.gmra.mrb[56].mxu1 %v7562_v24  ;;  %v2311_v44 = vpop.f32.mrb[28].mxu0 }
 0x329   : > { %3867 = vmatprep.mubr.f32.mxu1 %v2636_v30  ;;  %v2638_v11 = vmax.f32 %v2532_v63, 0.0  ;;  %v5857_v3 = vadd.f32 %v7475_v48, %v2311_v44  ;;  %v2313_v36 = vpop.f32.mrb[29].mxu0 }
 0x32a   : > { %v7567_v58 = vld [vmem:[#allocation3 + $0x92] sm:$0xff]  ;;  %v7571_v40 = vld [vmem:[#allocation3 + $0x9a] sm:$0xff] }
 0x32b   : > { %v7569_v43 = vld [vmem:[#allocation3 + $0x98] sm:$0xff]  ;;  %2671 = vst [vmem:[#allocation3 + $0xb1] sm:$0xff] %v2638_v11  ;;  %v2537_v38 = vadd.f32 %v5857_v3, %v7410_v57  ;;  %5343 = vmatprep.mubr.f32.mxu0 %v7567_v58 }
 0x32c   : > { %3868 = vmatmul.mubr.f32.gmra.mrb[58].mxu1 %v7569_v43  ;;  %v2316_v33 = vpop.f32.mrb[30].mxu0  ;;  %5344 = vmatmul.mubr.f32.gmra.mrb[72].mxu0 %v7571_v40 }
 0x32d   : > { %3872 = vmatprep.mubr.f32.mxu1 %v2637_v46  ;;  %v2639_v30 = vmax.f32 %v2537_v38, 0.0  ;;  %v5858_v1 = vadd.f32 %v7475_v48, %v2316_v33  ;;  %v2318_v32 = vpop.f32.mrb[31].mxu0 }
 0x32e   : > { %v7578_v21 = vld [vmem:[#allocation3 + $0xa8] sm:$0xff] }
 0x32f   : > { %2672 = vst [vmem:[#allocation3 + $0xc1] sm:$0xff] %v2639_v30  ;;  %v2542_v42 = vadd.f32 %v5858_v1, %v7408_v54 }
 0x330   : > { %3873 = vmatmul.mubr.f32.gmra.mrb[60].mxu1 %v7578_v21  ;;  %v2321_v57 = vpop.f32.mrb[32].mxu0 }
 0x331   : > { %3877 = vmatprep.mubr.f32.mxu1 %v2638_v11  ;;  %v2640_v27 = vmax.f32 %v2542_v42, 0.0  ;;  %v5859_v63 = vadd.f32 %v7475_v48, %v2321_v57  ;;  %v2323_v44 = vpop.f32.mrb[33].mxu0 }
 0x332   : > { %v7583_v3 = vld [vmem:[#allocation3 + $0xaa] sm:$0xff]  ;;  %v7587_v36 = vld [vmem:[#allocation3 + $0xb2] sm:$0xff] }
 0x333   : > { %v7585_v46 = vld [vmem:[#allocation3 + $0xb0] sm:$0xff]  ;;  %2673 = vst [vmem:[#allocation3 + $0xc9] sm:$0xff] %v2640_v27  ;;  %v2547_v38 = vadd.f32 %v5859_v63, %v7417_v62  ;;  %5346 = vmatprep.mubr.f32.mxu0 %v7583_v3 }
 0x334   : > { %3878 = vmatmul.mubr.f32.gmra.mrb[62].mxu1 %v7585_v46  ;;  %v2326_v54 = vpop.f32.mrb[34].mxu0  ;;  %5347 = vmatmul.mubr.f32.gmra.mrb[74].mxu0 %v7587_v36 }
 0x335   : > { %3882 = vmatprep.mubr.f32.mxu1 %v2639_v30  ;;  %v2641_v11 = vmax.f32 %v2547_v38, 0.0  ;;  %v5860_v33 = vadd.f32 %v7475_v48, %v2326_v54  ;;  %v2328_v1 = vpop.f32.mrb[35].mxu0 }
 0x336   : > { %v7594_v32 = vld [vmem:[#allocation3 + $0xc0] sm:$0xff] }
 0x337   : > { %2674 = vst [vmem:[#allocation3 + $0xd9] sm:$0xff] %v2641_v11  ;;  %v2552_v42 = vadd.f32 %v5860_v33, %v7415_v59 }
 0x338   : > { %3883 = vmatmul.mubr.f32.gmra.mrb[64].mxu1 %v7594_v32  ;;  %v2331_v62 = vpop.f32.mrb[36].mxu0 }
 0x339   : > { %3887 = vmatprep.mubr.f32.mxu1 %v2640_v27  ;;  %v2642_v57 = vmax.f32 %v2552_v42, 0.0  ;;  %v5861_v63 = vadd.f32 %v7475_v48, %v2331_v62  ;;  %v2333_v44 = vpop.f32.mrb[37].mxu0 }
 0x33a   : > { %v7599_v18 = vld [vmem:[#allocation3 + $0xc2] sm:$0xff]  ;;  %v7603_v38 = vld [vmem:[#allocation3 + $0xca] sm:$0xff] }
 0x33b   : > { %v7601_v30 = vld [vmem:[#allocation3 + $0xc8] sm:$0xff]  ;;  %2675 = vst [vmem:[#allocation3 + $0xe1] sm:$0xff] %v2642_v57  ;;  %v2557_v54 = vadd.f32 %v5861_v63, %v7424_v4  ;;  %5349 = vmatprep.mubr.f32.mxu0 %v7599_v18 }
 0x33c   : > { %3888 = vmatmul.mubr.f32.gmra.mrb[66].mxu1 %v7601_v30  ;;  %v2336_v59 = vpop.f32.mrb[38].mxu0  ;;  %5350 = vmatmul.mubr.f32.gmra.mrb[76].mxu0 %v7603_v38 }
 0x33d   : > { %3892 = vmatprep.mubr.f32.mxu1 %v2641_v11  ;;  %v2643_v27 = vmax.f32 %v2557_v54, 0.0  ;;  %v5862_v33 = vadd.f32 %v7475_v48, %v2336_v59  ;;  %v2338_v1 = vpop.f32.mrb[39].mxu0 }
 0x33e   : > { %v7610_v42 = vld [vmem:[#allocation3 + $0xd8] sm:$0xff] }
 0x33f   : > { %2676 = vst [vmem:[#allocation3 + $0xf1] sm:$0xff] %v2643_v27  ;;  %v2562_v62 = vadd.f32 %v5862_v33, %v7422_v37 }
 0x340   : > { %3893 = vmatmul.mubr.f32.gmra.mrb[68].mxu1 %v7610_v42  ;;  %v2341_v4 = vpop.f32.mrb[40].mxu0 }
 0x341   : > { %3897 = vmatprep.mubr.f32.mxu1 %v2642_v57  ;;  %v2644_v63 = vmax.f32 %v2562_v62, 0.0  ;;  %v5863_v44 = vadd.f32 %v7475_v48, %v2341_v4  ;;  %v2343_v15 = vpop.f32.mrb[41].mxu0 }
 0x342   : > { %v7615_v22 = vld [vmem:[#allocation3 + $0xda] sm:$0xff]  ;;  %v7619_v54 = vld [vmem:[#allocation3 + $0xe2] sm:$0xff] }
 0x343   : > { %v7617_v11 = vld [vmem:[#allocation3 + $0xe0] sm:$0xff]  ;;  %2677 = vst [vmem:[#allocation3 + $0xf9] sm:$0xff] %v2644_v63  ;;  %v2567_v59 = vadd.f32 %v5863_v44, %v7431_v45  ;;  %5352 = vmatprep.mubr.f32.mxu0 %v7615_v22 }
 0x344   : > { %3898 = vmatmul.mubr.f32.gmra.mrb[70].mxu1 %v7617_v11  ;;  %v2346_v37 = vpop.f32.mrb[42].mxu0  ;;  %5353 = vmatmul.mubr.f32.gmra.mrb[78].mxu0 %v7619_v54 }
 0x345   : > { %3902 = vmatprep.mubr.f32.mxu1 %v2643_v27  ;;  %v2645_v57 = vmax.f32 %v2567_v59, 0.0  ;;  %v5864_v15 = vadd.f32 %v7475_v48, %v2346_v37  ;;  %v2348_v33 = vpop.f32.mrb[43].mxu0 }
 0x346   : > { %v7626_v1 = vld [vmem:[#allocation3 + $0xf0] sm:$0xff] }
 0x347   : > { %2678 = vst [vmem:[#allocation3 + $0x109] sm:$0xff] %v2645_v57  ;;  %v2572_v62 = vadd.f32 %v5864_v15, %v7429_v9 }
 0x348   : > { %3903 = vmatmul.mubr.f32.gmra.mrb[72].mxu1 %v7626_v1  ;;  %v2351_v45 = vpop.f32.mrb[44].mxu0 }
 0x349   : > { %3907 = vmatprep.mubr.f32.mxu1 %v2644_v63  ;;  %v2646_v4 = vmax.f32 %v2572_v62, 0.0  ;;  %v5865_v44 = vadd.f32 %v7475_v48, %v2351_v45  ;;  %v2353_v2 = vpop.f32.mrb[45].mxu0 }
 0x34a   : > { %v7631_v0 = vld [vmem:[#allocation3 + $0xf2] sm:$0xff]  ;;  %v7635_v59 = vld [vmem:[#allocation3 + $0xfa] sm:$0xff] }
 0x34b   : > { %v7633_v27 = vld [vmem:[#allocation3 + $0xf8] sm:$0xff]  ;;  %2679 = vst [vmem:[#allocation3 + $0x111] sm:$0xff] %v2646_v4  ;;  %v2577_v37 = vadd.f32 %v5865_v44, %v7438_v10  ;;  %5355 = vmatprep.mubr.f32.mxu0 %v7631_v0 }
 0x34c   : > { %3908 = vmatmul.mubr.f32.gmra.mrb[74].mxu1 %v7633_v27  ;;  %v2356_v9 = vpop.f32.mrb[46].mxu0  ;;  %5356 = vmatmul.mubr.f32.gmra.mrb[80].mxu0 %v7635_v59 }
 0x34d   : > { %3912 = vmatprep.mubr.f32.mxu1 %v2645_v57  ;;  %v2647_v63 = vmax.f32 %v2577_v37, 0.0  ;;  %v5866_v2 = vadd.f32 %v7475_v48, %v2356_v9  ;;  %v2358_v15 = vpop.f32.mrb[47].mxu0 }
 0x34e   : > { %v7642_v33 = vld [vmem:[#allocation3 + $0x108] sm:$0xff] }
 0x34f   : > { %2680 = vst [vmem:[#allocation3 + $0x121] sm:$0xff] %v2647_v63  ;;  %v2582_v62 = vadd.f32 %v5866_v2, %v7436_v55 }
 0x350   : > { %3913 = vmatmul.mubr.f32.gmra.mrb[76].mxu1 %v7642_v33  ;;  %v2361_v10 = vpop.f32.mrb[48].mxu0 }
 0x351   : > { %3917 = vmatprep.mubr.f32.mxu1 %v2646_v4  ;;  %v2648_v45 = vmax.f32 %v2582_v62, 0.0  ;;  %v5867_v44 = vadd.f32 %v7475_v48, %v2361_v10  ;;  %v2363_v34 = vpop.f32.mrb[49].mxu0 }
 0x352   : > { %v7647_v28 = vld [vmem:[#allocation3 + $0x10a] sm:$0xff]  ;;  %v7651_v37 = vld [vmem:[#allocation3 + $0x112] sm:$0xff] }
 0x353   : > { %v7649_v57 = vld [vmem:[#allocation3 + $0x110] sm:$0xff]  ;;  %2681 = vst [vmem:[#allocation3 + $0x129] sm:$0xff] %v2648_v45  ;;  %v2587_v9 = vadd.f32 %v5867_v44, %v7445_v6  ;;  %5358 = vmatprep.mubr.f32.mxu0 %v7647_v28 }
 0x354   : > { %3918 = vmatmul.mubr.f32.gmra.mrb[78].mxu1 %v7649_v57  ;;  %v2366_v55 = vpop.f32.mrb[50].mxu0  ;;  %5359 = vmatmul.mubr.f32.gmra.mrb[82].mxu0 %v7651_v37 }
 0x355   : > { %3922 = vmatprep.mubr.f32.mxu1 %v2647_v63  ;;  %v7657_v4 = vmax.f32 %v2587_v9, 0.0  ;;  %v5868_v34 = vadd.f32 %v7475_v48, %v2366_v55  ;;  %v2368_v2 = vpop.f32.mrb[51].mxu0 }
 0x356   : > { %v7660_v15 = vld [vmem:[#allocation3 + $0x120] sm:$0xff] }
 0x357   : > { %8518 = vst [vmem:[#allocation14_spill] sm:$0xff] %v7657_v4  ;;  %2682 = vst [vmem:[#allocation3 + $0x139] sm:$0xff] %v7657_v4  ;;  %v2592_v62 = vadd.f32 %v5868_v34, %v7443_v19 }
 0x358   : > { %3923 = vmatmul.mubr.f32.gmra.mrb[80].mxu1 %v7660_v15  ;;  %v2371_v6 = vpop.f32.mrb[52].mxu0 }
 0x359   : > { %3927 = vmatprep.mubr.f32.mxu1 %v2648_v45  ;;  %v7665_v10 = vmax.f32 %v2592_v62, 0.0  ;;  %v5869_v44 = vadd.f32 %v7475_v48, %v2371_v6  ;;  %v2373_v63 = vpop.f32.mrb[53].mxu0 }
 0x35a   : > { %v7668_v9 = vld [vmem:[#allocation3 + $0x122] sm:$0xff]  ;;  %v7672_v55 = vld [vmem:[#allocation3 + $0x12a] sm:$0xff] }
 0x35b   : > { %8519 = vst [vmem:[#allocation15_spill] sm:$0xff] %v7665_v10  ;;  %v7670_v23 = vld [vmem:[#allocation3 + $0x128] sm:$0xff]  ;;  %8520 = vst [vmem:[#allocation16_spill] sm:$0xff] %v7672_v55  ;;  %v2597_v2 = vadd.f32 %v5869_v44, %v7452_v16  ;;  %5361 = vmatprep.mubr.f32.mxu0 %v7668_v9 }
 0x35c   : > { %2683 = vst [vmem:[#allocation3 + $0x141] sm:$0xff] %v7665_v10  ;;  %3928 = vmatmul.mubr.f32.gmra.mrb[82].mxu1 %v7670_v23  ;;  %v2376_v19 = vpop.f32.mrb[54].mxu0  ;;  %5362 = vmatmul.mubr.f32.gmra.mrb[84].mxu0 %v7672_v55 }
 0x35d   : > { %3932 = vmatprep.mubr.f32.mxu1 %v7657_v4  ;;  %v7680_v45 = vmax.f32 %v2597_v2, 0.0  ;;  %v5870_v34 = vadd.f32 %v7475_v48, %v2376_v19  ;;  %v2378_v62 = vpop.f32.mrb[55].mxu0 }
 0x35e   : > { %v7683_v6 = vld [vmem:[#allocation3 + $0x138] sm:$0xff] }
 0x35f   : > { %8521 = vst [vmem:[#allocation17_spill] sm:$0xff] %v7680_v45  ;;  %2684 = vst [vmem:[#allocation3 + $0x151] sm:$0xff] %v7680_v45  ;;  %v2602_v16 = vadd.f32 %v5870_v34, %v7450_v31 }
 0x360   : > { %3933 = vmatmul.mubr.f32.gmra.mrb[84].mxu1 %v7683_v6  ;;  %v2381_v44 = vpop.f32.mrb[56].mxu0 }
 0x361   : > { %3937 = vmatprep.mubr.f32.mxu1 %v7665_v10  ;;  %v7689_v63 = vmax.f32 %v2602_v16, 0.0  ;;  %v5871_v4 = vadd.f32 %v7475_v48, %v2381_v44  ;;  %v2383_v2 = vpop.f32.mrb[57].mxu0 }
 0x363   : > { %v7692_v55 = vld [vmem:[#allocation3 + $0x13a] sm:$0xff]  ;;  %v7696_v62 = vld [vmem:[#allocation3 + $0x142] sm:$0xff]  ;;  %2685 = vst [vmem:[#allocation3 + $0x159] sm:$0xff] %v7689_v63  ;;  %v2607_v31 = vadd.f32 %v5871_v4, %v7459_v8 }
 0x364   : > { %8522 = vst [vmem:[#allocation18_spill] sm:$0xff] %v7692_v55  ;;  %v7694_v19 = vld [vmem:[#allocation3 + $0x140] sm:$0xff]  ;;  %8523 = vst [vmem:[#allocation19_spill] sm:$0xff] %v7696_v62  ;;  %5364 = vmatprep.mubr.f32.mxu0 %v7692_v55  ;;  %v2386_v34 = vpop.f32.mrb[58].mxu0 }
 0x365   : > { %3938 = vmatmul.mubr.f32.gmra.mrb[86].mxu1 %v7694_v19  ;;  %5365 = vmatmul.mubr.f32.gmra.mrb[86].mxu0 %v7696_v62  ;;  %v7704_v16 = vmax.f32 %v2607_v31, 0.0  ;;  %v5872_v44 = vadd.f32 %v7475_v48, %v2386_v34  ;;  %v2388_v2 = vpop.f32.mrb[59].mxu0 }
 0x366   : > { %3942 = vmatprep.mubr.f32.mxu1 %v7680_v45  ;;  %v7707_v10 = vld [vmem:[#allocation3 + $0x150] sm:$0xff] }
 0x367   : > { %2686 = vst [vmem:[#allocation3 + $0x169] sm:$0xff] %v7704_v16  ;;  %v2612_v8 = vadd.f32 %v5872_v44, %v7457_v20 }
 0x368   : > { %v2391_v4 = vpop.f32.mrb[60].mxu0 }
 0x369   : > { %3943 = vmatmul.mubr.f32.gmra.mrb[88].mxu1 %v7707_v10  ;;  %v7713_v55 = vmax.f32 %v2612_v8, 0.0  ;;  %v5873_v45 = vadd.f32 %v7475_v48, %v2391_v4  ;;  %v2393_v31 = vpop.f32.mrb[61].mxu0 }
 0x36a   : > { %3947 = vmatprep.mubr.f32.mxu1 %v7689_v63  ;;  %v7716_v62 = vld [vmem:[#allocation3 + $0x158] sm:$0xff]  ;;  %v3619_v31 = vld [vmem:[%s6464_s17 + $0x200] sm:$0xff] }
 0x36b   : > { %8524 = vst [vmem:[#allocation20_spill] sm:$0xff] %v7713_v55  ;;  %2687 = vst [vmem:[#allocation3 + $0x171] sm:$0xff] %v7713_v55  ;;  %v7720_v34 = vadd.f32 %v5873_v45, %v7466_v61 }
 0x36c   : > { %v2396_v20 = vpop.f32.mrb[62].mxu0 }
 0x36d   : > { %8525 = vst [vmem:[#allocation21_spill] sm:$0xff] %v7720_v34  ;;  %3948 = vmatmul.mubr.f32.gmra.mrb[90].mxu1 %v7716_v62  ;;  %v8475_v44 = vmax.f32 %v7720_v34, 0.0  ;;  %v5874_v2 = vadd.f32 %v7475_v48, %v2396_v20  ;;  %v2398_v8 = vpop.f32.mrb[63].mxu0  ;;  %v3620_v48 = vld [vmem:[%s6464_s17 + $0x208] sm:$0xff]  ;;  %v2819_v34 = vld [vmem:[#allocation3 + $0xa] sm:$0xff] }
 0x36e   : > { %3952 = vmatprep.mubr.f32.mxu1 %v7704_v16  ;;  %v7726_v4 = vld [vmem:[#allocation3 + $0x168] sm:$0xff]  ;;  %v3621_v8 = vld [vmem:[%s6464_s17 + $0x210] sm:$0xff] }
 0x36f   : > { %2688 = vst [vmem:[#allocation3 + $0x181] sm:$0xff] %v8475_v44  ;;  %v7731_v61 = vadd.f32 %v5874_v2, %v7464_v51  ;;  %v2818_v51 = vld [vmem:[#allocation3 + $0x2] sm:$0xff]  ;;  %v5700_v2 = vpack.c.bf16 %v3620_v48, %v3619_v31 }
 0x370   : > { %v3622_v44 = vld [vmem:[%s6464_s17 + $0x218] sm:$0xff]  ;;  %v3625_v31 = vld [vmem:[%s6464_s17 + $0x230] sm:$0xff] }
 0x371   : > { %8526 = vst [vmem:[#allocation22_spill] sm:$0xff] %v7731_v61  ;;  %3953 = vmatmul.mubr.f32.gmra.mrb[92].mxu1 %v7726_v4  ;;  %v8478_v45 = vmax.f32 %v7731_v61, 0.0  ;;  %v3624_v61 = vld [vmem:[%s6464_s17 + $0x228] sm:$0xff]  ;;  %v3626_v48 = vld [vmem:[%s6464_s17 + $0x238] sm:$0xff] }
 0x372   : > { %3957 = vmatprep.mubr.f32.mxu1 %v7713_v55  ;;  %v7738_v20 = vld [vmem:[#allocation3 + $0x170] sm:$0xff]  ;;  %v5703_v55 = vpack.c.bf16 %v3622_v44, %v3621_v8  ;;  %v5709_v44 = vpack.c.bf16 %v3626_v48, %v3625_v31 }
 0x373   : > { %2689 = vst [vmem:[#allocation3 + $0x189] sm:$0xff] %v8478_v45  ;;  %v3623_v45 = vld [vmem:[%s6464_s17 + $0x220] sm:$0xff] }
 0x375   : > { %3958 = vmatmul.mubr.f32.gmra.mrb[94].mxu1 %v7738_v20 }
 0x376   : > { %4027 = vmatprep.mubr.f32.mxu1 %v7488_v56  ;;  %v5706_v56 = vpack.c.bf16 %v3624_v61, %v3623_v45  ;;  %v3630_v45 = vld [vmem:[%s6464_s17 + $0x258] sm:$0xff] }
 0x379   : > { %4028 = vmatmul.mubr.f32.vlgmr.msra.gmra.mrb[32].mxu1 %v2818_v51 }
 0x37a   : > { %4032 = vmatprep.mubr.f32.mxu1 %v7493_v25  ;;  %5701 = vmatpush1.bf16.msra.mxu1 %v5700_v2  ;;  %v7754_v25 = vld [vmem:[#allocation3 + $0x1a] sm:$0xff]  ;;  %v3631_v2 = vld [vmem:[%s6464_s17 + $0x260] sm:$0xff] }
 0x37b   : > { %5702 = vmatprep.subr.bf16.mxu1 %v8501_v13 }
 0x37d   : > { %4033 = vmatmul.mubr.f32.gmra.mrb[34].mxu1 %v2819_v34  ;;  %v7761_v34 = vld [vmem:[#allocation3 + $0x22] sm:$0xff] }
 0x37e   : > { %4037 = vmatprep.mubr.f32.mxu1 %v7498_v35  ;;  %5704 = vmatpush1.bf16.msra.mxu1 %v5703_v55  ;;  %v3627_v35 = vld [vmem:[%s6464_s17 + $0x240] sm:$0xff]  ;;  %v3628_v55 = vld [vmem:[%s6464_s17 + $0x248] sm:$0xff] }
 0x37f   : > { %5705 = vmatprep.subr.bf16.mxu1 %v8501_v13  ;;  %v5712_v61 = vpack.c.bf16 %v3628_v55, %v3627_v35 }
 0x381   : > { %4038 = vmatmul.mubr.f32.gmra.mrb[36].mxu1 %v7754_v25 }
 0x382   : > { %4042 = vmatprep.mubr.f32.mxu1 %v7505_v41  ;;  %5707 = vmatpush1.bf16.msra.mxu1 %v5706_v56  ;;  %v3629_v41 = vld [vmem:[%s6464_s17 + $0x250] sm:$0xff] }
 0x383   : > { %5708 = vmatprep.subr.bf16.mxu1 %v8501_v13  ;;  %v5715_v51 = vpack.c.bf16 %v3630_v45, %v3629_v41  ;;  %v3647_v41 = vld [vmem:[%s6464_s17 + $0x2e0] sm:$0xff]  ;;  %v3649_v45 = vld [vmem:[%s6464_s17 + $0x2f0] sm:$0xff] }
 0x385   : > { %4043 = vmatmul.mubr.f32.gmra.mrb[38].mxu1 %v7761_v34 }
 0x386   : > { %4047 = vmatprep.mubr.f32.mxu1 %v7514_v47  ;;  %5710 = vmatpush1.bf16.msra.mxu1 %v5709_v44  ;;  %v3632_v47 = vld [vmem:[%s6464_s17 + $0x268] sm:$0xff] }
 0x387   : > { %5711 = vmatprep.subr.bf16.mxu1 %v8501_v13  ;;  %v5718_v8 = vpack.c.bf16 %v3632_v47, %v3631_v2 }
 0x389   : > { %4048 = vmatmul.mubr.f32.gmra.mrb[40].mxu1 %v7503_v17  ;;  %v3633_v17 = vld [vmem:[%s6464_s17 + $0x270] sm:$0xff] }
 0x38a   : > { %4052 = vmatprep.mubr.f32.mxu1 %v7521_v14  ;;  %5713 = vmatpush1.bf16.msra.mxu1 %v5712_v61  ;;  %v3634_v14 = vld [vmem:[%s6464_s17 + $0x278] sm:$0xff] }
 0x38b   : > { %5714 = vmatprep.subr.bf16.mxu1 %v8501_v13  ;;  %v5721_v56 = vpack.c.bf16 %v3634_v14, %v3633_v17  ;;  %v3656_v17 = vld [vmem:[%s6464_s17 + $0x328] sm:$0xff] }
 0x38c   : > { %v3012_v14 = vld [vmem:[#allocation3 + $0x32] sm:$0xff] }
 0x38d   : > { %4053 = vmatmul.mubr.f32.gmra.mrb[42].mxu1 %v7507_v53  ;;  %v3635_v53 = vld [vmem:[%s6464_s17 + $0x280] sm:$0xff] }
 0x38e   : > { %4057 = vmatprep.mubr.f32.mxu1 %v7530_v60  ;;  %5716 = vmatpush1.bf16.msra.mxu1 %v5715_v51  ;;  %v3636_v60 = vld [vmem:[%s6464_s17 + $0x288] sm:$0xff]  ;;  %v3650_v51 = vld [vmem:[%s6464_s17 + $0x2f8] sm:$0xff] }
 0x38f   : > { %5717 = vmatprep.subr.bf16.mxu1 %v8501_v13  ;;  %v5724_v31 = vpack.c.bf16 %v3636_v60, %v3635_v53  ;;  %v3657_v53 = vld [vmem:[%s6464_s17 + $0x330] sm:$0xff]  ;;  %v3658_v60 = vld [vmem:[%s6464_s17 + $0x338] sm:$0xff] }
 0x391   : > { %4058 = vmatmul.mubr.f32.gmra.mrb[44].mxu1 %v7519_v12  ;;  %v3637_v12 = vld [vmem:[%s6464_s17 + $0x290] sm:$0xff] }
 0x392   : > { %4062 = vmatprep.mubr.f32.mxu1 %v7537_v39  ;;  %5719 = vmatpush1.bf16.msra.mxu1 %v5718_v8  ;;  %v3638_v39 = vld [vmem:[%s6464_s17 + $0x298] sm:$0xff]  ;;  %v3655_v8 = vld [vmem:[%s6464_s17 + $0x320] sm:$0xff] }
 0x393   : > { %5720 = vmatprep.subr.bf16.mxu1 %v8501_v13  ;;  %v5727_v48 = vpack.c.bf16 %v3638_v39, %v3637_v12  ;;  %v3013_v12 = vld [vmem:[#allocation3 + $0x3a] sm:$0xff] }
 0x395   : > { %4063 = vmatmul.mubr.f32.gmra.mrb[46].mxu1 %v7523_v7  ;;  %v3639_v7 = vld [vmem:[%s6464_s17 + $0x2a0] sm:$0xff] }
 0x396   : > { %4067 = vmatprep.mubr.f32.mxu1 %v7546_v5  ;;  %5722 = vmatpush1.bf16.msra.mxu1 %v5721_v56  ;;  %v3640_v5 = vld [vmem:[%s6464_s17 + $0x2a8] sm:$0xff]  ;;  %v5754_v56 = vpack.c.bf16 %v3656_v17, %v3655_v8  ;;  %v7937_v17 = vld [vmem:[#allocation3 + $0x69] sm:$0xff] }
 0x397   : > { %5723 = vmatprep.subr.bf16.mxu1 %v8501_v13  ;;  %v5730_v44 = vpack.c.bf16 %v3640_v5, %v3639_v7  ;;  %v3659_v7 = vld [vmem:[%s6464_s17 + $0x340] sm:$0xff]  ;;  %v3660_v5 = vld [vmem:[%s6464_s17 + $0x348] sm:$0xff] }
 0x398   : > { %v3668_v8 = vld [vmem:[%s6464_s17 + $0x388] sm:$0xff] }
 0x399   : > { %4068 = vmatmul.mubr.f32.gmra.mrb[48].mxu1 %v7535_v52  ;;  %v3641_v52 = vld [vmem:[%s6464_s17 + $0x2b0] sm:$0xff] }
 0x39a   : > { %4072 = vmatprep.mubr.f32.mxu1 %v7553_v50  ;;  %5725 = vmatpush1.bf16.msra.mxu1 %v5724_v31  ;;  %v3642_v50 = vld [vmem:[%s6464_s17 + $0x2b8] sm:$0xff]  ;;  %v7895_v31 = vld [vmem:[#allocation3 + $0x31] sm:$0xff] }
 0x39b   : > { %5726 = vmatprep.subr.bf16.mxu1 %v8501_v13  ;;  %v5733_v35 = vpack.c.bf16 %v3642_v50, %v3641_v52  ;;  %v3014_v52 = vld [vmem:[#allocation3 + $0x4a] sm:$0xff]  ;;  %v5760_v50 = vpack.c.bf16 %v3660_v5, %v3659_v7 }
 0x39d   : > { %4073 = vmatmul.mubr.f32.gmra.mrb[50].mxu1 %v7539_v26  ;;  %v3643_v26 = vld [vmem:[%s6464_s17 + $0x2c0] sm:$0xff] }
 0x39e   : > { %4077 = vmatprep.mubr.f32.mxu1 %v7562_v24  ;;  %5728 = vmatpush1.bf16.msra.mxu1 %v5727_v48  ;;  %v3644_v24 = vld [vmem:[%s6464_s17 + $0x2c8] sm:$0xff]  ;;  %v5757_v48 = vpack.c.bf16 %v3658_v60, %v3657_v53  ;;  %v3670_v53 = vld [vmem:[%s6464_s17 + $0x398] sm:$0xff] }
 0x39f   : > { %5729 = vmatprep.subr.bf16.mxu1 %v8501_v13  ;;  %v5736_v55 = vpack.c.bf16 %v3644_v24, %v3643_v26  ;;  %v3662_v26 = vld [vmem:[%s6464_s17 + $0x358] sm:$0xff]  ;;  %v7943_v60 = vld [vmem:[#allocation3 + $0x79] sm:$0xff] }
 0x3a0   : > { %v7911_v24 = vld [vmem:[#allocation3 + $0x49] sm:$0xff] }
 0x3a1   : > { %4078 = vmatmul.mubr.f32.gmra.mrb[52].mxu1 %v7551_v49  ;;  %v3645_v49 = vld [vmem:[%s6464_s17 + $0x2d0] sm:$0xff] }
 0x3a2   : > { %4082 = vmatprep.mubr.f32.mxu1 %v7569_v43  ;;  %5731 = vmatpush1.bf16.msra.mxu1 %v5730_v44  ;;  %v3646_v43 = vld [vmem:[%s6464_s17 + $0x2d8] sm:$0xff]  ;;  %v7905_v44 = vld [vmem:[#allocation3 + $0x39] sm:$0xff] }
 0x3a3   : > { %5732 = vmatprep.subr.bf16.mxu1 %v8501_v13  ;;  %v5739_v61 = vpack.c.bf16 %v3646_v43, %v3645_v49  ;;  %v3015_v49 = vld [vmem:[#allocation3 + $0x52] sm:$0xff] }
 0x3a5   : > { %4083 = vmatmul.mubr.f32.gmra.mrb[54].mxu1 %v7555_v29  ;;  %v3648_v29 = vld [vmem:[%s6464_s17 + $0x2e8] sm:$0xff] }
 0x3a6   : > { %4087 = vmatprep.mubr.f32.mxu1 %v7578_v21  ;;  %5734 = vmatpush1.bf16.msra.mxu1 %v5733_v35  ;;  %v5742_v21 = vpack.c.bf16 %v3648_v29, %v3647_v41  ;;  %v3661_v35 = vld [vmem:[%s6464_s17 + $0x350] sm:$0xff]  ;;  %v3663_v41 = vld [vmem:[%s6464_s17 + $0x360] sm:$0xff]  ;;  %v3664_v29 = vld [vmem:[%s6464_s17 + $0x368] sm:$0xff] }
 0x3a7   : > { %5735 = vmatprep.subr.bf16.mxu1 %v8501_v13 }
 0x3a9   : > { %4088 = vmatmul.mubr.f32.gmra.mrb[56].mxu1 %v7567_v58  ;;  %v5745_v58 = vpack.c.bf16 %v3650_v51, %v3649_v45  ;;  %v3016_v45 = vld [vmem:[#allocation3 + $0x62] sm:$0xff]  ;;  %v5766_v51 = vpack.c.bf16 %v3664_v29, %v3663_v41  ;;  %v7959_v29 = vld [vmem:[#allocation3 + $0x91] sm:$0xff] }
 0x3aa   : > { %4092 = vmatprep.mubr.f32.mxu1 %v7585_v46  ;;  %5737 = vmatpush1.bf16.msra.mxu1 %v5736_v55  ;;  %v3674_v41 = vld [vmem:[%s6464_s17 + $0x3b8] sm:$0xff] }
 0x3ab   : > { %5738 = vmatprep.subr.bf16.mxu1 %v8501_v13 }
 0x3ad   : > { %4093 = vmatmul.mubr.f32.gmra.mrb[58].mxu1 %v7571_v40 }
 0x3ae   : > { %4097 = vmatprep.mubr.f32.mxu1 %v7594_v32  ;;  %5740 = vmatpush1.bf16.msra.mxu1 %v5739_v61  ;;  %v5763_v61 = vpack.c.bf16 %v3662_v26, %v3661_v35  ;;  %v7953_v35 = vld [vmem:[#allocation3 + $0x81] sm:$0xff]  ;;  %v3020_v26 = vld [vmem:[#allocation3 + $0x92] sm:$0xff] }
 0x3af   : > { %5741 = vmatprep.subr.bf16.mxu1 %v8501_v13 }
 0x3b1   : > { %4098 = vmatmul.mubr.f32.gmra.mrb[60].mxu1 %v7583_v3  ;;  %v8528_v3 = vld [vmem:[#allocation18_spill] sm:$0xff] }
 0x3b2   : > { %4102 = vmatprep.mubr.f32.mxu1 %v7601_v30  ;;  %5743 = vmatpush1.bf16.msra.mxu1 %v5742_v21  ;;  %v7921_v21 = vld [vmem:[#allocation3 + $0x51] sm:$0xff] }
 0x3b3   : > { %5744 = vmatprep.subr.bf16.mxu1 %v8501_v13 }
 0x3b5   : > { %4103 = vmatmul.mubr.f32.gmra.mrb[62].mxu1 %v7587_v36  ;;  %v7852_v36 = vld [vmem:[#allocation3 + $0x152] sm:$0xff] }
 0x3b6   : > { %4107 = vmatprep.mubr.f32.mxu1 %v7610_v42  ;;  %5746 = vmatpush1.bf16.msra.mxu1 %v5745_v58  ;;  %v7863_v42 = vld [vmem:[#allocation3 + $0x180] sm:$0xff] }
 0x3b7   : > { %5747 = vmatprep.subr.bf16.mxu1 %v8501_v13  ;;  %v3665_v58 = vld [vmem:[%s6464_s17 + $0x370] sm:$0xff] }
 0x3b9   : > { %4108 = vmatmul.mubr.f32.gmra.mrb[64].mxu1 %v7599_v18  ;;  %v8527_v18 = vld [vmem:[#allocation16_spill] sm:$0xff] }
 0x3ba   : > { %4112 = vmatprep.mubr.f32.mxu1 %v7617_v11  ;;  %v7866_v11 = vld [vmem:[#allocation3 + $0x16a] sm:$0xff] }
 0x3bd   : > { %4113 = vmatmul.mubr.f32.gmra.mrb[66].mxu1 %v7603_v38  ;;  %v7860_v38 = vld [vmem:[#allocation3 + $0x15a] sm:$0xff] }
 0x3be   : > { %4117 = vmatprep.mubr.f32.mxu1 %v7626_v1 }
 0x3c1   : > { %4118 = vmatmul.mubr.f32.gmra.mrb[68].mxu1 %v7615_v22 }
 0x3c2   : > { %4122 = vmatprep.mubr.f32.mxu1 %v7633_v27  ;;  %v7871_v27 = vld [vmem:[#allocation3 + $0x188] sm:$0xff] }
 0x3c5   : > { %4123 = vmatmul.mubr.f32.gmra.mrb[70].mxu1 %v7619_v54 }
 0x3c6   : > { %4127 = vmatprep.mubr.f32.mxu1 %v7642_v33 }
 0x3c9   : > { %4128 = vmatmul.mubr.f32.gmra.mrb[72].mxu1 %v7631_v0 }
 0x3ca   : > { %4132 = vmatprep.mubr.f32.mxu1 %v7649_v57  ;;  %v3651_v57 = vld [vmem:[%s6464_s17 + $0x300] sm:$0xff] }
 0x3cd   : > { %4133 = vmatmul.mubr.f32.gmra.mrb[74].mxu1 %v7635_v59 }
 0x3ce   : > { %4137 = vmatprep.mubr.f32.mxu1 %v7660_v15  ;;  %v3652_v15 = vld [vmem:[%s6464_s17 + $0x308] sm:$0xff] }
 0x3d1   : > { %4138 = vmatmul.mubr.f32.gmra.mrb[76].mxu1 %v7647_v28 }
 0x3d2   : > { %4142 = vmatprep.mubr.f32.mxu1 %v7670_v23  ;;  %v8529_v23 = vld [vmem:[#allocation19_spill] sm:$0xff] }
 0x3d5   : > { %4143 = vmatmul.mubr.f32.gmra.mrb[78].mxu1 %v7651_v37 }
 0x3d6   : > { %4147 = vmatprep.mubr.f32.mxu1 %v7683_v6  ;;  %v5748_v6 = vpack.c.bf16 %v3652_v15, %v3651_v57  ;;  %v3666_v57 = vld [vmem:[%s6464_s17 + $0x378] sm:$0xff] }
 0x3d7   : > { %v7927_v15 = vld [vmem:[#allocation3 + $0x61] sm:$0xff] }
 0x3d9   : > { %4148 = vmatmul.mubr.f32.gmra.mrb[80].mxu1 %v7668_v9 }
 0x3da   : > { %4152 = vmatprep.mubr.f32.mxu1 %v7694_v19  ;;  %v3653_v19 = vld [vmem:[%s6464_s17 + $0x310] sm:$0xff] }
 0x3dd   : > { %4153 = vmatmul.mubr.f32.gmra.mrb[82].mxu1 %v8527_v18 }
 0x3de   : > { %4157 = vmatprep.mubr.f32.mxu1 %v7707_v10  ;;  %v7878_v10 = vld [vmem:[#allocation3 + $0x172] sm:$0xff] }
 0x3df   : > { %v7844_v40 = vpop.f32.mrb[64].mxu0 }
 0x3e0   : > { %v7847_v46 = vpop.f32.mrb[65].mxu0 }
 0x3e1   : > { %4158 = vmatmul.mubr.f32.gmra.mrb[84].mxu1 %v8528_v3 }
 0x3e2   : > { %4162 = vmatprep.mubr.f32.mxu1 %v7716_v62  ;;  %v3654_v62 = vld [vmem:[%s6464_s17 + $0x318] sm:$0xff] }
 0x3e3   : > { %v5751_v47 = vpack.c.bf16 %v3654_v62, %v3653_v19  ;;  %v3017_v19 = vld [vmem:[#allocation3 + $0x6a] sm:$0xff] }
 0x3e5   : > { %4163 = vmatmul.mubr.f32.gmra.mrb[86].mxu1 %v8529_v23 }
 0x3e6   : > { %4167 = vmatprep.mubr.f32.mxu1 %v7726_v4  ;;  %v2946_v4 = vld [vmem:[#allocation3 + $0x19] sm:$0xff] }
 0x3e7   : > { %v7854_v32 = vpop.f32.mrb[66].mxu0 }
 0x3e8   : > { %v7857_v30 = vpop.f32.mrb[67].mxu0 }
 0x3e9   : > { %4168 = vmatmul.mubr.f32.gmra.mrb[88].mxu1 %v7852_v36 }
 0x3ea   : > { %4172 = vmatprep.mubr.f32.mxu1 %v7738_v20 }
 0x3ed   : > { %4173 = vmatmul.mubr.f32.gmra.mrb[90].mxu1 %v7860_v38 }
 0x3ee   : > { %4177 = vmatprep.mubr.f32.mxu1 %v7863_v42 }
 0x3ef   : > { %v7868_v1 = vpop.f32.mrb[68].mxu0 }
 0x3f0   : > { %v7873_v33 = vpop.f32.mrb[69].mxu0 }
 0x3f1   : > { %4178 = vmatmul.mubr.f32.gmra.mrb[92].mxu1 %v7866_v11 }
 0x3f2   : > { %4182 = vmatprep.mubr.f32.mxu1 %v7871_v27 }
 0x3f5   : > { %4183 = vmatmul.mubr.f32.gmra.mrb[94].mxu1 %v7878_v10 }
 0x3f6   : > { %4252 = vmatprep.mubr.f32.mxu1 %v7754_v25  ;;  %v2947_v25 = vld [vmem:[#allocation3 + $0x21] sm:$0xff] }
 0x3f7   : > { %v7884_v20 = vpop.f32.mrb[70].mxu0 }
 0x3f8   : > { %v7886_v2 = vpop.f32.mrb[71].mxu0 }
 0x3f9   : > { %4253 = vmatmul.mubr.f32.vlgmr.msra.gmra.mrb[32].mxu1 %v2946_v4  ;;  %v5769_v4 = vpack.c.bf16 %v3666_v57, %v3665_v58 }
 0x3fa   : > { %4257 = vmatprep.mubr.f32.mxu1 %v7761_v34  ;;  %5749 = vmatpush1.bf16.msra.mxu1 %v5748_v6 }
 0x3fb   : > { %5750 = vmatprep.subr.bf16.mxu1 %v8501_v13 }
 0x3fd   : > { %4258 = vmatmul.mubr.f32.gmra.mrb[34].mxu1 %v2947_v25  ;;  %v3018_v25 = vld [vmem:[#allocation3 + $0x7a] sm:$0xff] }
 0x3fe   : > { %4262 = vmatprep.mubr.f32.mxu1 %v3012_v14  ;;  %5752 = vmatpush1.bf16.msra.mxu1 %v5751_v47  ;;  %v3667_v47 = vld [vmem:[%s6464_s17 + $0x380] sm:$0xff] }
 0x3ff   : > { %5753 = vmatprep.subr.bf16.mxu1 %v8501_v13  ;;  %v7897_v34 = vpop.f32.mrb[72].mxu0  ;;  %v5772_v14 = vpack.c.bf16 %v3668_v8, %v3667_v47  ;;  %v7969_v47 = vld [vmem:[#allocation3 + $0x99] sm:$0xff]  ;;  %v3022_v8 = vld [vmem:[#allocation3 + $0xaa] sm:$0xff] }
 0x400   : > { %v7900_v39 = vpop.f32.mrb[73].mxu0 }
 0x401   : > { %4263 = vmatmul.mubr.f32.gmra.mrb[36].mxu1 %v7895_v31 }
 0x402   : > { %4267 = vmatprep.mubr.f32.mxu1 %v3013_v12  ;;  %5755 = vmatpush1.bf16.msra.mxu1 %v5754_v56  ;;  %v3669_v56 = vld [vmem:[%s6464_s17 + $0x390] sm:$0xff] }
 0x403   : > { %5756 = vmatprep.subr.bf16.mxu1 %v8501_v13  ;;  %v5775_v5 = vpack.c.bf16 %v3670_v53, %v3669_v56  ;;  %v3678_v56 = vld [vmem:[%s6464_s17 + $0x3d8] sm:$0xff] }
 0x404   : > { %v7975_v53 = vld [vmem:[#allocation3 + $0xa9] sm:$0xff] }
 0x405   : > { %4268 = vmatmul.mubr.f32.gmra.mrb[38].mxu1 %v7905_v44 }
 0x406   : > { %4272 = vmatprep.mubr.f32.mxu1 %v3014_v52  ;;  %5758 = vmatpush1.bf16.msra.mxu1 %v5757_v48  ;;  %v3019_v48 = vld [vmem:[#allocation3 + $0x82] sm:$0xff]  ;;  %v3671_v52 = vld [vmem:[%s6464_s17 + $0x3a0] sm:$0xff] }
 0x407   : > { %5759 = vmatprep.subr.bf16.mxu1 %v8501_v13  ;;  %v7913_v55 = vpop.f32.mrb[74].mxu0 }
 0x408   : > { %v7916_v43 = vpop.f32.mrb[75].mxu0 }
 0x409   : > { %4273 = vmatmul.mubr.f32.gmra.mrb[40].mxu1 %v7911_v24 }
 0x40a   : > { %4277 = vmatprep.mubr.f32.mxu1 %v3015_v49  ;;  %5761 = vmatpush1.bf16.msra.mxu1 %v5760_v50  ;;  %v3672_v50 = vld [vmem:[%s6464_s17 + $0x3a8] sm:$0xff] }
 0x40b   : > { %5762 = vmatprep.subr.bf16.mxu1 %v8501_v13  ;;  %v5778_v49 = vpack.c.bf16 %v3672_v50, %v3671_v52 }
 0x40d   : > { %4278 = vmatmul.mubr.f32.gmra.mrb[42].mxu1 %v7921_v21 }
 0x40e   : > { %4282 = vmatprep.mubr.f32.mxu1 %v3016_v45  ;;  %5764 = vmatpush1.bf16.msra.mxu1 %v5763_v61  ;;  %v3673_v61 = vld [vmem:[%s6464_s17 + $0x3b0] sm:$0xff] }
 0x40f   : > { %5765 = vmatprep.subr.bf16.mxu1 %v8501_v13  ;;  %v7929_v6 = vpop.f32.mrb[76].mxu0  ;;  %v5781_v57 = vpack.c.bf16 %v3674_v41, %v3673_v61  ;;  %v7985_v61 = vld [vmem:[#allocation3 + $0xb1] sm:$0xff]  ;;  %v3024_v41 = vld [vmem:[#allocation3 + $0xc2] sm:$0xff] }
 0x410   : > { %v7932_v62 = vpop.f32.mrb[77].mxu0 }
 0x411   : > { %4283 = vmatmul.mubr.f32.gmra.mrb[44].mxu1 %v7927_v15 }
 0x412   : > { %4287 = vmatprep.mubr.f32.mxu1 %v3017_v19  ;;  %5767 = vmatpush1.bf16.msra.mxu1 %v5766_v51  ;;  %v3021_v51 = vld [vmem:[#allocation3 + $0x9a] sm:$0xff]  ;;  %v3675_v19 = vld [vmem:[%s6464_s17 + $0x3c0] sm:$0xff] }
 0x413   : > { %5768 = vmatprep.subr.bf16.mxu1 %v8501_v13 }
 0x415   : > { %4288 = vmatmul.mubr.f32.gmra.mrb[46].mxu1 %v7937_v17 }
 0x416   : > { %4292 = vmatprep.mubr.f32.mxu1 %v3018_v25  ;;  %5770 = vmatpush1.bf16.msra.mxu1 %v5769_v4  ;;  %v3676_v4 = vld [vmem:[%s6464_s17 + $0x3c8] sm:$0xff] }
 0x417   : > { %5771 = vmatprep.subr.bf16.mxu1 %v8501_v13  ;;  %v7945_v12 = vpop.f32.mrb[78].mxu0  ;;  %v5784_v25 = vpack.c.bf16 %v3676_v4, %v3675_v19  ;;  %v3682_v19 = vld [vmem:[%s6464_s17 + $0x3f8] sm:$0xff] }
 0x418   : > { %v7948_v7 = vpop.f32.mrb[79].mxu0  ;;  %v7991_v4 = vld [vmem:[#allocation3 + $0xc1] sm:$0xff] }
 0x419   : > { %4293 = vmatmul.mubr.f32.gmra.mrb[48].mxu1 %v7943_v60 }
 0x41a   : > { %4297 = vmatprep.mubr.f32.mxu1 %v3019_v48  ;;  %5773 = vmatpush1.bf16.msra.mxu1 %v5772_v14  ;;  %v3677_v14 = vld [vmem:[%s6464_s17 + $0x3d0] sm:$0xff] }
 0x41b   : > { %5774 = vmatprep.subr.bf16.mxu1 %v8501_v13  ;;  %v5787_v50 = vpack.c.bf16 %v3678_v56, %v3677_v14 }
 0x41d   : > { %4298 = vmatmul.mubr.f32.gmra.mrb[50].mxu1 %v7953_v35 }
 0x41e   : > { %4302 = vmatprep.mubr.f32.mxu1 %v3020_v26  ;;  %5776 = vmatpush1.bf16.msra.mxu1 %v5775_v5  ;;  %v3023_v5 = vld [vmem:[#allocation3 + $0xb2] sm:$0xff] }
 0x41f   : > { %5777 = vmatprep.subr.bf16.mxu1 %v8501_v13  ;;  %v7961_v45 = vpop.f32.mrb[80].mxu0  ;;  %v3679_v26 = vld [vmem:[%s6464_s17 + $0x3e0] sm:$0xff] }
 0x420   : > { %v7964_v58 = vpop.f32.mrb[81].mxu0 }
 0x421   : > { %4303 = vmatmul.mubr.f32.gmra.mrb[52].mxu1 %v7959_v29 }
 0x422   : > { %4307 = vmatprep.mubr.f32.mxu1 %v3021_v51  ;;  %5779 = vmatpush1.bf16.msra.mxu1 %v5778_v49  ;;  %v3680_v49 = vld [vmem:[%s6464_s17 + $0x3e8] sm:$0xff] }
 0x423   : > { %5780 = vmatprep.subr.bf16.mxu1 %v8501_v13  ;;  %v5790_v51 = vpack.c.bf16 %v3680_v49, %v3679_v26  ;;  %v8004_v26 = vld [vmem:[#allocation3 + $0xd9] sm:$0xff] }
 0x425   : > { %4308 = vmatmul.mubr.f32.gmra.mrb[54].mxu1 %v7969_v47 }
 0x426   : > { %4312 = vmatprep.mubr.f32.mxu1 %v3022_v8  ;;  %5782 = vmatpush1.bf16.msra.mxu1 %v5781_v57  ;;  %v3681_v57 = vld [vmem:[%s6464_s17 + $0x3f0] sm:$0xff] }
 0x427   : > { %5783 = vmatprep.subr.bf16.mxu1 %v8501_v13  ;;  %v7977_v48 = vpop.f32.mrb[82].mxu0  ;;  %v5793_v56 = vpack.c.bf16 %v3682_v19, %v3681_v57  ;;  %v8024_v57 = vld [vmem:[#allocation3 + $0x109] sm:$0xff] }
 0x428   : > { %v7980_v52 = vpop.f32.mrb[83].mxu0 }
 0x429   : > { %4313 = vmatmul.mubr.f32.gmra.mrb[56].mxu1 %v7975_v53 }
 0x42a   : > { %4317 = vmatprep.mubr.f32.mxu1 %v3023_v5  ;;  %5785 = vmatpush1.bf16.msra.mxu1 %v5784_v25  ;;  %v3025_v25 = vld [vmem:[#allocation3 + $0xca] sm:$0xff] }
 0x42b   : > { %5786 = vmatprep.subr.bf16.mxu1 %v8501_v13  ;;  %v7999_v5 = vld [vmem:[#allocation3 + $0xc9] sm:$0xff] }
 0x42d   : > { %4318 = vmatmul.mubr.f32.gmra.mrb[58].mxu1 %v7985_v61 }
 0x42e   : > { %4322 = vmatprep.mubr.f32.mxu1 %v3024_v41  ;;  %5788 = vmatpush1.bf16.msra.mxu1 %v5787_v50  ;;  %v8530_v50 = vld [vmem:[#allocation6_spill] sm:$0xff] }
 0x42f   : > { %5789 = vmatprep.subr.bf16.mxu1 %v8501_v13  ;;  %v7993_v8 = vpop.f32.mrb[84].mxu0 }
 0x430   : > { %v7996_v14 = vpop.f32.mrb[85].mxu0 }
 0x431   : > { %4323 = vmatmul.mubr.f32.gmra.mrb[60].mxu1 %v7991_v4 }
 0x432   : > { %4327 = vmatprep.mubr.f32.mxu1 %v3025_v25  ;;  %5791 = vmatpush1.bf16.msra.mxu1 %v5790_v51  ;;  %v8020_v51 = vld [vmem:[#allocation3 + $0xf9] sm:$0xff]  ;;  %v8056_v25 = vld [vmem:[#allocation3 + $0x18a] sm:$0xff] }
 0x433   : > { %5792 = vmatprep.subr.bf16.mxu1 %v8501_v13  ;;  %v8012_v13 = vld [vmem:[#allocation3 + $0xe1] sm:$0xff] }
 0x435   : > { %4328 = vmatmul.mubr.f32.gmra.mrb[62].mxu1 %v7999_v5 }
 0x436   : > { %4332 = vmatprep.mubr.f32.mxu1 %v7615_v22  ;;  %5794 = vmatpush1.bf16.msra.mxu1 %v5793_v56  ;;  %v8016_v22 = vld [vmem:[#allocation3 + $0xf1] sm:$0xff] }
 0x437   : > { %5827 = vmatprep.subr.bf16.mxu1 %v8530_v50 }
 0x438   : > { %v8006_v49 = vpop.f32.mrb[86].mxu0 }
 0x439   : > { %4333 = vmatmul.mubr.f32.gmra.mrb[64].mxu1 %v8004_v26  ;;  %v8009_v41 = vpop.f32.mrb[87].mxu0 }
 0x43a   : > { %4337 = vmatprep.mubr.f32.mxu1 %v7619_v54  ;;  %v8028_v54 = vld [vmem:[#allocation3 + $0x111] sm:$0xff] }
 0x43d   : > { %4338 = vmatmul.mubr.f32.gmra.mrb[66].mxu1 %v8012_v13 }
 0x43e   : > { %4342 = vmatprep.mubr.f32.mxu1 %v7631_v0  ;;  %v8032_v0 = vld [vmem:[#allocation3 + $0x121] sm:$0xff] }
 0x441   : > { %4343 = vmatmul.mubr.f32.gmra.mrb[68].mxu1 %v8016_v22 }
 0x442   : > { %4347 = vmatprep.mubr.f32.mxu1 %v7635_v59  ;;  %v8036_v59 = vld [vmem:[#allocation3 + $0x129] sm:$0xff] }
 0x445   : > { %4348 = vmatmul.mubr.f32.gmra.mrb[70].mxu1 %v8020_v51 }
 0x446   : > { %4352 = vmatprep.mubr.f32.mxu1 %v7647_v28  ;;  %v8531_v28 = vld [vmem:[#allocation14_spill] sm:$0xff] }
 0x449   : > { %4353 = vmatmul.mubr.f32.gmra.mrb[72].mxu1 %v8024_v57 }
 0x44a   : > { %4357 = vmatprep.mubr.f32.mxu1 %v7651_v37  ;;  %v8532_v37 = vld [vmem:[#allocation15_spill] sm:$0xff] }
 0x44d   : > { %4358 = vmatmul.mubr.f32.gmra.mrb[74].mxu1 %v8028_v54 }
 0x44e   : > { %4362 = vmatprep.mubr.f32.mxu1 %v7668_v9  ;;  %v8533_v9 = vld [vmem:[#allocation17_spill] sm:$0xff] }
 0x451   : > { %4363 = vmatmul.mubr.f32.gmra.mrb[76].mxu1 %v8032_v0 }
 0x452   : > { %4367 = vmatprep.mubr.f32.mxu1 %v8527_v18  ;;  %v8534_v18 = vld [vmem:[#allocation20_spill] sm:$0xff] }
 0x455   : > { %4368 = vmatmul.mubr.f32.gmra.mrb[78].mxu1 %v8036_v59 }
 0x456   : > { %4372 = vmatprep.mubr.f32.mxu1 %v8528_v3  ;;  %v8051_v3 = vld [vmem:[#allocation3 + $0x182] sm:$0xff] }
 0x459   : > { %4373 = vmatmul.mubr.f32.gmra.mrb[80].mxu1 %v8531_v28  ;;  %v8539_v28 = vld [vmem:[#allocation7_spill] sm:$0xff] }
 0x45a   : > { %4377 = vmatprep.mubr.f32.mxu1 %v8529_v23  ;;  %v8535_v23 = vld [vmem:[#allocation21_spill] sm:$0xff] }
 0x45b   : > { %v8536_v19 = vmax.f32 %v8535_v23, 0.0  ;;  %v8543_v23 = vld [vmem:[#allocation11_spill] sm:$0xff] }
 0x45d   : > { %4378 = vmatmul.mubr.f32.gmra.mrb[82].mxu1 %v8532_v37  ;;  %v3076_v37 = vld [vmem:[#allocation3 + $0x38] sm:$0xff] }
 0x45e   : > { %4382 = vmatprep.mubr.f32.mxu1 %v7852_v36 }
 0x461   : > { %4383 = vmatmul.mubr.f32.gmra.mrb[84].mxu1 %v8533_v9  ;;  %v8540_v9 = vld [vmem:[#allocation8_spill] sm:$0xff] }
 0x462   : > { %4387 = vmatprep.mubr.f32.mxu1 %v7860_v38 }
 0x465   : > { %4388 = vmatmul.mubr.f32.gmra.mrb[86].mxu1 %v7689_v63  ;;  %v8537_v63 = vld [vmem:[#allocation22_spill] sm:$0xff] }
 0x466   : > { %4392 = vmatprep.mubr.f32.mxu1 %v7866_v11  ;;  %v8538_v56 = vmax.f32 %v8537_v63, 0.0  ;;  %v8545_v63 = vld [vmem:[#allocation13_spill] sm:$0xff] }
 0x469   : > { %4393 = vmatmul.mubr.f32.gmra.mrb[88].mxu1 %v7704_v16  ;;  %v3075_v16 = vld [vmem:[#allocation3 + $0x30] sm:$0xff] }
 0x46a   : > { %4397 = vmatprep.mubr.f32.mxu1 %v7878_v10 }
 0x46d   : > { %4398 = vmatmul.mubr.f32.gmra.mrb[90].mxu1 %v8534_v18  ;;  %v3077_v18 = vld [vmem:[#allocation3 + $0x48] sm:$0xff] }
 0x46e   : > { %4402 = vmatprep.mubr.f32.mxu1 %v8051_v3 }
 0x471   : > { %4403 = vmatmul.mubr.f32.gmra.mrb[92].mxu1 %v8536_v19  ;;  %v8544_v19 = vld [vmem:[#allocation12_spill] sm:$0xff] }
 0x472   : > { %4407 = vmatprep.mubr.f32.mxu1 %v8056_v25 }
 0x475   : > { %4408 = vmatmul.mubr.f32.gmra.mrb[94].mxu1 %v8538_v56  ;;  %v3083_v56 = vld [vmem:[#allocation3 + $0x90] sm:$0xff] }
 0x476   : > { %4477 = vmatprep.mubr.f32.mxu1 %v7895_v31  ;;  %v8541_v31 = vld [vmem:[#allocation9_spill] sm:$0xff] }
 0x479   : > { %4478 = vmatmul.mubr.f32.vlgmr.msra.gmra.mrb[32].mxu1 %v3075_v16  ;;  %v3085_v16 = vld [vmem:[#allocation3 + $0xa8] sm:$0xff] }
 0x47a   : > { %4482 = vmatprep.mubr.f32.mxu1 %v7905_v44  ;;  %5835 = vmatpush3.bf16.msra.mxu1 %v8530_v50  ;;  %v3078_v44 = vld [vmem:[#allocation3 + $0x50] sm:$0xff] }
 0x47b   : > { %5828 = vmatprep.subr.bf16.mxu1 %v8539_v28  ;;  %v8542_v50 = vld [vmem:[#allocation10_spill] sm:$0xff] }
 0x47d   : > { %4483 = vmatmul.mubr.f32.gmra.mrb[34].mxu1 %v3076_v37  ;;  %v3161_v37 = vld [vmem:[#allocation3 + $0x139] sm:$0xff] }
 0x47e   : > { %4487 = vmatprep.mubr.f32.mxu1 %v7911_v24  ;;  %5836 = vmatpush3.bf16.msra.mxu1 %v8539_v28  ;;  %v3079_v24 = vld [vmem:[#allocation3 + $0x60] sm:$0xff] }
 0x47f   : > { %5829 = vmatprep.subr.bf16.mxu1 %v8540_v9  ;;  %v3087_v28 = vld [vmem:[#allocation3 + $0xc0] sm:$0xff] }
 0x481   : > { %4488 = vmatmul.mubr.f32.gmra.mrb[36].mxu1 %v3077_v18  ;;  %v3163_v18 = vld [vmem:[#allocation3 + $0x151] sm:$0xff] }
 0x482   : > { %4492 = vmatprep.mubr.f32.mxu1 %v7921_v21  ;;  %5837 = vmatpush3.bf16.msra.mxu1 %v8540_v9  ;;  %v3080_v21 = vld [vmem:[#allocation3 + $0x68] sm:$0xff] }
 0x483   : > { %5830 = vmatprep.subr.bf16.mxu1 %v8541_v31  ;;  %v3162_v9 = vld [vmem:[#allocation3 + $0x141] sm:$0xff] }
 0x485   : > { %4493 = vmatmul.mubr.f32.gmra.mrb[38].mxu1 %v3078_v44  ;;  %v3165_v44 = vld [vmem:[#allocation3 + $0x169] sm:$0xff] }
 0x486   : > { %4497 = vmatprep.mubr.f32.mxu1 %v7927_v15  ;;  %5838 = vmatpush3.bf16.msra.mxu1 %v8541_v31  ;;  %v3081_v15 = vld [vmem:[#allocation3 + $0x78] sm:$0xff] }
 0x487   : > { %5831 = vmatprep.subr.bf16.mxu1 %v8542_v50  ;;  %v3164_v31 = vld [vmem:[#allocation3 + $0x159] sm:$0xff] }
 0x489   : > { %4498 = vmatmul.mubr.f32.gmra.mrb[40].mxu1 %v3079_v24  ;;  %v3102_v24 = vld [vmem:[#allocation3 + $0x170] sm:$0xff] }
 0x48a   : > { %4502 = vmatprep.mubr.f32.mxu1 %v7937_v17  ;;  %5839 = vmatpush3.bf16.msra.mxu1 %v8542_v50  ;;  %v3082_v17 = vld [vmem:[#allocation3 + $0x80] sm:$0xff]  ;;  %v3166_v50 = vld [vmem:[#allocation3 + $0x171] sm:$0xff] }
 0x48b   : > { %5832 = vmatprep.subr.bf16.mxu1 %v8543_v23 }
 0x48d   : > { %4503 = vmatmul.mubr.f32.gmra.mrb[42].mxu1 %v3080_v21  ;;  %v3168_v21 = vld [vmem:[#allocation3 + $0x189] sm:$0xff] }
 0x48e   : > { %4507 = vmatprep.mubr.f32.mxu1 %v7943_v60  ;;  %5840 = vmatpush3.bf16.msra.mxu1 %v8543_v23  ;;  %v3084_v60 = vld [vmem:[#allocation3 + $0x98] sm:$0xff]  ;;  %v3167_v23 = vld [vmem:[#allocation3 + $0x181] sm:$0xff] }
 0x48f   : > { %5833 = vmatprep.subr.bf16.mxu1 %v8544_v19 }
 0x491   : > { %4508 = vmatmul.mubr.f32.gmra.mrb[44].mxu1 %v3081_v15  ;;  %v3105_v15 = vld [vmem:[#allocation3 + $0x198] sm:$0xff] }
 0x492   : > { %4512 = vmatprep.mubr.f32.mxu1 %v7953_v35  ;;  %5841 = vmatpush3.bf16.msra.mxu1 %v8544_v19  ;;  %v3086_v35 = vld [vmem:[#allocation3 + $0xb0] sm:$0xff]  ;;  %v3169_v19 = vld [vmem:[#allocation3 + $0x199] sm:$0xff] }
 0x493   : > { %5834 = vmatprep.subr.bf16.mxu1 %v8545_v63 }
 0x495   : > { %4513 = vmatmul.mubr.f32.gmra.mrb[46].mxu1 %v3082_v17  ;;  %v3106_v17 = vld [vmem:[#allocation3 + $0x1a0] sm:$0xff] }
 0x496   : > { %4517 = vmatprep.mubr.f32.mxu1 %v7959_v29  ;;  %5842 = vmatpush3.bf16.msra.mxu1 %v8545_v63  ;;  %v3088_v29 = vld [vmem:[#allocation3 + $0xc8] sm:$0xff] }
 0x497   : > { %v3170_v63 = vld [vmem:[#allocation3 + $0x1a1] sm:$0xff] }
 0x499   : > { %4518 = vmatmul.mubr.f32.gmra.mrb[48].mxu1 %v3083_v56  ;;  %v8111_v56 = vld [vmem:[%s299_s11] ss:$0 sm:$0xff] }
 0x49a   : > { %4522 = vmatprep.mubr.f32.mxu1 %v7969_v47  ;;  %v3089_v47 = vld [vmem:[#allocation3 + $0xd8] sm:$0xff] }
 0x49d   : > { %4523 = vmatmul.mubr.f32.gmra.mrb[50].mxu1 %v3084_v60  ;;  %v3699_v60 = vld [vmem:[#allocation2 + $0x19] sm:$0xff] }
 0x49e   : > { %4527 = vmatprep.mubr.f32.mxu1 %v7975_v53  ;;  %v3090_v53 = vld [vmem:[#allocation3 + $0xe0] sm:$0xff] }
 0x4a1   : > { %4528 = vmatmul.mubr.f32.gmra.mrb[52].mxu1 %v3085_v16 }
 0x4a2   : > { %4532 = vmatprep.mubr.f32.mxu1 %v7985_v61  ;;  %v3091_v61 = vld [vmem:[#allocation3 + $0xf0] sm:$0xff] }
 0x4a5   : > { %4533 = vmatmul.mubr.f32.gmra.mrb[54].mxu1 %v3086_v35 }
 0x4a6   : > { %4537 = vmatprep.mubr.f32.mxu1 %v7991_v4  ;;  %v3092_v4 = vld [vmem:[#allocation3 + $0xf8] sm:$0xff] }
 0x4a9   : > { %4538 = vmatmul.mubr.f32.gmra.mrb[56].mxu1 %v3087_v28  ;;  %v3700_v28 = vld [vmem:[#allocation2 + $0x21] sm:$0xff] }
 0x4aa   : > { %4542 = vmatprep.mubr.f32.mxu1 %v7999_v5  ;;  %v3093_v5 = vld [vmem:[#allocation3 + $0x108] sm:$0xff] }
 0x4ad   : > { %4543 = vmatmul.mubr.f32.gmra.mrb[58].mxu1 %v3088_v29 }
 0x4ae   : > { %4547 = vmatprep.mubr.f32.mxu1 %v8004_v26  ;;  %v3094_v26 = vld [vmem:[#allocation3 + $0x110] sm:$0xff] }
 0x4b1   : > { %4548 = vmatmul.mubr.f32.gmra.mrb[60].mxu1 %v3089_v47 }
 0x4b2   : > { %4552 = vmatprep.mubr.f32.mxu1 %v8012_v13  ;;  %v3095_v13 = vld [vmem:[#allocation3 + $0x120] sm:$0xff] }
 0x4b5   : > { %4553 = vmatmul.mubr.f32.gmra.mrb[62].mxu1 %v3090_v53 }
 0x4b6   : > { %4557 = vmatprep.mubr.f32.mxu1 %v8016_v22  ;;  %v3096_v22 = vld [vmem:[#allocation3 + $0x128] sm:$0xff] }
 0x4b9   : > { %4558 = vmatmul.mubr.f32.gmra.mrb[64].mxu1 %v3091_v61 }
 0x4ba   : > { %4562 = vmatprep.mubr.f32.mxu1 %v8020_v51  ;;  %v3097_v51 = vld [vmem:[#allocation3 + $0x138] sm:$0xff] }
 0x4bd   : > { %4563 = vmatmul.mubr.f32.gmra.mrb[66].mxu1 %v3092_v4 }
 0x4be   : > { %4567 = vmatprep.mubr.f32.mxu1 %v8024_v57  ;;  %v3098_v57 = vld [vmem:[#allocation3 + $0x140] sm:$0xff] }
 0x4c1   : > { %4568 = vmatmul.mubr.f32.gmra.mrb[68].mxu1 %v3093_v5  ;;  %v3701_v5 = vld [vmem:[#allocation2 + $0x31] sm:$0xff] }
 0x4c2   : > { %4572 = vmatprep.mubr.f32.mxu1 %v8028_v54  ;;  %v3099_v54 = vld [vmem:[#allocation3 + $0x150] sm:$0xff] }
 0x4c5   : > { %4573 = vmatmul.mubr.f32.gmra.mrb[70].mxu1 %v3094_v26 }
 0x4c6   : > { %4577 = vmatprep.mubr.f32.mxu1 %v8032_v0  ;;  %v3100_v0 = vld [vmem:[#allocation3 + $0x158] sm:$0xff] }
 0x4c9   : > { %4578 = vmatmul.mubr.f32.gmra.mrb[72].mxu1 %v3095_v13 }
 0x4ca   : > { %4582 = vmatprep.mubr.f32.mxu1 %v8036_v59  ;;  %v3101_v59 = vld [vmem:[#allocation3 + $0x168] sm:$0xff] }
 0x4cd   : > { %4583 = vmatmul.mubr.f32.gmra.mrb[74].mxu1 %v3096_v22 }
 0x4ce   : > { %4587 = vmatprep.mubr.f32.mxu1 %v3161_v37 }
 0x4d1   : > { %4588 = vmatmul.mubr.f32.gmra.mrb[76].mxu1 %v3097_v51 }
 0x4d2   : > { %4592 = vmatprep.mubr.f32.mxu1 %v3162_v9  ;;  %v3702_v9 = vld [vmem:[#allocation2 + $0x39] sm:$0xff] }
 0x4d5   : > { %4593 = vmatmul.mubr.f32.gmra.mrb[78].mxu1 %v3098_v57 }
 0x4d6   : > { %4597 = vmatprep.mubr.f32.mxu1 %v3163_v18 }
 0x4d9   : > { %4598 = vmatmul.mubr.f32.gmra.mrb[80].mxu1 %v3099_v54 }
 0x4da   : > { %4602 = vmatprep.mubr.f32.mxu1 %v3164_v31 }
 0x4dd   : > { %4603 = vmatmul.mubr.f32.gmra.mrb[82].mxu1 %v3100_v0 }
 0x4de   : > { %4607 = vmatprep.mubr.f32.mxu1 %v3165_v44  ;;  %v3703_v44 = vld [vmem:[#allocation2 + $0x49] sm:$0xff] }
 0x4e1   : > { %4608 = vmatmul.mubr.f32.gmra.mrb[84].mxu1 %v3101_v59 }
 0x4e2   : > { %4612 = vmatprep.mubr.f32.mxu1 %v3166_v50 }
 0x4e5   : > { %4613 = vmatmul.mubr.f32.gmra.mrb[86].mxu1 %v3102_v24 }
 0x4e6   : > { %4617 = vmatprep.mubr.f32.mxu1 %v3167_v23 }
 0x4e9   : > { %4618 = vmatmul.mubr.f32.gmra.mrb[88].mxu1 %v7863_v42  ;;  %v3233_v42 = vld [vmem:[#allocation3 + $0x19a] sm:$0xff] }
 0x4ea   : > { %4622 = vmatprep.mubr.f32.mxu1 %v3168_v21 }
 0x4ed   : > { %4623 = vmatmul.mubr.f32.gmra.mrb[90].mxu1 %v7871_v27  ;;  %v3234_v27 = vld [vmem:[#allocation3 + $0x1a2] sm:$0xff] }
 0x4ee   : > { %4627 = vmatprep.mubr.f32.mxu1 %v3169_v19  ;;  %v3704_v19 = vld [vmem:[#allocation2 + $0x51] sm:$0xff] }
 0x4f1   : > { %4628 = vmatmul.mubr.f32.gmra.mrb[92].mxu1 %v3105_v15 }
 0x4f2   : > { %4632 = vmatprep.mubr.f32.mxu1 %v3170_v63 }
 0x4f5   : > { %4633 = vmatmul.mubr.f32.gmra.mrb[94].mxu1 %v3106_v17 }
 0x4f6   : > { %5367 = vmatprep.mubr.f32.mxu1 %v7852_v36 }
 0x4f9   : > { %5368 = vmatmul.mubr.f32.vlgmr.msra.gmra.mrb[96].mxu1 %v7860_v38 }
 0x4fa   : > { %5370 = vmatprep.mubr.f32.mxu1 %v7866_v11 }
 0x4fd   : > { %5371 = vmatmul.mubr.f32.gmra.mrb[98].mxu1 %v7878_v10 }
 0x4fe   : > { %5373 = vmatprep.mubr.f32.mxu1 %v8051_v3 }
 0x501   : > { %5374 = vmatmul.mubr.f32.gmra.mrb[100].mxu1 %v8056_v25 }
 0x502   : > { %5376 = vmatprep.mubr.f32.mxu1 %v3233_v42 }
 0x505   : > { %5377 = vmatmul.mubr.f32.gmra.mrb[102].mxu1 %v3234_v27 }
 0x54c   : > { %v4479_v36 = vpop.f32.mrb[32].mxu1 }
 0x54d   : > { %v5875_v38 = vadd.f32 %v8111_v56, %v4479_v36  ;;  %v4481_v11 = vpop.f32.mrb[33].mxu1  ;;  %v3705_v36 = vld [vmem:[#allocation2 + $0x61] sm:$0xff] }
 0x54f   : > { %v4705_v10 = vadd.f32 %v5875_v38, %v7847_v46 }
 0x550   : > { %v4484_v3 = vpop.f32.mrb[34].mxu1 }
 0x551   : > { %v8115_v16 = vadd.f32 %v4705_v10, %v3699_v60  ;;  %v5876_v25 = vadd.f32 %v8111_v56, %v4484_v3  ;;  %v4486_v35 = vpop.f32.mrb[35].mxu1 }
 0x553   : > { %v4895_v29 = vmax.f32 %v8115_v16, 0.0  ;;  %v4710_v47 = vadd.f32 %v5876_v25, %v7844_v40  ;;  %v3706_v25 = vld [vmem:[#allocation2 + $0x69] sm:$0xff] }
 0x554   : > { %v4489_v53 = vpop.f32.mrb[36].mxu1 }
 0x555   : > { %4927 = vst [vmem:[#allocation2 + $0x19] sm:$0xff] %v4895_v29  ;;  %v8122_v61 = vadd.f32 %v4710_v47, %v3700_v28  ;;  %v5877_v4 = vadd.f32 %v8111_v56, %v4489_v53  ;;  %v4491_v46 = vpop.f32.mrb[37].mxu1  ;;  %4964 = vst.msk [vmem:[%s6469_s28] sm:$0xff] (!%p5118_p8), %vm4963_vm1, %v4895_v29 }
 0x556   : > { %v3707_v46 = vld [vmem:[#allocation2 + $0x79] sm:$0xff] }
 0x557   : > { %v4896_v26 = vmax.f32 %v8122_v61, 0.0  ;;  %v4715_v13 = vadd.f32 %v5877_v4, %v7857_v30 }
 0x558   : > { %v4494_v22 = vpop.f32.mrb[38].mxu1 }
 0x559   : > { %4928 = vst [vmem:[#allocation2 + $0x21] sm:$0xff] %v4896_v26  ;;  %v8129_v37 = vadd.f32 %v4715_v13, %v3701_v5  ;;  %v5878_v40 = vadd.f32 %v8111_v56, %v4494_v22  ;;  %v4496_v51 = vpop.f32.mrb[39].mxu1  ;;  %4965 = vst.msk [vmem:[%s6469_s28 + $0x8] sm:$0xff] (!%p5118_p8), %vm4963_vm1, %v4896_v26 }
 0x55b   : > { %v4897_v57 = vmax.f32 %v8129_v37, 0.0  ;;  %v4720_v18 = vadd.f32 %v5878_v40, %v7854_v32 }
 0x55c   : > { %v4499_v54 = vpop.f32.mrb[40].mxu1 }
 0x55d   : > { %4929 = vst [vmem:[#allocation2 + $0x31] sm:$0xff] %v4897_v57  ;;  %v8136_v31 = vadd.f32 %v4720_v18, %v3702_v9  ;;  %v5879_v30 = vadd.f32 %v8111_v56, %v4499_v54  ;;  %v4501_v0 = vpop.f32.mrb[41].mxu1  ;;  %v3708_v9 = vld [vmem:[#allocation2 + $0x81] sm:$0xff]  ;;  %4966 = vst.msk [vmem:[%s6469_s28 + $0x10] sm:$0xff] (!%p5118_p8), %vm4963_vm1, %v4897_v57 }
 0x55f   : > { %v4898_v59 = vmax.f32 %v8136_v31, 0.0  ;;  %v4725_v50 = vadd.f32 %v5879_v30, %v7873_v33 }
 0x560   : > { %v4504_v24 = vpop.f32.mrb[42].mxu1 }
 0x561   : > { %4930 = vst [vmem:[#allocation2 + $0x39] sm:$0xff] %v4898_v59  ;;  %v8143_v23 = vadd.f32 %v4725_v50, %v3703_v44  ;;  %v5880_v32 = vadd.f32 %v8111_v56, %v4504_v24  ;;  %v4506_v21 = vpop.f32.mrb[43].mxu1  ;;  %v3709_v50 = vld [vmem:[#allocation2 + $0x91] sm:$0xff]  ;;  %4967 = vst.msk [vmem:[%s6469_s28 + $0x18] sm:$0xff] (!%p5118_p8), %vm4963_vm1, %v4898_v59 }
 0x563   : > { %v4899_v15 = vmax.f32 %v8143_v23, 0.0  ;;  %v4730_v63 = vadd.f32 %v5880_v32, %v7868_v1 }
 0x564   : > { %v4509_v17 = vpop.f32.mrb[44].mxu1 }
 0x565   : > { %4931 = vst [vmem:[#allocation2 + $0x49] sm:$0xff] %v4899_v15  ;;  %v8150_v42 = vadd.f32 %v4730_v63, %v3704_v19  ;;  %v5881_v33 = vadd.f32 %v8111_v56, %v4509_v17  ;;  %v4511_v27 = vpop.f32.mrb[45].mxu1  ;;  %v3710_v17 = vld [vmem:[#allocation2 + $0x99] sm:$0xff]  ;;  %4968 = vst.msk [vmem:[%s6469_s28 + $0x20] sm:$0xff] (!%p5118_p8), %vm4963_vm1, %v4899_v15 }
 0x567   : > { %v4900_v38 = vmax.f32 %v8150_v42, 0.0  ;;  %v4735_v11 = vadd.f32 %v5881_v33, %v7886_v2 }
 0x568   : > { %v4514_v60 = vpop.f32.mrb[46].mxu1 }
 0x569   : > { %4932 = vst [vmem:[#allocation2 + $0x51] sm:$0xff] %v4900_v38  ;;  %v8157_v10 = vadd.f32 %v4735_v11, %v3705_v36  ;;  %v5882_v1 = vadd.f32 %v8111_v56, %v4514_v60  ;;  %v4516_v3 = vpop.f32.mrb[47].mxu1  ;;  %4969 = vst.msk [vmem:[%s6469_s28 + $0x28] sm:$0xff] (!%p5118_p8), %vm4963_vm1, %v4900_v38 }
 0x56b   : > { %v4901_v35 = vmax.f32 %v8157_v10, 0.0  ;;  %v4740_v28 = vadd.f32 %v5882_v1, %v7884_v20  ;;  %v3711_v1 = vld [vmem:[#allocation2 + $0xa9] sm:$0xff] }
 0x56c   : > { %v4519_v47 = vpop.f32.mrb[48].mxu1 }
 0x56d   : > { %4933 = vst [vmem:[#allocation2 + $0x61] sm:$0xff] %v4901_v35  ;;  %v8164_v53 = vadd.f32 %v4740_v28, %v3706_v25  ;;  %v5883_v2 = vadd.f32 %v8111_v56, %v4519_v47  ;;  %v4521_v4 = vpop.f32.mrb[49].mxu1  ;;  %4970 = vst.msk [vmem:[%s6469_s28 + $0x30] sm:$0xff] (!%p5118_p8), %vm4963_vm1, %v4901_v35 }
 0x56e   : > { %v3712_v4 = vld [vmem:[#allocation2 + $0xb1] sm:$0xff] }
 0x56f   : > { %v4902_v5 = vmax.f32 %v8164_v53, 0.0  ;;  %v4745_v13 = vadd.f32 %v5883_v2, %v7900_v39 }
 0x570   : > { %v4524_v22 = vpop.f32.mrb[50].mxu1 }
 0x571   : > { %4934 = vst [vmem:[#allocation2 + $0x69] sm:$0xff] %v4902_v5  ;;  %v8171_v40 = vadd.f32 %v4745_v13, %v3707_v46  ;;  %v5884_v20 = vadd.f32 %v8111_v56, %v4524_v22  ;;  %v4526_v51 = vpop.f32.mrb[51].mxu1  ;;  %4971 = vst.msk [vmem:[%s6469_s28 + $0x38] sm:$0xff] (!%p5118_p8), %vm4963_vm1, %v4902_v5 }
 0x573   : > { %v4903_v18 = vmax.f32 %v8171_v40, 0.0  ;;  %v4750_v54 = vadd.f32 %v5884_v20, %v7897_v34 }
 0x574   : > { %v4529_v30 = vpop.f32.mrb[52].mxu1 }
 0x575   : > { %4935 = vst [vmem:[#allocation2 + $0x79] sm:$0xff] %v4903_v18  ;;  %v8178_v0 = vadd.f32 %v4750_v54, %v3708_v9  ;;  %v5885_v39 = vadd.f32 %v8111_v56, %v4529_v30  ;;  %v4531_v44 = vpop.f32.mrb[53].mxu1  ;;  %v3713_v9 = vld [vmem:[#allocation2 + $0xc1] sm:$0xff]  ;;  %4972 = vst.msk [vmem:[%s6469_s28 + $0x40] sm:$0xff] (!%p5118_p8), %vm4963_vm1, %v4903_v18 }
 0x577   : > { %v4904_v24 = vmax.f32 %v8178_v0, 0.0  ;;  %v4755_v32 = vadd.f32 %v5885_v39, %v7916_v43 }
 0x578   : > { %v4534_v21 = vpop.f32.mrb[54].mxu1 }
 0x579   : > { %4936 = vst [vmem:[#allocation2 + $0x81] sm:$0xff] %v4904_v24  ;;  %v8185_v19 = vadd.f32 %v4755_v32, %v3709_v50  ;;  %v5886_v34 = vadd.f32 %v8111_v56, %v4534_v21  ;;  %v4536_v63 = vpop.f32.mrb[55].mxu1  ;;  %v3714_v32 = vld [vmem:[#allocation2 + $0xc9] sm:$0xff]  ;;  %4973 = vst.msk [vmem:[%s6469_s28 + $0x48] sm:$0xff] (!%p5118_p8), %vm4963_vm1, %v4904_v24 }
 0x57b   : > { %v4905_v33 = vmax.f32 %v8185_v19, 0.0  ;;  %v4760_v27 = vadd.f32 %v5886_v34, %v7913_v55 }
 0x57c   : > { %v4539_v36 = vpop.f32.mrb[56].mxu1 }
 0x57d   : > { %4937 = vst [vmem:[#allocation2 + $0x91] sm:$0xff] %v4905_v33  ;;  %v8192_v11 = vadd.f32 %v4760_v27, %v3710_v17  ;;  %v5887_v43 = vadd.f32 %v8111_v56, %v4539_v36  ;;  %v4541_v60 = vpop.f32.mrb[57].mxu1  ;;  %v3715_v36 = vld [vmem:[#allocation2 + $0xd9] sm:$0xff]  ;;  %4974 = vst.msk [vmem:[%s6469_s28 + $0x50] sm:$0xff] (!%p5118_p8), %vm4963_vm1, %v4905_v33 }
 0x57f   : > { %v4906_v3 = vmax.f32 %v8192_v11, 0.0  ;;  %v4765_v25 = vadd.f32 %v5887_v43, %v7932_v62 }
 0x580   : > { %v4544_v28 = vpop.f32.mrb[58].mxu1 }
 0x581   : > { %4938 = vst [vmem:[#allocation2 + $0x99] sm:$0xff] %v4906_v3  ;;  %v8199_v47 = vadd.f32 %v4765_v25, %v3711_v1  ;;  %v5888_v55 = vadd.f32 %v8111_v56, %v4544_v28  ;;  %v4546_v2 = vpop.f32.mrb[59].mxu1  ;;  %4975 = vst.msk [vmem:[%s6469_s28 + $0x58] sm:$0xff] (!%p5118_p8), %vm4963_vm1, %v4906_v3 }
 0x583   : > { %v4907_v46 = vmax.f32 %v8199_v47, 0.0  ;;  %v4770_v13 = vadd.f32 %v5888_v55, %v7929_v6  ;;  %v3716_v55 = vld [vmem:[#allocation2 + $0xe1] sm:$0xff] }
 0x584   : > { %v4549_v22 = vpop.f32.mrb[60].mxu1 }
 0x585   : > { %4939 = vst [vmem:[#allocation2 + $0xa9] sm:$0xff] %v4907_v46  ;;  %v8206_v20 = vadd.f32 %v4770_v13, %v3712_v4  ;;  %v5889_v62 = vadd.f32 %v8111_v56, %v4549_v22  ;;  %v4551_v51 = vpop.f32.mrb[61].mxu1  ;;  %4976 = vst.msk [vmem:[%s6469_s28 + $0x60] sm:$0xff] (!%p5118_p8), %vm4963_vm1, %v4907_v46 }
 0x586   : > { %v3717_v51 = vld [vmem:[#allocation2 + $0xf1] sm:$0xff] }
 0x587   : > { %v8492_v54 = vmax.f32 %v8206_v20, 0.0  ;;  %v4775_v30 = vadd.f32 %v5889_v62, %v7948_v7 }
 0x588   : > { %v4554_v39 = vpop.f32.mrb[62].mxu1 }
 0x589   : > { %4940 = vst [vmem:[#allocation2 + $0xb1] sm:$0xff] %v8492_v54  ;;  %v8213_v44 = vadd.f32 %v4775_v30, %v3713_v9  ;;  %v5890_v6 = vadd.f32 %v8111_v56, %v4554_v39  ;;  %v4556_v50 = vpop.f32.mrb[63].mxu1 }
 0x58b   : > { %v8491_v21 = vmax.f32 %v8213_v44, 0.0  ;;  %v4780_v34 = vadd.f32 %v5890_v6, %v7945_v12  ;;  %v8547_v16 = vmax.f32 (!%p5118_p8), %v8213_v44, 0.0 }
 0x58c   : > { %v4559_v63 = vpop.f32.mrb[64].mxu1 }
 0x58d   : > { %4941 = vst [vmem:[#allocation2 + $0xc1] sm:$0xff] %v8491_v21  ;;  %v8220_v17 = vadd.f32 %v4780_v34, %v3714_v32  ;;  %v5891_v7 = vadd.f32 %v8111_v56, %v4559_v63  ;;  %v4561_v27 = vpop.f32.mrb[65].mxu1  ;;  %v3718_v32 = vld [vmem:[#allocation2 + $0xf9] sm:$0xff]  ;;  %v3729_v21 = vld [vmem:[#allocation2 + $0x181] sm:$0xff]  ;;  %4978 = vst.msk [vmem:[%s6469_s28 + $0x70] sm:$0xff] (!%p5118_p8), %vm4963_vm1, %v8547_v16 }
 0x58f   : > { %v8488_v43 = vmax.f32 %v8220_v17, 0.0  ;;  %v4785_v60 = vadd.f32 %v5891_v7, %v7964_v58  ;;  %v8548_v29 = vmax.f32 (!%p5118_p8), %v8220_v17, 0.0 }
 0x590   : > { %v4564_v1 = vpop.f32.mrb[66].mxu1 }
 0x591   : > { %4942 = vst [vmem:[#allocation2 + $0xc9] sm:$0xff] %v8488_v43  ;;  %v8227_v25 = vadd.f32 %v4785_v60, %v3715_v36  ;;  %v5892_v12 = vadd.f32 %v8111_v56, %v4564_v1  ;;  %v4566_v28 = vpop.f32.mrb[67].mxu1  ;;  %v3719_v60 = vld [vmem:[#allocation2 + $0x109] sm:$0xff]  ;;  %4979 = vst.msk [vmem:[%s6469_s28 + $0x78] sm:$0xff] (!%p5118_p8), %vm4963_vm1, %v8548_v29 }
 0x593   : > { %v8487_v2 = vmax.f32 %v8227_v25, 0.0  ;;  %v4790_v4 = vadd.f32 %v5892_v12, %v7961_v45  ;;  %v8549_v61 = vmax.f32 (!%p5118_p8), %v8227_v25, 0.0 }
 0x594   : > { %v4569_v13 = vpop.f32.mrb[68].mxu1 }
 0x595   : > { %4943 = vst [vmem:[#allocation2 + $0xd9] sm:$0xff] %v8487_v2  ;;  %v8234_v22 = vadd.f32 %v4790_v4, %v3716_v55  ;;  %v5893_v58 = vadd.f32 %v8111_v56, %v4569_v13  ;;  %v4571_v62 = vpop.f32.mrb[69].mxu1  ;;  %v3720_v13 = vld [vmem:[#allocation2 + $0x111] sm:$0xff]  ;;  %4980 = vst.msk [vmem:[%s6469_s28 + $0x80] sm:$0xff] (!%p5118_p8), %vm4963_vm1, %v8549_v61 }
 0x597   : > { %v8486_v9 = vmax.f32 %v8234_v22, 0.0  ;;  %v4795_v30 = vadd.f32 %v5893_v58, %v7980_v52  ;;  %v8550_v26 = vmax.f32 (!%p5118_p8), %v8234_v22, 0.0 }
 0x598   : > { %v4574_v39 = vpop.f32.mrb[70].mxu1 }
 0x599   : > { %4944 = vst [vmem:[#allocation2 + $0xe1] sm:$0xff] %v8486_v9  ;;  %v8241_v6 = vadd.f32 %v4795_v30, %v3717_v51  ;;  %v5894_v45 = vadd.f32 %v8111_v56, %v4574_v39  ;;  %v4576_v50 = vpop.f32.mrb[71].mxu1  ;;  %4981 = vst.msk [vmem:[%s6469_s28 + $0x88] sm:$0xff] (!%p5118_p8), %vm4963_vm1, %v8550_v26 }
 0x59b   : > { %v8485_v34 = vmax.f32 %v8241_v6, 0.0  ;;  %v4800_v63 = vadd.f32 %v5894_v45, %v7977_v48  ;;  %v3721_v45 = vld [vmem:[#allocation2 + $0x121] sm:$0xff]  ;;  %v8551_v37 = vmax.f32 (!%p5118_p8), %v8241_v6, 0.0 }
 0x59c   : > { %v4579_v7 = vpop.f32.mrb[72].mxu1 }
 0x59d   : > { %4945 = vst [vmem:[#allocation2 + $0xf1] sm:$0xff] %v8485_v34  ;;  %v8248_v27 = vadd.f32 %v4800_v63, %v3718_v32  ;;  %v5895_v52 = vadd.f32 %v8111_v56, %v4579_v7  ;;  %v4581_v36 = vpop.f32.mrb[73].mxu1  ;;  %4982 = vst.msk [vmem:[%s6469_s28 + $0x90] sm:$0xff] (!%p5118_p8), %vm4963_vm1, %v8551_v37 }
 0x59e   : > { %v3722_v36 = vld [vmem:[#allocation2 + $0x129] sm:$0xff] }
 0x59f   : > { %v8483_v1 = vmax.f32 %v8248_v27, 0.0  ;;  %v4805_v12 = vadd.f32 %v5895_v52, %v7996_v14  ;;  %v8552_v57 = vmax.f32 (!%p5118_p8), %v8248_v27, 0.0 }
 0x5a0   : > { %v4584_v28 = vpop.f32.mrb[74].mxu1 }
 0x5a1   : > { %4946 = vst [vmem:[#allocation2 + $0xf9] sm:$0xff] %v8483_v1  ;;  %v8255_v55 = vadd.f32 %v4805_v12, %v3719_v60  ;;  %v5896_v48 = vadd.f32 %v8111_v56, %v4584_v28  ;;  %v4586_v4 = vpop.f32.mrb[75].mxu1  ;;  %4983 = vst.msk [vmem:[%s6469_s28 + $0x98] sm:$0xff] (!%p5118_p8), %vm4963_vm1, %v8552_v57 }
 0x5a3   : > { %v8482_v58 = vmax.f32 %v8255_v55, 0.0  ;;  %v4810_v62 = vadd.f32 %v5896_v48, %v7993_v8  ;;  %v8553_v31 = vmax.f32 (!%p5118_p8), %v8255_v55, 0.0 }
 0x5a4   : > { %v4589_v51 = vpop.f32.mrb[76].mxu1 }
 0x5a5   : > { %4947 = vst [vmem:[#allocation2 + $0x109] sm:$0xff] %v8482_v58  ;;  %v8262_v30 = vadd.f32 %v4810_v62, %v3720_v13  ;;  %v5897_v14 = vadd.f32 %v8111_v56, %v4589_v51  ;;  %v4591_v39 = vpop.f32.mrb[77].mxu1  ;;  %v3724_v58 = vld [vmem:[#allocation2 + $0x141] sm:$0xff]  ;;  %4984 = vst.msk [vmem:[%s6469_s28 + $0xa0] sm:$0xff] (!%p5118_p8), %vm4963_vm1, %v8553_v31 }
 0x5a7   : > { %v8481_v50 = vmax.f32 %v8262_v30, 0.0  ;;  %v4815_v32 = vadd.f32 %v5897_v14, %v8009_v41  ;;  %v8554_v59 = vmax.f32 (!%p5118_p8), %v8262_v30, 0.0 }
 0x5a8   : > { %v4594_v63 = vpop.f32.mrb[78].mxu1 }
 0x5a9   : > { %4948 = vst [vmem:[#allocation2 + $0x111] sm:$0xff] %v8481_v50  ;;  %v8269_v7 = vadd.f32 %v4815_v32, %v3721_v45  ;;  %v5898_v8 = vadd.f32 %v8111_v56, %v4594_v63  ;;  %v4596_v52 = vpop.f32.mrb[79].mxu1  ;;  %4985 = vst.msk [vmem:[%s6469_s28 + $0xa8] sm:$0xff] (!%p5118_p8), %vm4963_vm1, %v8554_v59 }
 0x5ab   : > { %v8480_v60 = vmax.f32 %v8269_v7, 0.0  ;;  %v4820_v12 = vadd.f32 %v5898_v8, %v8006_v49  ;;  %v8555_v23 = vmax.f32 (!%p5118_p8), %v8269_v7, 0.0 }
 0x5ac   : > { %v4599_v28 = vpop.f32.mrb[80].mxu1 }
 0x5ad   : > { %4949 = vst [vmem:[#allocation2 + $0x121] sm:$0xff] %v8480_v60  ;;  %v8276_v48 = vadd.f32 %v4820_v12, %v3722_v36  ;;  %v4601_v41 = vpop.f32.mrb[81].mxu1  ;;  %v5899_v50 = vadd.f32 %v8111_v56, %v4599_v28  ;;  %v3725_v28 = vld [vmem:[#allocation2 + $0x151] sm:$0xff]  ;;  %4986 = vst.msk [vmem:[%s6469_s28 + $0xb0] sm:$0xff] (!%p5118_p8), %vm4963_vm1, %v8555_v23 }
 0x5af   : > { %v8484_v4 = vmax.f32 %v8276_v48, 0.0  ;;  %v8556_v15 = vmax.f32 (!%p5118_p8), %v8276_v48, 0.0 }
 0x5b0   : > { %v4604_v13 = vpop.f32.mrb[82].mxu1 }
 0x5b1   : > { %4950 = vst [vmem:[#allocation2 + $0x129] sm:$0xff] %v8484_v4  ;;  %v4606_v62 = vpop.f32.mrb[83].mxu1  ;;  %v5900_v41 = vadd.f32 %v8111_v56, %v4604_v13  ;;  %4987 = vst.msk [vmem:[%s6469_s28 + $0xb8] sm:$0xff] (!%p5118_p8), %vm4963_vm1, %v8556_v15 }
 0x5b2   : > { %v3723_v62 = vld [vmem:[#allocation2 + $0x139] sm:$0xff] }
 0x5b4   : > { %v4609_v51 = vpop.f32.mrb[84].mxu1 }
 0x5b5   : > { %v4611_v14 = vpop.f32.mrb[85].mxu1 }
 0x5b8   : > { %v4614_v39 = vpop.f32.mrb[86].mxu1 }
 0x5b9   : > { %v4616_v45 = vpop.f32.mrb[87].mxu1 }
 0x5ba   : > { %v5902_v45 = vadd.f32 %v8111_v56, %v4614_v39 }
 0x5bc   : > { %v4619_v32 = vpop.f32.mrb[88].mxu1 }
 0x5bd   : > { %v4621_v49 = vpop.f32.mrb[89].mxu1 }
 0x5be   : > { %v5901_v49 = vadd.f32 %v8111_v56, %v4609_v51  ;;  %v3728_v51 = vld [vmem:[#allocation2 + $0x171] sm:$0xff] }
 0x5c0   : > { %v4624_v63 = vpop.f32.mrb[90].mxu1 }
 0x5c1   : > { %v4626_v8 = vpop.f32.mrb[91].mxu1 }
 0x5c4   : > { %v4629_v52 = vpop.f32.mrb[92].mxu1 }
 0x5c5   : > { %v4631_v60 = vpop.f32.mrb[93].mxu1 }
 0x5c6   : > { %v3726_v60 = vld [vmem:[#allocation2 + $0x159] sm:$0xff] }
 0x5c8   : > { %v4634_v36 = vpop.f32.mrb[94].mxu1 }
 0x5c9   : > { %v4636_v12 = vpop.f32.mrb[95].mxu1 }
 0x5cc   : > { %v5369_v1 = vpop.f32.mrb[96].mxu1 }
 0x5cd   : > { %v4830_v4 = vadd.f32 %v5900_v41, %v5369_v1  ;;  %v4824_v34 = vpop.f32.mrb[97].mxu1 }
 0x5ce   : > { %v4825_v14 = vadd.f32 %v5899_v50, %v4824_v34  ;;  %v5904_v34 = vadd.f32 %v8111_v56, %v4624_v63  ;;  %v5903_v50 = vadd.f32 %v8111_v56, %v4619_v32 }
 0x5cf   : > { %v8284_v9 = vadd.f32 %v4830_v4, %v3724_v58 }
 0x5d0   : > { %v8287_v8 = vadd.f32 %v4825_v14, %v3723_v62  ;;  %v5372_v12 = vpop.f32.mrb[98].mxu1 }
 0x5d1   : > { %v8489_v13 = vmax.f32 %v8284_v9, 0.0  ;;  %v4840_v2 = vadd.f32 %v5902_v45, %v5372_v12  ;;  %v4834_v43 = vpop.f32.mrb[99].mxu1  ;;  %v3727_v45 = vld [vmem:[#allocation2 + $0x169] sm:$0xff]  ;;  %v5906_v12 = vadd.f32 %v8111_v56, %v4634_v36  ;;  %v8558_v38 = vmax.f32 (!%p5118_p8), %v8284_v9, 0.0 }
 0x5d2   : > { %v8490_v1 = vmax.f32 %v8287_v8, 0.0  ;;  %v4835_v41 = vadd.f32 %v5901_v49, %v4834_v43  ;;  %v8557_v42 = vmax.f32 (!%p5118_p8), %v8287_v8, 0.0 }
 0x5d3   : > { %4952 = vst [vmem:[#allocation2 + $0x141] sm:$0xff] %v8489_v13  ;;  %v8294_v58 = vadd.f32 %v4840_v2, %v3726_v60  ;;  %v5905_v60 = vadd.f32 %v8111_v56, %v4629_v52  ;;  %v3730_v13 = vld [vmem:[#allocation2 + $0x189] sm:$0xff]  ;;  %v8546_v56 = vmax.f32 (!%p5118_p8), %v8206_v20, 0.0  ;;  %4989 = vst.msk [vmem:[%s6469_s28 + $0xc8] sm:$0xff] (!%p5118_p8), %vm4963_vm1, %v8558_v38 }
 0x5d4   : > { %4951 = vst [vmem:[#allocation2 + $0x139] sm:$0xff] %v8490_v1  ;;  %v4889_v4 = vadd.f32 %v4835_v41, %v3725_v28  ;;  %v5375_v39 = vpop.f32.mrb[100].mxu1  ;;  %4988 = vst.msk [vmem:[%s6469_s28 + $0xc0] sm:$0xff] (!%p5118_p8), %vm4963_vm1, %v8557_v42 }
 0x5d5   : > { %v4922_v62 = vmax.f32 %v8294_v58, 0.0  ;;  %v4850_v14 = vadd.f32 %v5904_v34, %v5375_v39  ;;  %v4844_v43 = vpop.f32.mrb[101].mxu1  ;;  %4977 = vst.msk [vmem:[%s6469_s28 + $0x68] sm:$0xff] (!%p5118_p8), %vm4963_vm1, %v8546_v56 }
 0x5d6   : > { %v4921_v49 = vmax.f32 %v4889_v4, 0.0  ;;  %v4845_v63 = vadd.f32 %v5903_v50, %v4844_v43 }
 0x5d7   : > { %4954 = vst [vmem:[#allocation2 + $0x159] sm:$0xff] %v4922_v62  ;;  %v4892_v2 = vadd.f32 %v4850_v14, %v3728_v51  ;;  %4991 = vst.msk [vmem:[%s6469_s28 + $0xd8] sm:$0xff] (!%p5118_p8), %vm4963_vm1, %v4922_v62 }
 0x5d8   : > { %4953 = vst [vmem:[#allocation2 + $0x151] sm:$0xff] %v4921_v49  ;;  %v4891_v32 = vadd.f32 %v4845_v63, %v3727_v45  ;;  %v5378_v1 = vpop.f32.mrb[102].mxu1  ;;  %4990 = vst.msk [vmem:[%s6469_s28 + $0xd0] sm:$0xff] (!%p5118_p8), %vm4963_vm1, %v4921_v49 }
 0x5d9   : > { %v4924_v28 = vmax.f32 %v4892_v2, 0.0  ;;  %v4860_v41 = vadd.f32 %v5906_v12, %v5378_v1  ;;  %v4854_v54 = vpop.f32.mrb[103].mxu1 }
 0x5da   : > { %v4923_v58 = vmax.f32 %v4891_v32, 0.0  ;;  %v4855_v34 = vadd.f32 %v5905_v60, %v4854_v54  ;;  %4962 = sbr.rel (%p5118_p8) target bundleno = 1505 (0x5e1), region = 48 }
 0x5db   : > { %4956 = vst [vmem:[#allocation2 + $0x171] sm:$0xff] %v4924_v28  ;;  %v4894_v39 = vadd.f32 %v4860_v41, %v3730_v13  ;;  %4993 = vst.msk [vmem:[%s6469_s28 + $0xe8] sm:$0xff] (!%p5118_p8), %vm4963_vm1, %v4924_v28 }
 0x5dc   : > { %4955 = vst [vmem:[#allocation2 + $0x169] sm:$0xff] %v4923_v58  ;;  %v4893_v50 = vadd.f32 %v4855_v34, %v3729_v21  ;;  %4992 = vst.msk [vmem:[%s6469_s28 + $0xe0] sm:$0xff] (!%p5118_p8), %vm4963_vm1, %v4923_v58 }
 0x5dd   : > { %v4926_v4 = vmax.f32 %v4894_v39, 0.0 }
 0x5de   : > { %v4925_v36 = vmax.f32 %v4893_v50, 0.0 }
 0x5df   : > { %4958 = vst [vmem:[#allocation2 + $0x189] sm:$0xff] %v4926_v4  ;;  %4995 = vst.msk [vmem:[%s6469_s28 + $0xf8] sm:$0xff] (!%p5118_p8), %vm4963_vm1, %v4926_v4 }
 0x5e0   : > { %4957 = vst [vmem:[#allocation2 + $0x181] sm:$0xff] %v4925_v36  ;;  %4994 = vst.msk [vmem:[%s6469_s28 + $0xf0] sm:$0xff] (!%p5118_p8), %vm4963_vm1, %v4925_v36 }
 0x5e1 PF: > { %s15_s22 = sadd.s32 1, %s6372_s22   ;;  %s8559_s18 = smov %s6364_s20 }
 0x5e2   : > { %p12_p9 = scmp.ge.s32.totalorder %s15_s22, 6   ;;  %s8560_s19 = smov %s6368_s21 }
 0x5e3   : > { %s8561_s20 = smov %s8564_s23  ;;  %s8562_s21 = smov %s8568_s24 }
 0x5e4   :  { %14 = sbr.rel (!%p12_p9) target bundleno = 3 (0x3), region = 95 }

</bundles_post_ra>
